<compile_context>
chip_gen: v7x
topology: tpu7x:2x2x1
jax: 0.10.0
libtpu: 0.0.40
codegen_flags: <defaults>
</compile_context>

<pallas_src>
import math

import jax
import jax.numpy as jnp
from jax.experimental import pallas as pl
from jax.experimental.pallas import tpu as pltpu

SQRT_HALF = math.sqrt(0.5)


def _round_up(x, m):
    return ((x + m - 1) // m) * m


def _cdiv(a, b):
    return (a + b - 1) // b


# ----------------------------------------------------------------------------- kernel


def _make_feature_transformer_kernel(residual_flags, num_layers):
    """Chain of GLU layers. Weights arrive pre-split (Wa, Wb) and pre-cast to bf16."""

    def kernel(x_ref, wa0_ref, wb0_ref, *rest):
        o_ref = rest[-1]
        if num_layers > 1:
            wa_rest_ref, wb_rest_ref = rest[0], rest[1]

        # Running activation kept in f32 (residual accumulation); MXU fed bf16.
        h = x_ref[...].astype(jnp.float32)
        for j in range(num_layers):
            if j == 0:
                wa = wa0_ref[...]
                wb = wb0_ref[...]
            else:
                wa = wa_rest_ref[j - 1]            # static slice of stacked weights
                wb = wb_rest_ref[j - 1]
            hb = h.astype(jnp.bfloat16)
            a = jnp.dot(hb, wa, preferred_element_type=jnp.float32)   # MXU
            b = jnp.dot(hb, wb, preferred_element_type=jnp.float32)   # MXU
            # GLU gate: a * sigmoid(b) = a / (1 + exp(-b)); exp + approx rcp on EUP.
            g = a * pl.reciprocal(1.0 + jnp.exp(-b), approx=True)
            if residual_flags[j]:
                h = h * SQRT_HALF + g
            else:
                h = g
        o_ref[...] = h.astype(o_ref.dtype)

    return kernel


# ----------------------------------------------------------------------------- tiling


def _vmem_bytes(tile_n, c_in, c_out, weight_bytes):
    io = 2 * tile_n * c_in * 4 + 2 * tile_n * c_out * 4   # double-buffered x / out tiles
    live = tile_n * (c_in + 4 * c_out) * 4                # h, a, b, g f32 temporaries
    return io + 2 * weight_bytes + live                   # weights also double-buffered


def _choose_tile_n(n_rows, c_in, c_out, weight_bytes, target_tile=512,
                   vmem_budget=24 << 20):
    """Pick a batch tile: multiple of 8 sublanes, target 512 rows, within a VMEM
    budget that fits v7x (64 MiB physical) / v5e (small default scoped VMEM)."""
    tile = min(target_tile, _round_up(n_rows, 8))
    tile = max(8, (tile // 8) * 8)
    while tile > 8 and _vmem_bytes(tile, c_in, c_out, weight_bytes) > vmem_budget:
        tile = max(8, (tile // 2 // 8) * 8)
    # Prefer >=2 grid steps: enables HBM/compute overlap and lets v7x shard the
    # "parallel" batch axis across its two TensorCores.
    if n_rows > 8 and _cdiv(n_rows, tile) < 2:
        tile = max(8, _round_up(_cdiv(n_rows, 2), 8))
    return tile


# ----------------------------------------------------------------------------- wrapper


def prepare_weights(weights, out_channels, mxu_dtype=jnp.bfloat16):
    """Split each [C_in, 2*C_out] GLU weight into (Wa, Wb) halves on the host (keeps
    the GLU split off a non-lane-aligned column in-kernel) and cast to the MXU
    operand dtype. Layers 1..L-1 all have fan_in == out_channels and are stacked."""
    was = [w[:, :out_channels].astype(mxu_dtype) for w in weights]
    wbs = [w[:, out_channels:].astype(mxu_dtype) for w in weights]
    wa0, wb0 = was[0], wbs[0]
    if len(weights) > 1:
        wa_rest = jnp.stack(was[1:], axis=0)
        wb_rest = jnp.stack(wbs[1:], axis=0)
    else:
        wa_rest = wb_rest = None
    return wa0, wb0, wa_rest, wb_rest


def feature_transformer_forward(x, weights, residual_flags, out_channels, *,
                                tile_n=None, mxu_dtype=jnp.bfloat16):
    """x: [N, C_in] f32; weights: list of [C_in_i, 2*out_channels] f32."""
    x = x.astype(jnp.float32)
    if not weights:                       # both GLU blocks are Identity
        return x

    N, c_in = x.shape
    c_out = out_channels
    num_layers = len(weights)

    w_itemsize = jnp.dtype(mxu_dtype).itemsize
    weight_bytes = sum(w.shape[0] * w.shape[1] for w in weights) * w_itemsize

    if tile_n is None:
        tile_n = _choose_tile_n(N, c_in, c_out, weight_bytes)
    tile_n = max(8, (tile_n // 8) * 8)

    n_pad = _round_up(N, tile_n)
    x_p = jnp.pad(x, ((0, n_pad - N), (0, 0))) if n_pad != N else x
    grid = (n_pad // tile_n,)

    wa0, wb0, wa_rest, wb_rest = prepare_weights(weights, c_out, mxu_dtype)
    kernel = _make_feature_transformer_kernel(
        tuple(bool(f) for f in residual_flags), num_layers)

    x_spec = pl.BlockSpec((tile_n, c_in), lambda i: (i, 0))
    out_spec = pl.BlockSpec((tile_n, c_out), lambda i: (i, 0))

    # Grid-invariant weights: index_map always returns zeros, so the pipeline
    # fetches each block exactly once and re-uses it on every grid step.
    w_inputs = [wa0, wb0]
    w_specs = [
        pl.BlockSpec(wa0.shape, lambda i: (0, 0)),
        pl.BlockSpec(wb0.shape, lambda i: (0, 0)),
    ]
    if num_layers > 1:
        w_inputs += [wa_rest, wb_rest]
        w_specs += [
            pl.BlockSpec(wa_rest.shape, lambda i: (0, 0, 0)),
            pl.BlockSpec(wb_rest.shape, lambda i: (0, 0, 0)),
        ]

    vmem_est = _vmem_bytes(tile_n, c_in, c_out, weight_bytes)
    vmem_limit = int(min(48 << 20, max(2 * vmem_est, 4 << 20)))

    flops = sum(4 * N * w.shape[0] * c_out for w in weights)      # two dots per layer
    transcendentals = N * c_out * num_layers                      # one exp per GLU gate
    bytes_accessed = (N * c_in + N * c_out) * 4 + weight_bytes

    out = pl.pallas_call(
        kernel,
        out_shape=jax.ShapeDtypeStruct((n_pad, c_out), x.dtype),
        grid_spec=pltpu.PrefetchScalarGridSpec(
            num_scalar_prefetch=0,
            grid=grid,
            in_specs=[x_spec] + w_specs,
            out_specs=out_spec,
        ),
        compiler_params=pltpu.CompilerParams(
            dimension_semantics=("parallel",),
            vmem_limit_bytes=vmem_limit,
        ),
        cost_estimate=pl.CostEstimate(
            flops=int(flops),
            transcendentals=int(transcendentals),
            bytes_accessed=int(bytes_accessed),
        ),
    )(x_p, *w_inputs)

    return out[:N] if n_pad != N else out


# ----------------------------------------------------------------------------- params / reference


def init_feature_transformer_params(key, in_channels, out_channels,
                                    num_shared_glu_layers, num_dependent_glu_layers):
    """Deterministic synthetic params mirroring the module's __init__ structure.

    Returns (weights, residual_flags). Note: the PyTorch module uses GLUBlock's
    default of 2 layers for the shared block whenever num_shared_glu_layers > 0.
    """
    weights = []
    residual_flags = []

    def linear_weight(k, fan_in, fan_out):
        # mimic torch Linear reset_parameters bound = 1/sqrt(fan_in)
        bound = 1.0 / math.sqrt(fan_in)
        return jax.random.uniform(k, (fan_in, fan_out), jnp.float32, -bound, bound)

    cur_in = in_channels
    shared_present = num_shared_glu_layers > 0
    if shared_present:
        n_shared = 2  # GLUBlock default num_glu_layers (module ignores the arg count)
        for i in range(n_shared):
            key, sub = jax.random.split(key)
            fan_in = cur_in if i == 0 else out_channels
            weights.append(linear_weight(sub, fan_in, 2 * out_channels))
            residual_flags.append(not (i == 0))        # shared: no_first_residual=True
        cur_in = out_channels

    if num_dependent_glu_layers > 0:
        dep_no_first_residual = not shared_present
        for i in range(num_dependent_glu_layers):
            key, sub = jax.random.split(key)
            fan_in = cur_in if i == 0 else out_channels
            weights.append(linear_weight(sub, fan_in, 2 * out_channels))
            residual_flags.append(not (dep_no_first_residual and i == 0))

    return weights, residual_flags


def feature_transformer_reference(x, weights, residual_flags, out_channels):
    """Pure-JAX f32 reference matching the PyTorch forward exactly."""
    h = x
    for w, has_residual in zip(weights, residual_flags):
        y = h @ w
        g = y[:, :out_channels] * jax.nn.sigmoid(y[:, out_channels:])
        h = h * SQRT_HALF + g if has_residual else g
    return h


if __name__ == "__main__":
    # Small tabular TabNet-like shapes; N=1024 with the 512-row tile gives a
    # 2-step parallel grid (pipelining + both v7x TensorCores used).
    N = 1024
    in_channels = 32
    out_channels = 32
    num_shared_glu_layers = 2
    num_dependent_glu_layers = 2

    key = jax.random.PRNGKey(0)
    key, kx = jax.random.split(key)
    x = jax.random.normal(kx, (N, in_channels), jnp.float32)

    weights, residual_flags = init_feature_transformer_params(
        key, in_channels, out_channels, num_shared_glu_layers, num_dependent_glu_layers
    )

    out = feature_transformer_forward(x, weights, residual_flags, out_channels)
    out = jax.block_until_ready(out)

    ref = feature_transformer_reference(x, weights, residual_flags, out_channels)
    assert out.shape == (N, out_channels)
    # bf16 MXU operands + approx reciprocal -> looser tolerance vs the f32 reference.
    assert jnp.allclose(out, ref, atol=5e-2, rtol=5e-2), "mismatch vs pure-JAX reference"

    print("KERNEL_OK")
</pallas_src>

<mosaic_0001>
module attributes {stable_mosaic.version = 11 : i64} {
  func.func @kernel(%arg0: i32, %arg1: memref<512x32xf32, #tpu.memory_space<vmem>>, %arg2: memref<32x32xbf16, #tpu.memory_space<vmem>>, %arg3: memref<32x32xbf16, #tpu.memory_space<vmem>>, %arg4: memref<3x32x32xbf16, #tpu.memory_space<vmem>>, %arg5: memref<3x32x32xbf16, #tpu.memory_space<vmem>>, %arg6: memref<512x32xf32, #tpu.memory_space<vmem>>) attributes {dimension_semantics = [#tpu.dimension_semantics<parallel>], iteration_bounds = array<i64: 2>, scalar_prefetch = 0 : i64, scratch_operands = 0 : i64, tpu.core_type = #tpu.core_type<tc>, window_params = [{transform_indices = @transform_0, window_bounds = array<i64: 512, 32>}, {pipeline_mode = #tpu.pipeline_mode<synchronous>, transform_indices = @transform_1, window_bounds = array<i64: 32, 32>}, {pipeline_mode = #tpu.pipeline_mode<synchronous>, transform_indices = @transform_2, window_bounds = array<i64: 32, 32>}, {pipeline_mode = #tpu.pipeline_mode<synchronous>, transform_indices = @transform_3, window_bounds = array<i64: 3, 32, 32>}, {pipeline_mode = #tpu.pipeline_mode<synchronous>, transform_indices = @transform_4, window_bounds = array<i64: 3, 32, 32>}, {transform_indices = @transform_5, window_bounds = array<i64: 512, 32>}]} {
    %c0 = arith.constant 0 : index
    %c0_0 = arith.constant 0 : index
    %0 = vector.load %arg1[%c0, %c0_0] : memref<512x32xf32, #tpu.memory_space<vmem>>, vector<512x32xf32>
    %c0_1 = arith.constant 0 : index
    %c0_2 = arith.constant 0 : index
    %1 = vector.load %arg2[%c0_1, %c0_2] : memref<32x32xbf16, #tpu.memory_space<vmem>>, vector<32x32xbf16>
    %c0_3 = arith.constant 0 : index
    %c0_4 = arith.constant 0 : index
    %2 = vector.load %arg3[%c0_3, %c0_4] : memref<32x32xbf16, #tpu.memory_space<vmem>>, vector<32x32xbf16>
    %3 = arith.truncf %0 : vector<512x32xf32> to vector<512x32xbf16>
    %cst = arith.constant dense<0.000000e+00> : vector<512x32xf32>
    %4 = tpu.matmul %3, %1, %cst {dimension_numbers = #tpu.dot_dimension_numbers<[1], [0], [0], [1], [0, 0, 1, 1], [], []>} : vector<512x32xbf16>, vector<32x32xbf16>, vector<512x32xf32> -> vector<512x32xf32>
    %cst_5 = arith.constant dense<0.000000e+00> : vector<512x32xf32>
    %5 = tpu.matmul %3, %2, %cst_5 {dimension_numbers = #tpu.dot_dimension_numbers<[1], [0], [0], [1], [0, 0, 1, 1], [], []>} : vector<512x32xbf16>, vector<32x32xbf16>, vector<512x32xf32> -> vector<512x32xf32>
    %cst_6 = arith.constant 0.000000e+00 : f32
    %6 = vector.broadcast %cst_6 : f32 to vector<512x32xf32>
    %7 = arith.subf %6, %5 : vector<512x32xf32>
    %8 = math.exp %7 : vector<512x32xf32>
    %cst_7 = arith.constant 1.000000e+00 : f32
    %9 = vector.broadcast %cst_7 : f32 to vector<512x32xf32>
    %10 = arith.addf %9, %8 : vector<512x32xf32>
    %11 = tpu.reciprocal %10 {approx = true} : vector<512x32xf32> -> vector<512x32xf32>
    %12 = arith.mulf %4, %11 : vector<512x32xf32>
    %c0_8 = arith.constant 0 : index
    %c0_9 = arith.constant 0 : index
    %c0_10 = arith.constant 0 : index
    %13 = vector.load %arg4[%c0_8, %c0_9, %c0_10] : memref<3x32x32xbf16, #tpu.memory_space<vmem>>, vector<1x32x32xbf16>
    %14 = vector.shape_cast %13 : vector<1x32x32xbf16> to vector<32x32xbf16>
    %c0_11 = arith.constant 0 : index
    %c0_12 = arith.constant 0 : index
    %c0_13 = arith.constant 0 : index
    %15 = vector.load %arg5[%c0_11, %c0_12, %c0_13] : memref<3x32x32xbf16, #tpu.memory_space<vmem>>, vector<1x32x32xbf16>
    %16 = vector.shape_cast %15 : vector<1x32x32xbf16> to vector<32x32xbf16>
    %17 = arith.truncf %12 : vector<512x32xf32> to vector<512x32xbf16>
    %cst_14 = arith.constant dense<0.000000e+00> : vector<512x32xf32>
    %18 = tpu.matmul %17, %14, %cst_14 {dimension_numbers = #tpu.dot_dimension_numbers<[1], [0], [0], [1], [0, 0, 1, 1], [], []>} : vector<512x32xbf16>, vector<32x32xbf16>, vector<512x32xf32> -> vector<512x32xf32>
    %cst_15 = arith.constant dense<0.000000e+00> : vector<512x32xf32>
    %19 = tpu.matmul %17, %16, %cst_15 {dimension_numbers = #tpu.dot_dimension_numbers<[1], [0], [0], [1], [0, 0, 1, 1], [], []>} : vector<512x32xbf16>, vector<32x32xbf16>, vector<512x32xf32> -> vector<512x32xf32>
    %cst_16 = arith.constant 0.000000e+00 : f32
    %20 = vector.broadcast %cst_16 : f32 to vector<512x32xf32>
    %21 = arith.subf %20, %19 : vector<512x32xf32>
    %22 = math.exp %21 : vector<512x32xf32>
    %cst_17 = arith.constant 1.000000e+00 : f32
    %23 = vector.broadcast %cst_17 : f32 to vector<512x32xf32>
    %24 = arith.addf %23, %22 : vector<512x32xf32>
    %25 = tpu.reciprocal %24 {approx = true} : vector<512x32xf32> -> vector<512x32xf32>
    %26 = arith.mulf %18, %25 : vector<512x32xf32>
    %cst_18 = arith.constant 0.707106769 : f32
    %27 = vector.broadcast %cst_18 : f32 to vector<512x32xf32>
    %28 = arith.mulf %12, %27 : vector<512x32xf32>
    %29 = arith.addf %28, %26 : vector<512x32xf32>
    %c1 = arith.constant 1 : index
    %c0_19 = arith.constant 0 : index
    %c0_20 = arith.constant 0 : index
    %30 = vector.load %arg4[%c1, %c0_19, %c0_20] : memref<3x32x32xbf16, #tpu.memory_space<vmem>>, vector<1x32x32xbf16>
    %31 = vector.shape_cast %30 : vector<1x32x32xbf16> to vector<32x32xbf16>
    %c1_21 = arith.constant 1 : index
    %c0_22 = arith.constant 0 : index
    %c0_23 = arith.constant 0 : index
    %32 = vector.load %arg5[%c1_21, %c0_22, %c0_23] : memref<3x32x32xbf16, #tpu.memory_space<vmem>>, vector<1x32x32xbf16>
    %33 = vector.shape_cast %32 : vector<1x32x32xbf16> to vector<32x32xbf16>
    %34 = arith.truncf %29 : vector<512x32xf32> to vector<512x32xbf16>
    %cst_24 = arith.constant dense<0.000000e+00> : vector<512x32xf32>
    %35 = tpu.matmul %34, %31, %cst_24 {dimension_numbers = #tpu.dot_dimension_numbers<[1], [0], [0], [1], [0, 0, 1, 1], [], []>} : vector<512x32xbf16>, vector<32x32xbf16>, vector<512x32xf32> -> vector<512x32xf32>
    %cst_25 = arith.constant dense<0.000000e+00> : vector<512x32xf32>
    %36 = tpu.matmul %34, %33, %cst_25 {dimension_numbers = #tpu.dot_dimension_numbers<[1], [0], [0], [1], [0, 0, 1, 1], [], []>} : vector<512x32xbf16>, vector<32x32xbf16>, vector<512x32xf32> -> vector<512x32xf32>
    %cst_26 = arith.constant 0.000000e+00 : f32
    %37 = vector.broadcast %cst_26 : f32 to vector<512x32xf32>
    %38 = arith.subf %37, %36 : vector<512x32xf32>
    %39 = math.exp %38 : vector<512x32xf32>
    %cst_27 = arith.constant 1.000000e+00 : f32
    %40 = vector.broadcast %cst_27 : f32 to vector<512x32xf32>
    %41 = arith.addf %40, %39 : vector<512x32xf32>
    %42 = tpu.reciprocal %41 {approx = true} : vector<512x32xf32> -> vector<512x32xf32>
    %43 = arith.mulf %35, %42 : vector<512x32xf32>
    %cst_28 = arith.constant 0.707106769 : f32
    %44 = vector.broadcast %cst_28 : f32 to vector<512x32xf32>
    %45 = arith.mulf %29, %44 : vector<512x32xf32>
    %46 = arith.addf %45, %43 : vector<512x32xf32>
    %c2 = arith.constant 2 : index
    %c0_29 = arith.constant 0 : index
    %c0_30 = arith.constant 0 : index
    %47 = vector.load %arg4[%c2, %c0_29, %c0_30] : memref<3x32x32xbf16, #tpu.memory_space<vmem>>, vector<1x32x32xbf16>
    %48 = vector.shape_cast %47 : vector<1x32x32xbf16> to vector<32x32xbf16>
    %c2_31 = arith.constant 2 : index
    %c0_32 = arith.constant 0 : index
    %c0_33 = arith.constant 0 : index
    %49 = vector.load %arg5[%c2_31, %c0_32, %c0_33] : memref<3x32x32xbf16, #tpu.memory_space<vmem>>, vector<1x32x32xbf16>
    %50 = vector.shape_cast %49 : vector<1x32x32xbf16> to vector<32x32xbf16>
    %51 = arith.truncf %46 : vector<512x32xf32> to vector<512x32xbf16>
    %cst_34 = arith.constant dense<0.000000e+00> : vector<512x32xf32>
    %52 = tpu.matmul %51, %48, %cst_34 {dimension_numbers = #tpu.dot_dimension_numbers<[1], [0], [0], [1], [0, 0, 1, 1], [], []>} : vector<512x32xbf16>, vector<32x32xbf16>, vector<512x32xf32> -> vector<512x32xf32>
    %cst_35 = arith.constant dense<0.000000e+00> : vector<512x32xf32>
    %53 = tpu.matmul %51, %50, %cst_35 {dimension_numbers = #tpu.dot_dimension_numbers<[1], [0], [0], [1], [0, 0, 1, 1], [], []>} : vector<512x32xbf16>, vector<32x32xbf16>, vector<512x32xf32> -> vector<512x32xf32>
    %cst_36 = arith.constant 0.000000e+00 : f32
    %54 = vector.broadcast %cst_36 : f32 to vector<512x32xf32>
    %55 = arith.subf %54, %53 : vector<512x32xf32>
    %56 = math.exp %55 : vector<512x32xf32>
    %cst_37 = arith.constant 1.000000e+00 : f32
    %57 = vector.broadcast %cst_37 : f32 to vector<512x32xf32>
    %58 = arith.addf %57, %56 : vector<512x32xf32>
    %59 = tpu.reciprocal %58 {approx = true} : vector<512x32xf32> -> vector<512x32xf32>
    %60 = arith.mulf %52, %59 : vector<512x32xf32>
    %cst_38 = arith.constant 0.707106769 : f32
    %61 = vector.broadcast %cst_38 : f32 to vector<512x32xf32>
    %62 = arith.mulf %46, %61 : vector<512x32xf32>
    %63 = arith.addf %62, %60 : vector<512x32xf32>
    %c0_39 = arith.constant 0 : index
    %c0_40 = arith.constant 0 : index
    %64 = vector.load %arg6[%c0_39, %c0_40] : memref<512x32xf32, #tpu.memory_space<vmem>>, vector<512x32xf32>
    tpu.vector_store %arg6[%c0_39, %c0_40], %63 {strides = array<i32>} : memref<512x32xf32, #tpu.memory_space<vmem>>, vector<512x32xf32>,
    return
  }
  func.func @transform_0(%arg0: i32) -> (i32, i32) {
    %c0_i32 = arith.constant 0 : i32
    %c0_i32_0 = arith.constant 0 : i32
    return %arg0, %c0_i32 : i32, i32
  }
  func.func @transform_1(%arg0: i32) -> (i32, i32) {
    %c0_i32 = arith.constant 0 : i32
    %c0_i32_0 = arith.constant 0 : i32
    %c0_i32_1 = arith.constant 0 : i32
    return %c0_i32, %c0_i32_0 : i32, i32
  }
  func.func @transform_2(%arg0: i32) -> (i32, i32) {
    %c0_i32 = arith.constant 0 : i32
    %c0_i32_0 = arith.constant 0 : i32
    %c0_i32_1 = arith.constant 0 : i32
    return %c0_i32, %c0_i32_0 : i32, i32
  }
  func.func @transform_3(%arg0: i32) -> (i32, i32, i32) {
    %c0_i32 = arith.constant 0 : i32
    %c0_i32_0 = arith.constant 0 : i32
    %c0_i32_1 = arith.constant 0 : i32
    %c0_i32_2 = arith.constant 0 : i32
    return %c0_i32, %c0_i32_0, %c0_i32_1 : i32, i32, i32
  }
  func.func @transform_4(%arg0: i32) -> (i32, i32, i32) {
    %c0_i32 = arith.constant 0 : i32
    %c0_i32_0 = arith.constant 0 : i32
    %c0_i32_1 = arith.constant 0 : i32
    %c0_i32_2 = arith.constant 0 : i32
    return %c0_i32, %c0_i32_0, %c0_i32_1 : i32, i32, i32
  }
  func.func @transform_5(%arg0: i32) -> (i32, i32) {
    %c0_i32 = arith.constant 0 : i32
    %c0_i32_0 = arith.constant 0 : i32
    return %arg0, %c0_i32 : i32, i32
  }
}

</mosaic_0001>

<bundles_post_ra>
// kernel: tpu_custom_call.1
= control target key start
LH: loop header
LB: loop body
LE: loop exit
PB: predicated region body
PF: predicated region fallthrough
CT: control target
= control target key end

     0   :  { %s7491_s18 = smov 0   ;;  %s9650_s0 = inlined_call_operand.vmem [shape: f32[1024,32], index: 0, kind: input, shape index: {}]   ;;  %s9651_s1 = inlined_call_operand.vmem [shape: bf16[32,32], index: 1, kind: input, shape index: {}]   ;;  %s9652_s2 = inlined_call_operand.vmem [shape: bf16[32,32], index: 2, kind: input, shape index: {}]   ;;  %s9653_s3 = inlined_call_operand.vmem [shape: bf16[3,32,32], index: 3, kind: input, shape index: {}]   ;;  %s9654_s4 = inlined_call_operand.vmem [shape: bf16[3,32,32], index: 4, kind: input, shape index: {}]   ;;  %s9655_s5 = inlined_call_operand.vmem [shape: f32[1024,32], index: 5, kind: output, shape index: {}]  }
   0x1 LB: > { %s5290_s19 = sadd.s32 4294967295, %s7459_s18   ;;  %p5294_p0 = scmp.ge.s32.totalorder %s7459_s18, 1  ;;  %s7459_s18 = sphi %s7491_s18, %s15_s18  }
   0x2   : > { %p188_p1 = scmp.lt.s32.totalorder %s7459_s18, 3 }
   0x4   : > { %p189_p2 = pnand %p5294_p0, %p188_p1 }
   0x6   : > { %192 = sbr.rel (%p189_p2) target bundleno = 1165 (0x48d), region = 40 }
   0xd   : > { %v6413_v0 = vld [vmem:[%s9652_s2] sm:$0xff]   ;;  %s5295_s22 = sshll.u32 %s5290_s19, 6  ;;  %v6414_v1 = vld [vmem:[%s9652_s2 + $0x8] sm:$0xff]   ;;  %vm345_vm0 = vcmask 261120  }
   0xe   : > { %p217_p3 = scmp.lt.s32.totalorder %s5295_s22, 127  ;;  %5929 = vmatprep.subr.bf16.mxu1 %v6413_v0  ;;  %v6415_v2 = vld [vmem:[%s9651_s1] sm:$0xff]   ;;  %v6416_v3 = vld [vmem:[%s9651_s1 + $0x8] sm:$0xff]  }
   0xf   : > { %5930 = vmatpush3.bf16.msra.mxu1 %v6413_v0  ;;  %5861 = vmatprep.subr.bf16.mxu0 %v6415_v2  ;;  %v6417_v4 = vld [vmem:[%s9654_s4] sm:$0xff]   ;;  %v6419_v15 = vld [vmem:[%s9654_s4 + $0x8] sm:$0xff]  }
  0x10   : > { %s9963_s22 = smov (!%p217_p3, %s5295_s22), 127  ;;  %5931 = vmatprep.subr.bf16.mxu1 %v6414_v1  ;;  %5862 = vmatpush3.bf16.msra.mxu0 %v6415_v2  ;;  %v6418_v5 = vld [vmem:[%s9653_s3] sm:$0xff]  }
  0x11   : > { %s5296_s6 = sshll.u32 %s9963_s22, 3  ;;  %5863 = vmatprep.subr.bf16.mxu0 %v6416_v3 }
  0x12   : > { %s7522_s9 = scalar_lea.vmem %s9650_s0, %s5296_s6  ;;  %s9290_s12 = scalar_lea.vmem %s9655_s5, %s5296_s6 }
  0x13   : > { %5932 = vmatpush3.bf16.msra.mxu1 %v6414_v1  ;;  %v229_v6 = vld [vmem:[%s7522_s9] sm:$0xff]  ;;  %v230_v7 = vld [vmem:[%s7522_s9 + $0x8] sm:$0xff]  ;;  %v231_v8 = vld [vmem:[%s7522_s9 + $0x10] sm:$0xff] }
  0x14   : > { %v301_v9 = vpack.c.bf16 %v230_v7, %v229_v6  ;;  %v232_v10 = vld [vmem:[%s7522_s9 + $0x18] sm:$0xff]  ;;  %v233_v11 = vld [vmem:[%s7522_s9 + $0x20] sm:$0xff]  ;;  %v234_v12 = vld [vmem:[%s7522_s9 + $0x28] sm:$0xff]  ;;  %6065 = vmatprep.subr.bf16.mxu1 %v6417_v4  ;;  %5864 = vmatpush3.bf16.msra.mxu0 %v6416_v3 }
  0x15   : > { %v302_v13 = vpack.c.bf16 %v232_v10, %v231_v8  ;;  %v303_v14 = vpack.c.bf16 %v234_v12, %v233_v11  ;;  %5997 = vmatprep.subr.bf16.mxu0 %v6418_v5  ;;  %v235_v16 = vld [vmem:[%s7522_s9 + $0x30] sm:$0xff]  ;;  %v236_v17 = vld [vmem:[%s7522_s9 + $0x38] sm:$0xff]  ;;  %v237_v18 = vld [vmem:[%s7522_s9 + $0x40] sm:$0xff] }
  0x16   : > { %5933 = vmatprep.mubr.msk.bf16.mxu1 %vm345_vm0, %v301_v9  ;;  %5865 = vmatprep.mubr.msk.bf16.mxu0 %vm345_vm0, %v301_v9  ;;  %v238_v19 = vld [vmem:[%s7522_s9 + $0x48] sm:$0xff]  ;;  %v304_v20 = vpack.c.bf16 %v236_v17, %v235_v16  ;;  %v239_v22 = vld [vmem:[%s7522_s9 + $0x50] sm:$0xff]  ;;  %v240_v23 = vld [vmem:[%s7522_s9 + $0x58] sm:$0xff] }
  0x17   : > { %5934 = vmatmul.mubr.msk.bf16.vlgmr.msra.gmra.mrb[0].mxu1 %vm345_vm0, %v302_v13  ;;  %5866 = vmatmul.mubr.msk.bf16.vlgmr.msra.gmra.mrb[0].mxu0 %vm345_vm0, %v302_v13  ;;  %v305_v21 = vpack.c.bf16 %v238_v19, %v237_v18  ;;  %v241_v24 = vld [vmem:[%s7522_s9 + $0x60] sm:$0xff]  ;;  %v242_v25 = vld [vmem:[%s7522_s9 + $0x68] sm:$0xff]  ;;  %v306_v26 = vpack.c.bf16 %v240_v23, %v239_v22  ;;  %v243_v28 = vld [vmem:[%s7522_s9 + $0x70] sm:$0xff] }
  0x18   : > { %5937 = vmatprep.mubr.msk.bf16.mxu1 %vm345_vm0, %v303_v14  ;;  %5869 = vmatprep.mubr.msk.bf16.mxu0 %vm345_vm0, %v303_v14  ;;  %v307_v27 = vpack.c.bf16 %v242_v25, %v241_v24  ;;  %v244_v29 = vld [vmem:[%s7522_s9 + $0x78] sm:$0xff]  ;;  %v245_v30 = vld [vmem:[%s7522_s9 + $0x80] sm:$0xff]  ;;  %v246_v31 = vld [vmem:[%s7522_s9 + $0x88] sm:$0xff] }
  0x19   : > { %6066 = vmatpush3.bf16.msra.mxu1 %v6417_v4  ;;  %5998 = vmatpush3.bf16.msra.mxu0 %v6418_v5  ;;  %v308_v32 = vpack.c.bf16 %v244_v29, %v243_v28  ;;  %v309_v33 = vpack.c.bf16 %v246_v31, %v245_v30  ;;  %v247_v34 = vld [vmem:[%s7522_s9 + $0x90] sm:$0xff]  ;;  %v248_v35 = vld [vmem:[%s7522_s9 + $0x98] sm:$0xff]  ;;  %v249_v36 = vld [vmem:[%s7522_s9 + $0xa0] sm:$0xff] }
  0x1a   : > { %6067 = vmatprep.subr.bf16.mxu1 %v6419_v15  ;;  %v250_v37 = vld [vmem:[%s7522_s9 + $0xa8] sm:$0xff]  ;;  %v310_v38 = vpack.c.bf16 %v248_v35, %v247_v34  ;;  %v251_v40 = vld [vmem:[%s7522_s9 + $0xb0] sm:$0xff]  ;;  %v252_v41 = vld [vmem:[%s7522_s9 + $0xb8] sm:$0xff] }
  0x1b   : > { %v311_v39 = vpack.c.bf16 %v250_v37, %v249_v36  ;;  %v253_v42 = vld [vmem:[%s7522_s9 + $0xc0] sm:$0xff]  ;;  %v254_v43 = vld [vmem:[%s7522_s9 + $0xc8] sm:$0xff]  ;;  %v312_v44 = vpack.c.bf16 %v252_v41, %v251_v40  ;;  %v255_v46 = vld [vmem:[%s7522_s9 + $0xd0] sm:$0xff] }
  0x1c   : > { %v313_v45 = vpack.c.bf16 %v254_v43, %v253_v42  ;;  %v256_v47 = vld [vmem:[%s7522_s9 + $0xd8] sm:$0xff]  ;;  %v257_v48 = vld [vmem:[%s7522_s9 + $0xe0] sm:$0xff]  ;;  %v258_v49 = vld [vmem:[%s7522_s9 + $0xe8] sm:$0xff] }
  0x1d   : > { %6068 = vmatpush3.bf16.msra.mxu1 %v6419_v15  ;;  %v314_v50 = vpack.c.bf16 %v256_v47, %v255_v46  ;;  %v315_v51 = vpack.c.bf16 %v258_v49, %v257_v48  ;;  %v259_v52 = vld [vmem:[%s7522_s9 + $0xf0] sm:$0xff]  ;;  %v260_v53 = vld [vmem:[%s7522_s9 + $0xf8] sm:$0xff]  ;;  %v261_v54 = vld [vmem:[%s7522_s9 + $0x100] sm:$0xff] }
  0x1e   : > { %v262_v55 = vld [vmem:[%s7522_s9 + $0x108] sm:$0xff]  ;;  %v316_v56 = vpack.c.bf16 %v260_v53, %v259_v52  ;;  %v263_v58 = vld [vmem:[%s7522_s9 + $0x110] sm:$0xff]  ;;  %v264_v59 = vld [vmem:[%s7522_s9 + $0x118] sm:$0xff] }
  0x1f   : > { %5938 = vmatmul.mubr.msk.bf16.gmra.mrb[4].mxu1 %vm345_vm0, %v304_v20  ;;  %5870 = vmatmul.mubr.msk.bf16.gmra.mrb[4].mxu0 %vm345_vm0, %v304_v20  ;;  %v317_v57 = vpack.c.bf16 %v262_v55, %v261_v54  ;;  %v265_v60 = vld [vmem:[%s7522_s9 + $0x120] sm:$0xff]  ;;  %v266_v61 = vld [vmem:[%s7522_s9 + $0x128] sm:$0xff]  ;;  %v318_v62 = vpack.c.bf16 %v264_v59, %v263_v58  ;;  %v267_v0 = vld [vmem:[%s7522_s9 + $0x130] sm:$0xff] }
  0x20   : > { %5941 = vmatprep.mubr.msk.bf16.mxu1 %vm345_vm0, %v305_v21  ;;  %5873 = vmatprep.mubr.msk.bf16.mxu0 %vm345_vm0, %v305_v21  ;;  %v319_v63 = vpack.c.bf16 %v266_v61, %v265_v60  ;;  %v268_v1 = vld [vmem:[%s7522_s9 + $0x138] sm:$0xff]  ;;  %v269_v2 = vld [vmem:[%s7522_s9 + $0x140] sm:$0xff]  ;;  %v270_v3 = vld [vmem:[%s7522_s9 + $0x148] sm:$0xff] }
  0x21   : > { %v320_v4 = vpack.c.bf16 %v268_v1, %v267_v0  ;;  %v321_v5 = vpack.c.bf16 %v270_v3, %v269_v2  ;;  %v271_v6 = vld [vmem:[%s7522_s9 + $0x150] sm:$0xff]  ;;  %v272_v7 = vld [vmem:[%s7522_s9 + $0x158] sm:$0xff]  ;;  %v273_v8 = vld [vmem:[%s7522_s9 + $0x160] sm:$0xff] }
  0x22   : > { %v274_v9 = vld [vmem:[%s7522_s9 + $0x168] sm:$0xff]  ;;  %v322_v10 = vpack.c.bf16 %v272_v7, %v271_v6  ;;  %v275_v12 = vld [vmem:[%s7522_s9 + $0x170] sm:$0xff]  ;;  %v276_v13 = vld [vmem:[%s7522_s9 + $0x178] sm:$0xff] }
  0x23   : > { %v323_v11 = vpack.c.bf16 %v274_v9, %v273_v8  ;;  %v277_v14 = vld [vmem:[%s7522_s9 + $0x180] sm:$0xff]  ;;  %v278_v15 = vld [vmem:[%s7522_s9 + $0x188] sm:$0xff]  ;;  %v324_v16 = vpack.c.bf16 %v276_v13, %v275_v12  ;;  %v279_v18 = vld [vmem:[%s7522_s9 + $0x190] sm:$0xff] }
  0x24   : > { %v325_v17 = vpack.c.bf16 %v278_v15, %v277_v14  ;;  %v280_v19 = vld [vmem:[%s7522_s9 + $0x198] sm:$0xff]  ;;  %v281_v20 = vld [vmem:[%s7522_s9 + $0x1a0] sm:$0xff]  ;;  %v282_v21 = vld [vmem:[%s7522_s9 + $0x1a8] sm:$0xff] }
  0x25   : > { %v326_v22 = vpack.c.bf16 %v280_v19, %v279_v18  ;;  %v327_v23 = vpack.c.bf16 %v282_v21, %v281_v20  ;;  %v283_v24 = vld [vmem:[%s7522_s9 + $0x1b0] sm:$0xff]  ;;  %v284_v25 = vld [vmem:[%s7522_s9 + $0x1b8] sm:$0xff]  ;;  %v6420_v30 = vld [vmem:[%s9653_s3 + $0x8] sm:$0xff]  }
  0x26   : > { %v328_v28 = vpack.c.bf16 %v284_v25, %v283_v24  ;;  %5999 = vmatprep.subr.bf16.mxu0 %v6420_v30  ;;  %v287_v31 = vld [vmem:[%s7522_s9 + $0x1d0] sm:$0xff]  ;;  %v290_v34 = vld [vmem:[%s7522_s9 + $0x1e8] sm:$0xff] }
  0x27   : > { %5942 = vmatmul.mubr.msk.bf16.gmra.mrb[8].mxu1 %vm345_vm0, %v306_v26  ;;  %5874 = vmatmul.mubr.msk.bf16.gmra.mrb[8].mxu0 %vm345_vm0, %v306_v26  ;;  %v285_v26 = vld [vmem:[%s7522_s9 + $0x1c0] sm:$0xff]  ;;  %v291_v37 = vld [vmem:[%s7522_s9 + $0x1f0] sm:$0xff] }
  0x28   : > { %5945 = vmatprep.mubr.msk.bf16.mxu1 %vm345_vm0, %v307_v27  ;;  %5877 = vmatprep.mubr.msk.bf16.mxu0 %vm345_vm0, %v307_v27  ;;  %v286_v27 = vld [vmem:[%s7522_s9 + $0x1c8] sm:$0xff] }
  0x29   : > { %v329_v29 = vpack.c.bf16 %v286_v27, %v285_v26  ;;  %6000 = vmatpush3.bf16.msra.mxu0 %v6420_v30 }
  0x2f   : > { %5946 = vmatmul.mubr.msk.bf16.gmra.mrb[12].mxu1 %vm345_vm0, %v308_v32  ;;  %5878 = vmatmul.mubr.msk.bf16.gmra.mrb[12].mxu0 %vm345_vm0, %v308_v32  ;;  %v288_v32 = vld [vmem:[%s7522_s9 + $0x1d8] sm:$0xff] }
  0x30   : > { %5949 = vmatprep.mubr.msk.bf16.mxu1 %vm345_vm0, %v309_v33  ;;  %5881 = vmatprep.mubr.msk.bf16.mxu0 %vm345_vm0, %v309_v33  ;;  %v289_v33 = vld [vmem:[%s7522_s9 + $0x1e0] sm:$0xff]  ;;  %v330_v35 = vpack.c.bf16 %v288_v32, %v287_v31 }
  0x31   : > { %v331_v36 = vpack.c.bf16 %v290_v34, %v289_v33 }
  0x37   : > { %5950 = vmatmul.mubr.msk.bf16.gmra.mrb[16].mxu1 %vm345_vm0, %v310_v38  ;;  %5882 = vmatmul.mubr.msk.bf16.gmra.mrb[16].mxu0 %vm345_vm0, %v310_v38  ;;  %v292_v38 = vld [vmem:[%s7522_s9 + $0x1f8] sm:$0xff] }
  0x38   : > { %5953 = vmatprep.mubr.msk.bf16.mxu1 %vm345_vm0, %v311_v39  ;;  %5885 = vmatprep.mubr.msk.bf16.mxu0 %vm345_vm0, %v311_v39  ;;  %v332_v39 = vpack.c.bf16 %v292_v38, %v291_v37 }
  0x3f   : > { %5954 = vmatmul.mubr.msk.bf16.gmra.mrb[20].mxu1 %vm345_vm0, %v312_v44  ;;  %5886 = vmatmul.mubr.msk.bf16.gmra.mrb[20].mxu0 %vm345_vm0, %v312_v44 }
  0x40   : > { %5957 = vmatprep.mubr.msk.bf16.mxu1 %vm345_vm0, %v313_v45  ;;  %5889 = vmatprep.mubr.msk.bf16.mxu0 %vm345_vm0, %v313_v45 }
  0x47   : > { %5958 = vmatmul.mubr.msk.bf16.gmra.mrb[24].mxu1 %vm345_vm0, %v314_v50  ;;  %5890 = vmatmul.mubr.msk.bf16.gmra.mrb[24].mxu0 %vm345_vm0, %v314_v50 }
  0x48   : > { %5961 = vmatprep.mubr.msk.bf16.mxu1 %vm345_vm0, %v315_v51  ;;  %5893 = vmatprep.mubr.msk.bf16.mxu0 %vm345_vm0, %v315_v51 }
  0x4f   : > { %5962 = vmatmul.mubr.msk.bf16.gmra.mrb[28].mxu1 %vm345_vm0, %v316_v56  ;;  %5894 = vmatmul.mubr.msk.bf16.gmra.mrb[28].mxu0 %vm345_vm0, %v316_v56 }
  0x50   : > { %5965 = vmatprep.mubr.msk.bf16.mxu1 %vm345_vm0, %v317_v57  ;;  %5897 = vmatprep.mubr.msk.bf16.mxu0 %vm345_vm0, %v317_v57 }
  0x57   : > { %5966 = vmatmul.mubr.msk.bf16.gmra.mrb[32].mxu1 %vm345_vm0, %v318_v62  ;;  %5898 = vmatmul.mubr.msk.bf16.gmra.mrb[32].mxu0 %vm345_vm0, %v318_v62 }
  0x58   : > { %5969 = vmatprep.mubr.msk.bf16.mxu1 %vm345_vm0, %v319_v63  ;;  %5901 = vmatprep.mubr.msk.bf16.mxu0 %vm345_vm0, %v319_v63 }
  0x5f   : > { %5970 = vmatmul.mubr.msk.bf16.gmra.mrb[36].mxu1 %vm345_vm0, %v320_v4  ;;  %5902 = vmatmul.mubr.msk.bf16.gmra.mrb[36].mxu0 %vm345_vm0, %v320_v4 }
  0x60   : > { %5973 = vmatprep.mubr.msk.bf16.mxu1 %vm345_vm0, %v321_v5  ;;  %5905 = vmatprep.mubr.msk.bf16.mxu0 %vm345_vm0, %v321_v5 }
  0x67   : > { %5974 = vmatmul.mubr.msk.bf16.gmra.mrb[40].mxu1 %vm345_vm0, %v322_v10  ;;  %5906 = vmatmul.mubr.msk.bf16.gmra.mrb[40].mxu0 %vm345_vm0, %v322_v10 }
  0x68   : > { %5977 = vmatprep.mubr.msk.bf16.mxu1 %vm345_vm0, %v323_v11  ;;  %5909 = vmatprep.mubr.msk.bf16.mxu0 %vm345_vm0, %v323_v11 }
  0x6f   : > { %5978 = vmatmul.mubr.msk.bf16.gmra.mrb[44].mxu1 %vm345_vm0, %v324_v16  ;;  %5910 = vmatmul.mubr.msk.bf16.gmra.mrb[44].mxu0 %vm345_vm0, %v324_v16 }
  0x70   : > { %5981 = vmatprep.mubr.msk.bf16.mxu1 %vm345_vm0, %v325_v17  ;;  %5913 = vmatprep.mubr.msk.bf16.mxu0 %vm345_vm0, %v325_v17 }
  0x77   : > { %5982 = vmatmul.mubr.msk.bf16.gmra.mrb[48].mxu1 %vm345_vm0, %v326_v22  ;;  %5914 = vmatmul.mubr.msk.bf16.gmra.mrb[48].mxu0 %vm345_vm0, %v326_v22 }
  0x78   : > { %5985 = vmatprep.mubr.msk.bf16.mxu1 %vm345_vm0, %v327_v23  ;;  %5917 = vmatprep.mubr.msk.bf16.mxu0 %vm345_vm0, %v327_v23 }
  0x7f   : > { %5986 = vmatmul.mubr.msk.bf16.gmra.mrb[52].mxu1 %vm345_vm0, %v328_v28  ;;  %5918 = vmatmul.mubr.msk.bf16.gmra.mrb[52].mxu0 %vm345_vm0, %v328_v28 }
  0x80   : > { %5989 = vmatprep.mubr.msk.bf16.mxu1 %vm345_vm0, %v329_v29  ;;  %5921 = vmatprep.mubr.msk.bf16.mxu0 %vm345_vm0, %v329_v29 }
  0x87   : > { %5990 = vmatmul.mubr.msk.bf16.gmra.mrb[56].mxu1 %vm345_vm0, %v330_v35  ;;  %5922 = vmatmul.mubr.msk.bf16.gmra.mrb[56].mxu0 %vm345_vm0, %v330_v35 }
  0x88   : > { %5993 = vmatprep.mubr.msk.bf16.mxu1 %vm345_vm0, %v331_v36  ;;  %5925 = vmatprep.mubr.msk.bf16.mxu0 %vm345_vm0, %v331_v36 }
  0x8f   : > { %5994 = vmatmul.mubr.msk.bf16.gmra.mrb[60].mxu1 %vm345_vm0, %v332_v39  ;;  %5926 = vmatmul.mubr.msk.bf16.gmra.mrb[60].mxu0 %vm345_vm0, %v332_v39 }
  0xea   : > { %v5935_v40 = vpop.f32.mrb[0].mxu1  ;;  %v7661_v43 = vpop.f32.mrb[0].mxu0 }
  0xeb   : > { %v1034_v41 = vsub.f32 0.0, %v5935_v40  ;;  %v777_v42 = vpop.f32.mrb[1].mxu1  ;;  %v7663_v46 = vpop.f32.mrb[1].mxu0 }
  0xec   : > { %v1032_v44 = vsub.f32 0.0, %v777_v42  ;;  %v5936_v45 = vpop.f32.mrb[2].mxu1  ;;  %v7665_v50 = vpop.f32.mrb[2].mxu0 }
  0xed   : > { %v1100_v47 = vmul.f32 1.442695, %v1034_v41  ;;  %v1035_v48 = vsub.f32 0.0, %v5936_v45  ;;  %v780_v49 = vpop.f32.mrb[3].mxu1  ;;  %v7667_v53 = vpop.f32.mrb[3].mxu0 }
  0xee   : > { %v1096_v51 = vmul.f32 1.442695, %v1032_v44  ;;  %v1033_v52 = vsub.f32 0.0, %v780_v49 }
  0xef   : > { %6429 = vpow2.f32 %v1100_v47  ;;  %v1102_v54 = vmul.f32 1.442695, %v1035_v48 }
  0xf0   : > { %6431 = vpow2.f32 %v1096_v51  ;;  %v1098_v55 = vmul.f32 1.442695, %v1033_v52 }
  0xf1   : > { %6433 = vpow2.f32 %v1102_v54 }
  0xf2   : > { %6435 = vpow2.f32 %v1098_v55  ;;  %v5939_v56 = vpop.f32.mrb[4].mxu1  ;;  %v7669_v59 = vpop.f32.mrb[4].mxu0 }
  0xf3   : > { %v1038_v57 = vsub.f32 0.0, %v5939_v56  ;;  %v793_v58 = vpop.f32.mrb[5].mxu1  ;;  %v7671_v62 = vpop.f32.mrb[5].mxu0 }
  0xf4   : > { %v1036_v60 = vsub.f32 0.0, %v793_v58  ;;  %v5940_v61 = vpop.f32.mrb[6].mxu1  ;;  %v7673_v2 = vpop.f32.mrb[6].mxu0 }
  0xf5   : > { %v1108_v63 = vmul.f32 1.442695, %v1038_v57  ;;  %v1039_v0 = vsub.f32 0.0, %v5940_v61  ;;  %v796_v1 = vpop.f32.mrb[7].mxu1  ;;  %v7675_v5 = vpop.f32.mrb[7].mxu0 }
  0xf6   : > { %v1104_v3 = vmul.f32 1.442695, %v1036_v60  ;;  %v1037_v4 = vsub.f32 0.0, %v796_v1 }
  0xf7   : > { %6437 = vpow2.f32 %v1108_v63  ;;  %v1110_v6 = vmul.f32 1.442695, %v1039_v0 }
  0xf8   : > { %6439 = vpow2.f32 %v1104_v3  ;;  %v1106_v7 = vmul.f32 1.442695, %v1037_v4 }
  0xf9   : > { %v6430_v8 = vpop.eup %6429  ;;  %6441 = vpow2.f32 %v1110_v6 }
  0xfa   : > { %v6432_v9 = vpop.eup %6431  ;;  %v1226_v10 = vadd.f32 1.0, %v6430_v8  ;;  %6443 = vpow2.f32 %v1106_v7  ;;  %v5943_v11 = vpop.f32.mrb[8].mxu1 }
  0xfb   : > { %v6434_v12 = vpop.eup %6433  ;;  %v1224_v13 = vadd.f32 1.0, %v6432_v9  ;;  %v1042_v14 = vsub.f32 0.0, %v5943_v11  ;;  %v809_v15 = vpop.f32.mrb[9].mxu1 }
  0xfc   : > { %v7677_v16 = vpop.f32.mrb[8].mxu0  ;;  %v6436_v17 = vpop.eup %6435  ;;  %6445 = vrcp.f32 %v1226_v10  ;;  %v1227_v18 = vadd.f32 1.0, %v6434_v12  ;;  %v1040_v19 = vsub.f32 0.0, %v809_v15 }
  0xfd   : > { %v5944_v20 = vpop.f32.mrb[10].mxu1  ;;  %v7679_v21 = vpop.f32.mrb[9].mxu0  ;;  %6447 = vrcp.f32 %v1224_v13  ;;  %v1225_v22 = vadd.f32 1.0, %v6436_v17  ;;  %v1116_v23 = vmul.f32 1.442695, %v1042_v14 }
  0xfe   : > { %v1043_v24 = vsub.f32 0.0, %v5944_v20  ;;  %v812_v25 = vpop.f32.mrb[11].mxu1  ;;  %v7681_v26 = vpop.f32.mrb[10].mxu0  ;;  %6449 = vrcp.f32 %v1227_v18  ;;  %v1112_v27 = vmul.f32 1.442695, %v1040_v19 }
  0xff   : > { %v1041_v28 = vsub.f32 0.0, %v812_v25  ;;  %v7683_v29 = vpop.f32.mrb[11].mxu0  ;;  %6451 = vrcp.f32 %v1225_v22  ;;  %v6421_v25 = vld [vmem:[%s9654_s4 + $0x10] sm:$0xff]  }
 0x100   : > { %v1118_v30 = vmul.f32 1.442695, %v1043_v24  ;;  %6453 = vpow2.f32 %v1116_v23  ;;  %6201 = vmatprep.subr.bf16.mxu1 %v6421_v25 }
 0x101   : > { %v1114_v31 = vmul.f32 1.442695, %v1041_v28  ;;  %v6438_v32 = vpop.eup %6437  ;;  %6455 = vpow2.f32 %v1112_v27 }
 0x102   : > { %v6440_v33 = vpop.eup %6439  ;;  %v1230_v34 = vadd.f32 1.0, %v6438_v32  ;;  %6457 = vpow2.f32 %v1118_v30  ;;  %v5947_v35 = vpop.f32.mrb[12].mxu1 }
 0x103   : > { %v6442_v36 = vpop.eup %6441  ;;  %v1228_v37 = vadd.f32 1.0, %v6440_v33  ;;  %6459 = vpow2.f32 %v1114_v31  ;;  %v1046_v38 = vsub.f32 0.0, %v5947_v35  ;;  %v825_v39 = vpop.f32.mrb[13].mxu1  ;;  %v6422_v33 = vld [vmem:[%s9653_s3 + $0x10] sm:$0xff]  }
 0x104   : > { %v7685_v40 = vpop.f32.mrb[12].mxu0  ;;  %v6444_v41 = vpop.eup %6443  ;;  %6461 = vrcp.f32 %v1230_v34  ;;  %v1231_v42 = vadd.f32 1.0, %v6442_v36  ;;  %v1044_v44 = vsub.f32 0.0, %v825_v39  ;;  %6133 = vmatprep.subr.bf16.mxu0 %v6422_v33 }
 0x105   : > { %v5948_v45 = vpop.f32.mrb[14].mxu1  ;;  %v7687_v47 = vpop.f32.mrb[13].mxu0  ;;  %6463 = vrcp.f32 %v1228_v37  ;;  %v1229_v48 = vadd.f32 1.0, %v6444_v41  ;;  %v1124_v49 = vmul.f32 1.442695, %v1046_v38  ;;  %v6423_v38 = vld [vmem:[%s9654_s4 + $0x18] sm:$0xff]  }
 0x106   : > { %v1047_v51 = vsub.f32 0.0, %v5948_v45  ;;  %v828_v52 = vpop.f32.mrb[15].mxu1  ;;  %v7689_v54 = vpop.f32.mrb[14].mxu0  ;;  %6465 = vrcp.f32 %v1231_v42  ;;  %v1120_v56 = vmul.f32 1.442695, %v1044_v44 }
 0x107   : > { %v6446_v55 = vpop.eup %6445  ;;  %v1045_v57 = vsub.f32 0.0, %v828_v52  ;;  %v7691_v58 = vpop.f32.mrb[15].mxu0  ;;  %6467 = vrcp.f32 %v1229_v48 }
 0x108   : > { %v6448_v60 = vpop.eup %6447  ;;  %v7694_v61 = vmul.f32 %v6446_v55, %v7661_v43  ;;  %v1126_v63 = vmul.f32 1.442695, %v1047_v51  ;;  %6469 = vpow2.f32 %v1124_v49 }
 0x109   : > { %v6450_v0 = vpop.eup %6449  ;;  %v7697_v1 = vmul.f32 %v6448_v60, %v7663_v46  ;;  %v1122_v3 = vmul.f32 1.442695, %v1045_v57  ;;  %6471 = vpow2.f32 %v1120_v56 }
 0x10a   : > { %v6452_v4 = vpop.eup %6451  ;;  %v7700_v6 = vmul.f32 %v6450_v0, %v7665_v50  ;;  %6473 = vpow2.f32 %v1126_v63  ;;  %v5951_v9 = vpop.f32.mrb[16].mxu1 }
 0x10b   : > { %v6454_v7 = vpop.eup %6453  ;;  %v7703_v8 = vmul.f32 %v6452_v4, %v7667_v53  ;;  %6475 = vpow2.f32 %v1122_v3  ;;  %v841_v46 = vpop.f32.mrb[17].mxu1  ;;  %v1050_v15 = vsub.f32 0.0, %v5951_v9 }
 0x10c   : > { %v6456_v43 = vpop.eup %6455  ;;  %v1234_v10 = vadd.f32 1.0, %v6454_v7  ;;  %v1425_v11 = vpack.c.bf16 %v7700_v6, %v7694_v61  ;;  %v7707_v12 = vpop.f32.mrb[16].mxu0  ;;  %v1048_v20 = vsub.f32 0.0, %v841_v46 }
 0x10d   : > { %v6458_v13 = vpop.eup %6457  ;;  %v1232_v14 = vadd.f32 1.0, %v6456_v43  ;;  %v1424_v50 = vpack.c.bf16 %v7703_v8, %v7697_v1  ;;  %v5952_v17 = vpop.f32.mrb[18].mxu1  ;;  %v1132_v30 = vmul.f32 1.442695, %v1050_v15 }
 0x10e   : > { %v7711_v18 = vpop.f32.mrb[17].mxu0  ;;  %v6460_v53 = vpop.eup %6459  ;;  %6477 = vrcp.f32 %v1234_v10  ;;  %v1235_v19 = vadd.f32 1.0, %v6458_v13  ;;  %v1051_v22 = vsub.f32 0.0, %v5952_v17  ;;  %v1128_v36 = vmul.f32 1.442695, %v1048_v20 }
 0x10f   : > { %v844_v23 = vpop.f32.mrb[19].mxu1  ;;  %v7713_v24 = vpop.f32.mrb[18].mxu0  ;;  %6479 = vrcp.f32 %v1232_v14  ;;  %v1233_v28 = vadd.f32 1.0, %v6460_v53  ;;  %6001 = vmatprep.mubr.msk.bf16.mxu0 %vm345_vm0, %v1424_v50  ;;  %6069 = vmatprep.mubr.msk.bf16.mxu1 %vm345_vm0, %v1424_v50 }
 0x110   : > { %v6462_v27 = vpop.eup %6461  ;;  %v1049_v31 = vsub.f32 0.0, %v844_v23  ;;  %v7720_v32 = vpop.f32.mrb[19].mxu0  ;;  %6481 = vrcp.f32 %v1235_v19  ;;  %v1134_v37 = vmul.f32 1.442695, %v1051_v22  ;;  %6002 = vmatmul.mubr.msk.bf16.vlgmr.msra.gmra.mrb[64].mxu0 %vm345_vm0, %v1425_v11  ;;  %6070 = vmatmul.mubr.msk.bf16.vlgmr.msra.gmra.mrb[64].mxu1 %vm345_vm0, %v1425_v11 }
 0x111   : > { %v6464_v34 = vpop.eup %6463  ;;  %v7726_v35 = vmul.f32 %v6462_v27, %v7669_v59  ;;  %6483 = vrcp.f32 %v1233_v28  ;;  %6202 = vmatpush3.bf16.msra.mxu1 %v6421_v25  ;;  %6134 = vmatpush3.bf16.msra.mxu0 %v6422_v33 }
 0x112   : > { %v6466_v39 = vpop.eup %6465  ;;  %v7734_v41 = vmul.f32 %v6464_v34, %v7671_v62  ;;  %v1130_v42 = vmul.f32 1.442695, %v1049_v31  ;;  %6485 = vpow2.f32 %v1132_v30  ;;  %v5955_v49 = vpop.f32.mrb[20].mxu1  ;;  %6203 = vmatprep.subr.bf16.mxu1 %v6423_v38 }
 0x113   : > { %v6468_v59 = vpop.eup %6467  ;;  %v7737_v44 = vmul.f32 %v6466_v39, %v7673_v2  ;;  %6487 = vpow2.f32 %v1128_v36  ;;  %v857_v55 = vpop.f32.mrb[21].mxu1  ;;  %v1054_v4 = vsub.f32 0.0, %v5955_v49 }
 0x114   : > { %v6470_v45 = vpop.eup %6469  ;;  %v7740_v48 = vmul.f32 %v6468_v59, %v7675_v5  ;;  %6489 = vpow2.f32 %v1134_v37  ;;  %v7744_v56 = vpop.f32.mrb[20].mxu0  ;;  %v1052_v7 = vsub.f32 0.0, %v857_v55 }
 0x115   : > { %v6472_v51 = vpop.eup %6471  ;;  %v1238_v62 = vadd.f32 1.0, %v6470_v45  ;;  %v1427_v52 = vpack.c.bf16 %v7737_v44, %v7726_v35  ;;  %6491 = vpow2.f32 %v1130_v42  ;;  %v5956_v63 = vpop.f32.mrb[22].mxu1  ;;  %6204 = vmatpush3.bf16.msra.mxu1 %v6423_v38  ;;  %v1140_v50 = vmul.f32 1.442695, %v1054_v4 }
 0x116   : > { %v6474_v2 = vpop.eup %6473  ;;  %v1236_v57 = vadd.f32 1.0, %v6472_v51  ;;  %v1426_v60 = vpack.c.bf16 %v7740_v48, %v7734_v41  ;;  %v7748_v5 = vpop.f32.mrb[21].mxu0  ;;  %v1055_v11 = vsub.f32 0.0, %v5956_v63  ;;  %v1136_v15 = vmul.f32 1.442695, %v1052_v7 }
 0x117   : > { %v6476_v0 = vpop.eup %6475  ;;  %6493 = vrcp.f32 %v1238_v62  ;;  %v1239_v3 = vadd.f32 1.0, %v6474_v2  ;;  %v860_v9 = vpop.f32.mrb[23].mxu1 }
 0x118   : > { %v7750_v43 = vpop.f32.mrb[22].mxu0  ;;  %6495 = vrcp.f32 %v1236_v57  ;;  %v1237_v10 = vadd.f32 1.0, %v6476_v0  ;;  %v1053_v46 = vsub.f32 0.0, %v860_v9  ;;  %6005 = vmatprep.mubr.msk.bf16.mxu0 %vm345_vm0, %v1426_v60  ;;  %6073 = vmatprep.mubr.msk.bf16.mxu1 %vm345_vm0, %v1426_v60  ;;  %v6478_v14 = vpop.eup %6477  ;;  %v1142_v19 = vmul.f32 1.442695, %v1055_v11 }
 0x119   : > { %v7754_v13 = vpop.f32.mrb[23].mxu0  ;;  %6497 = vrcp.f32 %v1239_v3  ;;  %6006 = vmatmul.mubr.msk.bf16.gmra.mrb[68].mxu0 %vm345_vm0, %v1427_v52  ;;  %6074 = vmatmul.mubr.msk.bf16.gmra.mrb[68].mxu1 %vm345_vm0, %v1427_v52  ;;  %v6480_v17 = vpop.eup %6479  ;;  %v7759_v53 = vmul.f32 %v6478_v14, %v7677_v16 }
 0x11a   : > { %6499 = vrcp.f32 %v1237_v10  ;;  %v1138_v20 = vmul.f32 1.442695, %v1053_v46  ;;  %v6482_v22 = vpop.eup %6481  ;;  %v7762_v23 = vmul.f32 %v6480_v17, %v7679_v21  ;;  %v5959_v28 = vpop.f32.mrb[24].mxu1 }
 0x11b   : > { %6501 = vpow2.f32 %v1140_v50  ;;  %v6484_v25 = vpop.eup %6483  ;;  %v7765_v27 = vmul.f32 %v6482_v22, %v7681_v26  ;;  %v1058_v16 = vsub.f32 0.0, %v5959_v28  ;;  %v873_v33 = vpop.f32.mrb[25].mxu1 }
 0x11c   : > { %6503 = vpow2.f32 %v1136_v15  ;;  %v6486_v30 = vpop.eup %6485  ;;  %v7768_v31 = vmul.f32 %v6484_v25, %v7683_v29  ;;  %v7770_v34 = vpop.f32.mrb[24].mxu0  ;;  %v1056_v62 = vsub.f32 0.0, %v873_v33 }
 0x11d   : > { %6505 = vpow2.f32 %v1142_v19  ;;  %v6488_v36 = vpop.eup %6487  ;;  %v1242_v37 = vadd.f32 1.0, %v6486_v30  ;;  %v1429_v21 = vpack.c.bf16 %v7765_v27, %v7759_v53  ;;  %v5960_v38 = vpop.f32.mrb[26].mxu1  ;;  %v1148_v29 = vmul.f32 1.442695, %v1058_v16 }
 0x11e   : > { %6507 = vpow2.f32 %v1138_v20  ;;  %v7774_v39 = vpop.f32.mrb[25].mxu0  ;;  %v6490_v26 = vpop.eup %6489  ;;  %v1240_v42 = vadd.f32 1.0, %v6488_v36  ;;  %v1428_v59 = vpack.c.bf16 %v7768_v31, %v7762_v23  ;;  %v1059_v52 = vsub.f32 0.0, %v5960_v38 }
 0x11f   : > { %v876_v45 = vpop.f32.mrb[27].mxu1  ;;  %v6492_v49 = vpop.eup %6491  ;;  %6509 = vrcp.f32 %v1242_v37  ;;  %v1243_v51 = vadd.f32 1.0, %v6490_v26  ;;  %v1144_v4 = vmul.f32 1.442695, %v1056_v62 }
 0x120   : > { %v7778_v55 = vpop.f32.mrb[26].mxu0  ;;  %6511 = vrcp.f32 %v1240_v42  ;;  %v1241_v57 = vadd.f32 1.0, %v6492_v49  ;;  %v1057_v60 = vsub.f32 0.0, %v876_v45  ;;  %6009 = vmatprep.mubr.msk.bf16.mxu0 %vm345_vm0, %v1428_v59  ;;  %6077 = vmatprep.mubr.msk.bf16.mxu1 %vm345_vm0, %v1428_v59  ;;  %v1150_v7 = vmul.f32 1.442695, %v1059_v52 }
 0x121   : > { %v6494_v2 = vpop.eup %6493  ;;  %v7782_v63 = vpop.f32.mrb[27].mxu0  ;;  %6513 = vrcp.f32 %v1243_v51  ;;  %6010 = vmatmul.mubr.msk.bf16.gmra.mrb[72].mxu0 %vm345_vm0, %v1429_v21  ;;  %6078 = vmatmul.mubr.msk.bf16.gmra.mrb[72].mxu1 %vm345_vm0, %v1429_v21 }
 0x122   : > { %v6496_v0 = vpop.eup %6495  ;;  %v7785_v3 = vmul.f32 %v6494_v2, %v7685_v40  ;;  %6515 = vrcp.f32 %v1241_v57  ;;  %v1146_v11 = vmul.f32 1.442695, %v1057_v60  ;;  %v5963_v50 = vpop.f32.mrb[28].mxu1 }
 0x123   : > { %v6498_v9 = vpop.eup %6497  ;;  %v7790_v10 = vmul.f32 %v6496_v0, %v7687_v47  ;;  %6517 = vpow2.f32 %v1148_v29  ;;  %v1062_v17 = vsub.f32 0.0, %v5963_v50  ;;  %v889_v19 = vpop.f32.mrb[29].mxu1 }
 0x124   : > { %v6500_v46 = vpop.eup %6499  ;;  %v7793_v14 = vmul.f32 %v6498_v9, %v7689_v54  ;;  %6519 = vpow2.f32 %v1144_v4  ;;  %v7798_v20 = vpop.f32.mrb[28].mxu0  ;;  %v1060_v26 = vsub.f32 0.0, %v889_v19 }
 0x125   : > { %v6502_v40 = vpop.eup %6501  ;;  %v7796_v15 = vmul.f32 %v6500_v46, %v7691_v58  ;;  %6521 = vpow2.f32 %v1150_v7  ;;  %v5964_v28 = vpop.f32.mrb[30].mxu1  ;;  %v1156_v38 = vmul.f32 1.442695, %v1062_v17 }
 0x126   : > { %v6504_v22 = vpop.eup %6503  ;;  %v1246_v25 = vadd.f32 1.0, %v6502_v40  ;;  %v1431_v47 = vpack.c.bf16 %v7793_v14, %v7785_v3  ;;  %v7802_v30 = vpop.f32.mrb[29].mxu0  ;;  %6523 = vpow2.f32 %v1146_v11  ;;  %v1063_v29 = vsub.f32 0.0, %v5964_v28 }
 0x127   : > { %v6506_v54 = vpop.eup %6505  ;;  %v1244_v16 = vadd.f32 1.0, %v6504_v22  ;;  %v1430_v58 = vpack.c.bf16 %v7796_v15, %v7790_v10  ;;  %v892_v33 = vpop.f32.mrb[31].mxu1  ;;  %v1152_v51 = vmul.f32 1.442695, %v1060_v26 }
 0x128   : > { %v7806_v36 = vpop.f32.mrb[30].mxu0  ;;  %v6508_v37 = vpop.eup %6507  ;;  %6525 = vrcp.f32 %v1246_v25  ;;  %v1247_v21 = vadd.f32 1.0, %v6506_v54  ;;  %v1061_v45 = vsub.f32 0.0, %v892_v33  ;;  %v1158_v2 = vmul.f32 1.442695, %v1063_v29 }
 0x129   : > { %v7808_v42 = vpop.f32.mrb[31].mxu0  ;;  %6527 = vrcp.f32 %v1244_v16  ;;  %v1245_v59 = vadd.f32 1.0, %v6508_v37  ;;  %6013 = vmatprep.mubr.msk.bf16.mxu0 %vm345_vm0, %v1430_v58  ;;  %6081 = vmatprep.mubr.msk.bf16.mxu1 %vm345_vm0, %v1430_v58  ;;  %v6510_v49 = vpop.eup %6509 }
 0x12a   : > { %6529 = vrcp.f32 %v1247_v21  ;;  %6014 = vmatmul.mubr.msk.bf16.gmra.mrb[76].mxu0 %vm345_vm0, %v1431_v47  ;;  %6082 = vmatmul.mubr.msk.bf16.gmra.mrb[76].mxu1 %vm345_vm0, %v1431_v47  ;;  %v6512_v62 = vpop.eup %6511  ;;  %v7815_v52 = vmul.f32 %v6510_v49, %v7707_v12  ;;  %v1154_v57 = vmul.f32 1.442695, %v1061_v45  ;;  %v5967_v4 = vpop.f32.mrb[32].mxu1 }
 0x12b   : > { %6531 = vrcp.f32 %v1245_v59  ;;  %v6514_v60 = vpop.eup %6513  ;;  %v7818_v0 = vmul.f32 %v6512_v62, %v7711_v18  ;;  %v1066_v11 = vsub.f32 0.0, %v5967_v4  ;;  %v905_v46 = vpop.f32.mrb[33].mxu1 }
 0x12c   : > { %6533 = vpow2.f32 %v1156_v38  ;;  %v6516_v7 = vpop.eup %6515  ;;  %v7821_v9 = vmul.f32 %v6514_v60, %v7713_v24  ;;  %v7823_v50 = vpop.f32.mrb[32].mxu0  ;;  %v1064_v17 = vsub.f32 0.0, %v905_v46 }
 0x12d   : > { %6535 = vpow2.f32 %v1152_v51  ;;  %v6518_v40 = vpop.eup %6517  ;;  %v7826_v12 = vmul.f32 %v6516_v7, %v7720_v32  ;;  %v5968_v19 = vpop.f32.mrb[34].mxu1  ;;  %v1164_v21 = vmul.f32 1.442695, %v1066_v11 }
 0x12e   : > { %6537 = vpow2.f32 %v1158_v2  ;;  %v7828_v22 = vpop.f32.mrb[33].mxu0  ;;  %v6520_v18 = vpop.eup %6519  ;;  %v1250_v25 = vadd.f32 1.0, %v6518_v40  ;;  %v1433_v47 = vpack.c.bf16 %v7821_v9, %v7815_v52  ;;  %v1067_v38 = vsub.f32 0.0, %v5968_v19 }
 0x12f   : > { %6539 = vpow2.f32 %v1154_v57  ;;  %v908_v24 = vpop.f32.mrb[35].mxu1  ;;  %v7832_v28 = vpop.f32.mrb[34].mxu0  ;;  %v1248_v16 = vadd.f32 1.0, %v6520_v18  ;;  %v1432_v58 = vpack.c.bf16 %v7826_v12, %v7818_v0  ;;  %v1160_v29 = vmul.f32 1.442695, %v1064_v17 }
 0x130   : > { %v6522_v54 = vpop.eup %6521  ;;  %v7836_v32 = vpop.f32.mrb[35].mxu0  ;;  %6541 = vrcp.f32 %v1250_v25  ;;  %v1065_v45 = vsub.f32 0.0, %v908_v24  ;;  %v1166_v62 = vmul.f32 1.442695, %v1067_v38 }
 0x131   : > { %v6524_v33 = vpop.eup %6523  ;;  %v1251_v37 = vadd.f32 1.0, %v6522_v54  ;;  %6543 = vrcp.f32 %v1248_v16  ;;  %6017 = vmatprep.mubr.msk.bf16.mxu0 %vm345_vm0, %v1432_v58  ;;  %6085 = vmatprep.mubr.msk.bf16.mxu1 %vm345_vm0, %v1432_v58 }
 0x132   : > { %v6526_v26 = vpop.eup %6525  ;;  %v1249_v59 = vadd.f32 1.0, %v6524_v33  ;;  %6018 = vmatmul.mubr.msk.bf16.gmra.mrb[80].mxu0 %vm345_vm0, %v1433_v47  ;;  %6086 = vmatmul.mubr.msk.bf16.gmra.mrb[80].mxu1 %vm345_vm0, %v1433_v47  ;;  %v1162_v60 = vmul.f32 1.442695, %v1065_v45  ;;  %v5971_v4 = vpop.f32.mrb[36].mxu1 }
 0x133   : > { %v6528_v49 = vpop.eup %6527  ;;  %6545 = vrcp.f32 %v1251_v37  ;;  %v7841_v51 = vmul.f32 %v6526_v26, %v7744_v56  ;;  %v1070_v46 = vsub.f32 0.0, %v5971_v4  ;;  %v921_v56 = vpop.f32.mrb[37].mxu1 }
 0x134   : > { %v6530_v2 = vpop.eup %6529  ;;  %6547 = vrcp.f32 %v1249_v59  ;;  %v7846_v57 = vmul.f32 %v6528_v49, %v7748_v5  ;;  %v7851_v40 = vpop.f32.mrb[36].mxu0  ;;  %v1068_v18 = vsub.f32 0.0, %v921_v56 }
 0x135   : > { %v6532_v7 = vpop.eup %6531  ;;  %6549 = vpow2.f32 %v1164_v21  ;;  %v7849_v11 = vmul.f32 %v6530_v2, %v7750_v43  ;;  %v5972_v25 = vpop.f32.mrb[38].mxu1  ;;  %v1172_v26 = vmul.f32 1.442695, %v1070_v46 }
 0x136   : > { %v6534_v17 = vpop.eup %6533  ;;  %6551 = vpow2.f32 %v1160_v29  ;;  %v7854_v19 = vmul.f32 %v6532_v7, %v7754_v13  ;;  %v7856_v5 = vpop.f32.mrb[37].mxu0  ;;  %v1168_v59 = vmul.f32 1.442695, %v1068_v18  ;;  %v1071_v45 = vsub.f32 0.0, %v5972_v25 }
 0x137   : > { %v6536_v47 = vpop.eup %6535  ;;  %v1254_v24 = vadd.f32 1.0, %v6534_v17  ;;  %6553 = vpow2.f32 %v1166_v62  ;;  %v1435_v43 = vpack.c.bf16 %v7849_v11, %v7841_v51  ;;  %v924_v54 = vpop.f32.mrb[39].mxu1 }
 0x138   : > { %v7860_v16 = vpop.f32.mrb[38].mxu0  ;;  %v6538_v58 = vpop.eup %6537  ;;  %v1252_v33 = vadd.f32 1.0, %v6536_v47  ;;  %6555 = vpow2.f32 %v1162_v60  ;;  %v1434_v13 = vpack.c.bf16 %v7854_v19, %v7846_v57  ;;  %v1069_v49 = vsub.f32 0.0, %v924_v54 }
 0x139   : > { %v7864_v37 = vpop.f32.mrb[39].mxu0  ;;  %v6540_v21 = vpop.eup %6539  ;;  %6557 = vrcp.f32 %v1254_v24  ;;  %v1255_v38 = vadd.f32 1.0, %v6538_v58  ;;  %v1174_v4 = vmul.f32 1.442695, %v1071_v45 }
 0x13a   : > { %6559 = vrcp.f32 %v1252_v33  ;;  %v1253_v29 = vadd.f32 1.0, %v6540_v21  ;;  %6021 = vmatprep.mubr.msk.bf16.mxu0 %vm345_vm0, %v1434_v13  ;;  %6089 = vmatprep.mubr.msk.bf16.mxu1 %vm345_vm0, %v1434_v13  ;;  %v6542_v62 = vpop.eup %6541  ;;  %v1170_v7 = vmul.f32 1.442695, %v1069_v49  ;;  %v5975_v46 = vpop.f32.mrb[40].mxu1 }
 0x13b   : > { %6561 = vrcp.f32 %v1255_v38  ;;  %6022 = vmatmul.mubr.msk.bf16.gmra.mrb[84].mxu0 %vm345_vm0, %v1435_v43  ;;  %6090 = vmatmul.mubr.msk.bf16.gmra.mrb[84].mxu1 %vm345_vm0, %v1435_v43  ;;  %v6544_v2 = vpop.eup %6543  ;;  %v7871_v60 = vmul.f32 %v6542_v62, %v7770_v34  ;;  %v1074_v18 = vsub.f32 0.0, %v5975_v46  ;;  %v937_v25 = vpop.f32.mrb[41].mxu1 }
 0x13c   : > { %6563 = vrcp.f32 %v1253_v29  ;;  %v7874_v17 = vmul.f32 %v6544_v2, %v7774_v39  ;;  %v7876_v47 = vpop.f32.mrb[40].mxu0  ;;  %v1072_v54 = vsub.f32 0.0, %v937_v25  ;;  %v5976_v34 = vpop.f32.mrb[42].mxu1 }
 0x13d   : > { %v6546_v56 = vpop.eup %6545  ;;  %6565 = vpow2.f32 %v1172_v26  ;;  %v7881_v58 = vpop.f32.mrb[41].mxu0  ;;  %v1180_v39 = vmul.f32 1.442695, %v1074_v18  ;;  %v1075_v46 = vsub.f32 0.0, %v5976_v34 }
 0x13e   : > { %9758 = vst [vmem:[#allocation2_spill] sm:$0xff] %v7874_v17  ;;  %v6548_v24 = vpop.eup %6547  ;;  %6567 = vpow2.f32 %v1168_v59  ;;  %v7879_v43 = vmul.f32 %v6546_v56, %v7778_v55  ;;  %v940_v21 = vpop.f32.mrb[43].mxu1 }
 0x13f   : > { %v6550_v33 = vpop.eup %6549  ;;  %6569 = vpow2.f32 %v1174_v4  ;;  %v7884_v13 = vmul.f32 %v6548_v24, %v7782_v63  ;;  %v7886_v38 = vpop.f32.mrb[42].mxu0  ;;  %v1176_v4 = vmul.f32 1.442695, %v1072_v54  ;;  %v1073_v25 = vsub.f32 0.0, %v940_v21 }
 0x140   : > { %9759 = vst [vmem:[#allocation3_spill] sm:$0xff] %v7879_v43  ;;  %v6552_v26 = vpop.eup %6551  ;;  %v1258_v29 = vadd.f32 1.0, %v6550_v33  ;;  %v1437_v59 = vpack.c.bf16 %v7879_v43, %v7871_v60  ;;  %6571 = vpow2.f32 %v1170_v7  ;;  %v7890_v55 = vpop.f32.mrb[43].mxu0  ;;  %v1182_v33 = vmul.f32 1.442695, %v1075_v46 }
 0x141   : > { %9760 = vst [vmem:[#allocation4_spill] sm:$0xff] %v7884_v13  ;;  %v6554_v45 = vpop.eup %6553  ;;  %v1256_v49 = vadd.f32 1.0, %v6552_v26  ;;  %v1436_v62 = vpack.c.bf16 %v7884_v13, %v7874_v17  ;;  %6573 = vpow2.f32 %v1180_v39  ;;  %v1178_v21 = vmul.f32 1.442695, %v1073_v25 }
 0x142   : > { %v6556_v63 = vpop.eup %6555  ;;  %6575 = vrcp.f32 %v1258_v29  ;;  %v1259_v2 = vadd.f32 1.0, %v6554_v45  ;;  %v5979_v54 = vpop.f32.mrb[44].mxu1 }
 0x143   : > { %v6558_v56 = vpop.eup %6557  ;;  %6577 = vrcp.f32 %v1256_v49  ;;  %v1257_v18 = vadd.f32 1.0, %v6556_v63  ;;  %6025 = vmatprep.mubr.msk.bf16.mxu0 %vm345_vm0, %v1436_v62  ;;  %6093 = vmatprep.mubr.msk.bf16.mxu1 %vm345_vm0, %v1436_v62  ;;  %v1078_v26 = vsub.f32 0.0, %v5979_v54  ;;  %v953_v29 = vpop.f32.mrb[45].mxu1 }
 0x144   : > { %v6560_v7 = vpop.eup %6559  ;;  %6579 = vrcp.f32 %v1259_v2  ;;  %v7897_v24 = vmul.f32 %v6558_v56, %v7798_v20  ;;  %6026 = vmatmul.mubr.msk.bf16.gmra.mrb[88].mxu0 %vm345_vm0, %v1437_v59  ;;  %6094 = vmatmul.mubr.msk.bf16.gmra.mrb[88].mxu1 %vm345_vm0, %v1437_v59  ;;  %v7904_v45 = vpop.f32.mrb[44].mxu0  ;;  %v1076_v46 = vsub.f32 0.0, %v953_v29 }
 0x145   : > { %v6562_v34 = vpop.eup %6561  ;;  %6581 = vrcp.f32 %v1257_v18  ;;  %v7902_v39 = vmul.f32 %v6560_v7, %v7802_v30  ;;  %v5980_v62 = vpop.f32.mrb[46].mxu1  ;;  %v1188_v30 = vmul.f32 1.442695, %v1078_v26 }
 0x146   : > { %9761 = vst [vmem:[#allocation5_spill] sm:$0xff] %v7897_v24  ;;  %v6564_v49 = vpop.eup %6563  ;;  %6583 = vpow2.f32 %v1176_v4  ;;  %v7907_v20 = vmul.f32 %v6562_v34, %v7806_v36  ;;  %v7909_v63 = vpop.f32.mrb[45].mxu0  ;;  %v1079_v29 = vsub.f32 0.0, %v5980_v62 }
 0x147   : > { %9762 = vst [vmem:[#allocation6_spill] sm:$0xff] %v7902_v39  ;;  %v6566_v59 = vpop.eup %6565  ;;  %6585 = vpow2.f32 %v1182_v33  ;;  %v7912_v2 = vmul.f32 %v6564_v49, %v7808_v42  ;;  %v956_v56 = vpop.f32.mrb[47].mxu1 }
 0x148   : > { %9763 = vst [vmem:[#allocation7_spill] sm:$0xff] %v7907_v20  ;;  %v7914_v18 = vpop.f32.mrb[46].mxu0  ;;  %v6568_v25 = vpop.eup %6567  ;;  %v1262_v7 = vadd.f32 1.0, %v6566_v59  ;;  %v1439_v4 = vpack.c.bf16 %v7907_v20, %v7897_v24  ;;  %6587 = vpow2.f32 %v1178_v21  ;;  %v1184_v59 = vmul.f32 1.442695, %v1076_v46 }
 0x149   : > { %9764 = vst [vmem:[#allocation8_spill] sm:$0xff] %v7912_v2  ;;  %v7918_v36 = vpop.f32.mrb[47].mxu0  ;;  %v6570_v54 = vpop.eup %6569  ;;  %v1260_v34 = vadd.f32 1.0, %v6568_v25  ;;  %v1438_v33 = vpack.c.bf16 %v7912_v2, %v7902_v39  ;;  %6589 = vpow2.f32 %v1188_v30  ;;  %v1077_v43 = vsub.f32 0.0, %v956_v56 }
 0x14a   : > { %v6572_v42 = vpop.eup %6571  ;;  %6591 = vrcp.f32 %v1262_v7  ;;  %v1263_v26 = vadd.f32 1.0, %v6570_v54  ;;  %v1190_v20 = vmul.f32 1.442695, %v1079_v29  ;;  %v5983_v30 = vpop.f32.mrb[48].mxu1 }
 0x14b   : > { %v6574_v49 = vpop.eup %6573  ;;  %6593 = vrcp.f32 %v1260_v34  ;;  %v1261_v13 = vadd.f32 1.0, %v6572_v42  ;;  %6029 = vmatprep.mubr.msk.bf16.mxu0 %vm345_vm0, %v1438_v33  ;;  %6097 = vmatprep.mubr.msk.bf16.mxu1 %vm345_vm0, %v1438_v33  ;;  %v1186_v46 = vmul.f32 1.442695, %v1077_v43  ;;  %v1082_v56 = vsub.f32 0.0, %v5983_v30  ;;  %v969_v54 = vpop.f32.mrb[49].mxu1 }
 0x14c   : > { %v6576_v21 = vpop.eup %6575  ;;  %6595 = vrcp.f32 %v1263_v26  ;;  %v1266_v25 = vadd.f32 1.0, %v6574_v49  ;;  %6030 = vmatmul.mubr.msk.bf16.gmra.mrb[92].mxu0 %vm345_vm0, %v1439_v4  ;;  %6098 = vmatmul.mubr.msk.bf16.gmra.mrb[92].mxu1 %vm345_vm0, %v1439_v4  ;;  %v7929_v34 = vpop.f32.mrb[48].mxu0  ;;  %v1080_v26 = vsub.f32 0.0, %v969_v54 }
 0x14d   : > { %v6578_v7 = vpop.eup %6577  ;;  %6597 = vrcp.f32 %v1261_v13  ;;  %v7927_v62 = vmul.f32 %v6576_v21, %v7823_v50  ;;  %v5984_v29 = vpop.f32.mrb[50].mxu1  ;;  %v1196_v50 = vmul.f32 1.442695, %v1082_v56 }
 0x14e   : > { %v6580_v33 = vpop.eup %6579  ;;  %6599 = vrcp.f32 %v1266_v25  ;;  %v7932_v42 = vmul.f32 %v6578_v7, %v7828_v22  ;;  %v7934_v49 = vpop.f32.mrb[49].mxu0 }
 0x14f   : > { %9765 = vst [vmem:[#allocation9_spill] sm:$0xff] %v7927_v62  ;;  %v6582_v4 = vpop.eup %6581  ;;  %6601 = vpow2.f32 %v1184_v59  ;;  %v7937_v13 = vmul.f32 %v6580_v33, %v7832_v28  ;;  %v972_v43 = vpop.f32.mrb[51].mxu1  ;;  %v1192_v33 = vmul.f32 1.442695, %v1080_v26 }
 0x150   : > { %9766 = vst [vmem:[#allocation10_spill] sm:$0xff] %v7932_v42  ;;  %v7939_v21 = vpop.f32.mrb[50].mxu0  ;;  %v6584_v30 = vpop.eup %6583  ;;  %6603 = vpow2.f32 %v1190_v20  ;;  %v7942_v25 = vmul.f32 %v6582_v4, %v7836_v32  ;;  %v1083_v32 = vsub.f32 0.0, %v5984_v29  ;;  %v1081_v4 = vsub.f32 0.0, %v972_v43 }
 0x151   : > { %9767 = vst [vmem:[#allocation11_spill] sm:$0xff] %v7937_v13  ;;  %v7944_v22 = vpop.f32.mrb[51].mxu0  ;;  %v6586_v7 = vpop.eup %6585  ;;  %v1264_v54 = vadd.f32 1.0, %v6584_v30  ;;  %v1441_v2 = vpack.c.bf16 %v7937_v13, %v7927_v62  ;;  %6605 = vpow2.f32 %v1186_v46 }
 0x152   : > { %9768 = vst [vmem:[#allocation12_spill] sm:$0xff] %v7942_v25  ;;  %v6588_v59 = vpop.eup %6587  ;;  %v1267_v28 = vadd.f32 1.0, %v6586_v7  ;;  %v1440_v56 = vpack.c.bf16 %v7942_v25, %v7932_v42  ;;  %6607 = vpow2.f32 %v1196_v50  ;;  %v5987_v46 = vpop.f32.mrb[52].mxu1  ;;  %v1198_v50 = vmul.f32 1.442695, %v1083_v32 }
 0x153   : > { %v6590_v39 = vpop.eup %6589  ;;  %6609 = vrcp.f32 %v1264_v54  ;;  %v1265_v20 = vadd.f32 1.0, %v6588_v59  ;;  %v1194_v26 = vmul.f32 1.442695, %v1081_v4  ;;  %v985_v29 = vpop.f32.mrb[53].mxu1  ;;  %v1086_v59 = vsub.f32 0.0, %v5987_v46 }
 0x154   : > { %v6592_v24 = vpop.eup %6591  ;;  %6611 = vrcp.f32 %v1267_v28  ;;  %v1270_v17 = vadd.f32 1.0, %v6590_v39  ;;  %6033 = vmatprep.mubr.msk.bf16.mxu0 %vm345_vm0, %v1440_v56  ;;  %6101 = vmatprep.mubr.msk.bf16.mxu1 %vm345_vm0, %v1440_v56  ;;  %v7957_v43 = vpop.f32.mrb[52].mxu0 }
 0x155   : > { %v6594_v30 = vpop.eup %6593  ;;  %6613 = vrcp.f32 %v1265_v20  ;;  %v7953_v7 = vmul.f32 %v6592_v24, %v7851_v40  ;;  %6034 = vmatmul.mubr.msk.bf16.gmra.mrb[96].mxu0 %vm345_vm0, %v1441_v2  ;;  %6102 = vmatmul.mubr.msk.bf16.gmra.mrb[96].mxu1 %vm345_vm0, %v1441_v2  ;;  %v5988_v28 = vpop.f32.mrb[54].mxu1 }
 0x156   : > { %v6596_v39 = vpop.eup %6595  ;;  %6615 = vrcp.f32 %v1270_v17  ;;  %v7960_v54 = vmul.f32 %v6594_v30, %v7856_v5  ;;  %v7962_v56 = vpop.f32.mrb[53].mxu0  ;;  %v1204_v17 = vmul.f32 1.442695, %v1086_v59  ;;  %v1084_v5 = vsub.f32 0.0, %v985_v29 }
 0x157   : > { %9769 = vst [vmem:[#allocation13_spill] sm:$0xff] %v7953_v7  ;;  %v6598_v40 = vpop.eup %6597  ;;  %6617 = vpow2.f32 %v1192_v33  ;;  %v7965_v24 = vmul.f32 %v6596_v39, %v7860_v16  ;;  %v988_v20 = vpop.f32.mrb[55].mxu1  ;;  %v1087_v33 = vsub.f32 0.0, %v5988_v28 }
 0x158   : > { %9770 = vst [vmem:[#allocation14_spill] sm:$0xff] %v7960_v54  ;;  %v7967_v32 = vpop.f32.mrb[54].mxu0  ;;  %v6600_v2 = vpop.eup %6599  ;;  %6619 = vpow2.f32 %v1198_v50  ;;  %v7970_v4 = vmul.f32 %v6598_v40, %v7864_v37  ;;  %v1085_v29 = vsub.f32 0.0, %v988_v20  ;;  %v1200_v62 = vmul.f32 1.442695, %v1084_v5 }
 0x159   : > { %9771 = vst [vmem:[#allocation15_spill] sm:$0xff] %v7965_v24  ;;  %v7972_v30 = vpop.f32.mrb[55].mxu0  ;;  %v6602_v46 = vpop.eup %6601  ;;  %v1443_v25 = vpack.c.bf16 %v7965_v24, %v7953_v7  ;;  %6621 = vpow2.f32 %v1194_v26  ;;  %v7977_v16 = vmul.f32 %v6600_v2, %v7876_v47  ;;  %v1206_v2 = vmul.f32 1.442695, %v1087_v33 }
 0x15a   : > { %9772 = vst [vmem:[#allocation16_spill] sm:$0xff] %v7970_v4  ;;  %v6604_v39 = vpop.eup %6603  ;;  %v1268_v13 = vadd.f32 1.0, %v6602_v46  ;;  %v1442_v50 = vpack.c.bf16 %v7970_v4, %v7960_v54  ;;  %6623 = vpow2.f32 %v1204_v17  ;;  %v5991_v47 = vpop.f32.mrb[56].mxu1 }
 0x15b   : > { %v6606_v37 = vpop.eup %6605  ;;  %v1271_v59 = vadd.f32 1.0, %v6604_v39  ;;  %v1090_v17 = vsub.f32 0.0, %v5991_v47  ;;  %v1001_v46 = vpop.f32.mrb[57].mxu1  ;;  %v1202_v39 = vmul.f32 1.442695, %v1085_v29 }
 0x15c   : > { %v6608_v40 = vpop.eup %6607  ;;  %6625 = vrcp.f32 %v1268_v13  ;;  %v1269_v42 = vadd.f32 1.0, %v6606_v37  ;;  %6037 = vmatprep.mubr.msk.bf16.mxu0 %vm345_vm0, %v1442_v50  ;;  %6105 = vmatprep.mubr.msk.bf16.mxu1 %vm345_vm0, %v1442_v50  ;;  %v7985_v20 = vpop.f32.mrb[56].mxu0 }
 0x15d   : > { %v6610_v26 = vpop.eup %6609  ;;  %6627 = vrcp.f32 %v1271_v59  ;;  %v1274_v28 = vadd.f32 1.0, %v6608_v40  ;;  %6038 = vmatmul.mubr.msk.bf16.gmra.mrb[100].mxu0 %vm345_vm0, %v1443_v25  ;;  %6106 = vmatmul.mubr.msk.bf16.gmra.mrb[100].mxu1 %vm345_vm0, %v1443_v25  ;;  %v5992_v50 = vpop.f32.mrb[58].mxu1  ;;  %v1212_v40 = vmul.f32 1.442695, %v1090_v17 }
 0x15e   : > { %v6612_v13 = vpop.eup %6611  ;;  %6629 = vrcp.f32 %v1269_v42  ;;  %v7988_v5 = vmul.f32 %v6610_v26, %v7881_v58  ;;  %v7990_v37 = vpop.f32.mrb[57].mxu0  ;;  %v1088_v58 = vsub.f32 0.0, %v1001_v46  ;;  %v1091_v17 = vsub.f32 0.0, %v5992_v50 }
 0x15f   : > { %v6614_v59 = vpop.eup %6613  ;;  %6631 = vrcp.f32 %v1274_v28  ;;  %v7993_v33 = vmul.f32 %v6612_v13, %v7886_v38  ;;  %v1004_v25 = vpop.f32.mrb[59].mxu1 }
 0x160   : > { %9773 = vst [vmem:[#allocation17_spill] sm:$0xff] %v7988_v5  ;;  %v7995_v47 = vpop.f32.mrb[58].mxu0  ;;  %v6616_v4 = vpop.eup %6615  ;;  %6633 = vpow2.f32 %v1200_v62  ;;  %v7998_v42 = vmul.f32 %v6614_v59, %v7890_v55  ;;  %v1089_v7 = vsub.f32 0.0, %v1004_v25  ;;  %v1214_v50 = vmul.f32 1.442695, %v1091_v17 }
 0x161   : > { %9774 = vst [vmem:[#allocation18_spill] sm:$0xff] %v7993_v33  ;;  %v8000_v26 = vpop.f32.mrb[59].mxu0  ;;  %v6618_v29 = vpop.eup %6617  ;;  %6635 = vpow2.f32 %v1206_v2  ;;  %v1445_v28 = vpack.c.bf16 %v7993_v33, %v7977_v16  ;;  %v8005_v38 = vmul.f32 %v6616_v4, %v7904_v45  ;;  %v1208_v2 = vmul.f32 1.442695, %v1088_v58 }
 0x162   : > { %9775 = vst [vmem:[#allocation19_spill] sm:$0xff] %v7998_v42  ;;  %v6620_v13 = vpop.eup %6619  ;;  %v1272_v24 = vadd.f32 1.0, %v6618_v29  ;;  %6637 = vpow2.f32 %v1202_v39  ;;  %v1444_v62 = vpack.c.bf16 %v7998_v42, %v7988_v5  ;;  %v5995_v45 = vpop.f32.mrb[60].mxu1  ;;  %v1210_v58 = vmul.f32 1.442695, %v1089_v7 }
 0x163   : > { %v6622_v55 = vpop.eup %6621  ;;  %v1275_v59 = vadd.f32 1.0, %v6620_v13  ;;  %6639 = vpow2.f32 %v1212_v40  ;;  %v1094_v39 = vsub.f32 0.0, %v5995_v45  ;;  %v1017_v29 = vpop.f32.mrb[61].mxu1 }
 0x164   : > { %v6624_v46 = vpop.eup %6623  ;;  %6641 = vrcp.f32 %v1272_v24  ;;  %v1273_v54 = vadd.f32 1.0, %v6622_v55  ;;  %6041 = vmatprep.mubr.msk.bf16.mxu0 %vm345_vm0, %v1444_v62  ;;  %6109 = vmatprep.mubr.msk.bf16.mxu1 %vm345_vm0, %v1444_v62  ;;  %v8013_v40 = vpop.f32.mrb[60].mxu0  ;;  %v1092_v25 = vsub.f32 0.0, %v1017_v29 }
 0x165   : > { %6643 = vrcp.f32 %v1275_v59  ;;  %v1278_v4 = vadd.f32 1.0, %v6624_v46  ;;  %6042 = vmatmul.mubr.msk.bf16.gmra.mrb[104].mxu0 %vm345_vm0, %v1445_v28  ;;  %6110 = vmatmul.mubr.msk.bf16.gmra.mrb[104].mxu1 %vm345_vm0, %v1445_v28  ;;  %v5996_v13 = vpop.f32.mrb[62].mxu1  ;;  %v8015_v55 = vpop.f32.mrb[61].mxu0  ;;  %v1220_v17 = vmul.f32 1.442695, %v1094_v39 }
 0x166   : > { %v6626_v24 = vpop.eup %6625  ;;  %6645 = vrcp.f32 %v1273_v54  ;;  %v1020_v46 = vpop.f32.mrb[63].mxu1  ;;  %v1216_v54 = vmul.f32 1.442695, %v1092_v25 }
 0x167   : > { %v6628_v62 = vpop.eup %6627  ;;  %6647 = vrcp.f32 %v1278_v4  ;;  %v8018_v59 = vmul.f32 %v6626_v24, %v7909_v63  ;;  %v8020_v42 = vpop.f32.mrb[62].mxu0  ;;  %v1095_v4 = vsub.f32 0.0, %v5996_v13 }
 0x168   : > { %v6630_v28 = vpop.eup %6629  ;;  %6649 = vpow2.f32 %v1208_v2  ;;  %v8023_v45 = vmul.f32 %v6628_v62, %v7914_v18  ;;  %v8025_v7 = vpop.f32.mrb[63].mxu0  ;;  %v1093_v2 = vsub.f32 0.0, %v1020_v46 }
 0x169   : > { %v6632_v29 = vpop.eup %6631  ;;  %6651 = vpow2.f32 %v1214_v50  ;;  %v8028_v33 = vmul.f32 %v6630_v28, %v7918_v36  ;;  %v1222_v28 = vmul.f32 1.442695, %v1095_v4 }
 0x16a   : > { %v6634_v63 = vpop.eup %6633  ;;  %v1447_v39 = vpack.c.bf16 %v8023_v45, %v8005_v38  ;;  %6653 = vpow2.f32 %v1210_v58  ;;  %v8033_v24 = vmul.f32 %v6632_v29, %v7929_v34  ;;  %v1218_v46 = vmul.f32 1.442695, %v1093_v2 }
 0x16b   : > { %v6636_v18 = vpop.eup %6635  ;;  %v1276_v62 = vadd.f32 1.0, %v6634_v63  ;;  %v1446_v25 = vpack.c.bf16 %v8028_v33, %v8018_v59  ;;  %6655 = vpow2.f32 %v1220_v17 }
 0x16c   : > { %9776 = vst [vmem:[#allocation20_spill] sm:$0xff] %v8033_v24  ;;  %v6638_v50 = vpop.eup %6637  ;;  %v1279_v5 = vadd.f32 1.0, %v6636_v18  ;;  %6657 = vpow2.f32 %v1216_v54 }
 0x16d   : > { %v6640_v36 = vpop.eup %6639  ;;  %6659 = vrcp.f32 %v1276_v62  ;;  %v1277_v13 = vadd.f32 1.0, %v6638_v50  ;;  %6045 = vmatprep.mubr.msk.bf16.mxu0 %vm345_vm0, %v1446_v25  ;;  %6113 = vmatprep.mubr.msk.bf16.mxu1 %vm345_vm0, %v1446_v25 }
 0x16e   : > { %v6642_v34 = vpop.eup %6641  ;;  %6661 = vrcp.f32 %v1279_v5  ;;  %v1282_v58 = vadd.f32 1.0, %v6640_v36  ;;  %6046 = vmatmul.mubr.msk.bf16.gmra.mrb[108].mxu0 %vm345_vm0, %v1447_v39  ;;  %6114 = vmatmul.mubr.msk.bf16.gmra.mrb[108].mxu1 %vm345_vm0, %v1447_v39 }
 0x16f   : > { %v6644_v17 = vpop.eup %6643  ;;  %6663 = vrcp.f32 %v1277_v13  ;;  %v8042_v54 = vmul.f32 %v6642_v34, %v7934_v49 }
 0x170   : > { %v6646_v29 = vpop.eup %6645  ;;  %6665 = vrcp.f32 %v1282_v58  ;;  %v8045_v4 = vmul.f32 %v6644_v17, %v7939_v21 }
 0x171   : > { %9777 = vst [vmem:[#allocation21_spill] sm:$0xff] %v8042_v54  ;;  %v6648_v63 = vpop.eup %6647  ;;  %6667 = vpow2.f32 %v1222_v28  ;;  %v8048_v5 = vmul.f32 %v6646_v29, %v7944_v22 }
 0x172   : > { %9778 = vst [vmem:[#allocation22_spill] sm:$0xff] %v8045_v4  ;;  %v6650_v2 = vpop.eup %6649  ;;  %v1449_v18 = vpack.c.bf16 %v8045_v4, %v8033_v24  ;;  %6669 = vpow2.f32 %v1218_v46  ;;  %v8053_v39 = vmul.f32 %v6648_v63, %v7957_v43 }
 0x173   : > { %9779 = vst [vmem:[#allocation23_spill] sm:$0xff] %v8048_v5  ;;  %v6652_v49 = vpop.eup %6651  ;;  %v1280_v62 = vadd.f32 1.0, %v6650_v2  ;;  %v1448_v25 = vpack.c.bf16 %v8048_v5, %v8042_v54 }
 0x174   : > { %9780 = vst [vmem:[#allocation24_spill] sm:$0xff] %v8053_v39  ;;  %v6654_v21 = vpop.eup %6653  ;;  %v1283_v50 = vadd.f32 1.0, %v6652_v49 }
 0x175   : > { %v6656_v36 = vpop.eup %6655  ;;  %6671 = vrcp.f32 %v1280_v62  ;;  %v1281_v13 = vadd.f32 1.0, %v6654_v21  ;;  %6049 = vmatprep.mubr.msk.bf16.mxu0 %vm345_vm0, %v1448_v25  ;;  %6117 = vmatprep.mubr.msk.bf16.mxu1 %vm345_vm0, %v1448_v25 }
 0x176   : > { %v6658_v22 = vpop.eup %6657  ;;  %6673 = vrcp.f32 %v1283_v50  ;;  %v1286_v28 = vadd.f32 1.0, %v6656_v36  ;;  %6050 = vmatmul.mubr.msk.bf16.gmra.mrb[112].mxu0 %vm345_vm0, %v1449_v18  ;;  %6118 = vmatmul.mubr.msk.bf16.gmra.mrb[112].mxu1 %vm345_vm0, %v1449_v18 }
 0x177   : > { %v6660_v43 = vpop.eup %6659  ;;  %6675 = vrcp.f32 %v1281_v13  ;;  %v1284_v34 = vadd.f32 1.0, %v6658_v22 }
 0x178   : > { %v6662_v58 = vpop.eup %6661  ;;  %6677 = vrcp.f32 %v1286_v28  ;;  %v8062_v46 = vmul.f32 %v6660_v43, %v7962_v56 }
 0x179   : > { %v6664_v17 = vpop.eup %6663  ;;  %6679 = vrcp.f32 %v1284_v34  ;;  %v8065_v29 = vmul.f32 %v6662_v58, %v7967_v32 }
 0x17a   : > { %9781 = vst [vmem:[#allocation25_spill] sm:$0xff] %v8062_v46  ;;  %v6666_v63 = vpop.eup %6665  ;;  %v8068_v2 = vmul.f32 %v6664_v17, %v7972_v30 }
 0x17b   : > { %9782 = vst [vmem:[#allocation26_spill] sm:$0xff] %v8065_v29  ;;  %v6668_v49 = vpop.eup %6667  ;;  %v1451_v18 = vpack.c.bf16 %v8065_v29, %v8053_v39  ;;  %v8073_v62 = vmul.f32 %v6666_v63, %v7985_v20 }
 0x17c   : > { %9783 = vst [vmem:[#allocation27_spill] sm:$0xff] %v8068_v2  ;;  %v6670_v25 = vpop.eup %6669  ;;  %v1287_v21 = vadd.f32 1.0, %v6668_v49  ;;  %v1450_v56 = vpack.c.bf16 %v8068_v2, %v8062_v46 }
 0x17d   : > { %9784 = vst [vmem:[#allocation28_spill] sm:$0xff] %v8073_v62  ;;  %v1285_v50 = vadd.f32 1.0, %v6670_v25 }
 0x17e   : > { %6681 = vrcp.f32 %v1287_v21  ;;  %6053 = vmatprep.mubr.msk.bf16.mxu0 %vm345_vm0, %v1450_v56  ;;  %6121 = vmatprep.mubr.msk.bf16.mxu1 %vm345_vm0, %v1450_v56 }
 0x17f   : > { %v6672_v32 = vpop.eup %6671  ;;  %6683 = vrcp.f32 %v1285_v50  ;;  %6054 = vmatmul.mubr.msk.bf16.gmra.mrb[116].mxu0 %vm345_vm0, %v1451_v18  ;;  %6122 = vmatmul.mubr.msk.bf16.gmra.mrb[116].mxu1 %vm345_vm0, %v1451_v18 }
 0x180   : > { %v6674_v30 = vpop.eup %6673  ;;  %v8082_v20 = vmul.f32 %v6672_v32, %v7990_v37 }
 0x181   : > { %v6676_v36 = vpop.eup %6675  ;;  %v8085_v13 = vmul.f32 %v6674_v30, %v7995_v47  ;;  %v6424_v47 = vld [vmem:[%s9653_s3 + $0x18] sm:$0xff]  }
 0x182   : > { %9785 = vst [vmem:[#allocation29_spill] sm:$0xff] %v8082_v20  ;;  %v6678_v22 = vpop.eup %6677  ;;  %v8088_v28 = vmul.f32 %v6676_v36, %v8000_v26  ;;  %6135 = vmatprep.subr.bf16.mxu0 %v6424_v47 }
 0x183   : > { %9786 = vst [vmem:[#allocation30_spill] sm:$0xff] %v8085_v13  ;;  %v6680_v43 = vpop.eup %6679  ;;  %v1453_v34 = vpack.c.bf16 %v8085_v13, %v8073_v62  ;;  %v8093_v58 = vmul.f32 %v6678_v22, %v8013_v40  ;;  %6136 = vmatpush3.bf16.msra.mxu0 %v6424_v47 }
 0x184   : > { %9787 = vst [vmem:[#allocation31_spill] sm:$0xff] %v8088_v28  ;;  %v1452_v17 = vpack.c.bf16 %v8088_v28, %v8082_v20  ;;  %v8098_v37 = vmul.f32 %v6680_v43, %v8015_v55 }
 0x185   : > { %9788 = vst [vmem:[#allocation32_spill] sm:$0xff] %v8093_v58 }
 0x186   : > { %9789 = vst [vmem:[#allocation33_spill] sm:$0xff] %v8098_v37  ;;  %6057 = vmatprep.mubr.msk.bf16.mxu0 %vm345_vm0, %v1452_v17  ;;  %6125 = vmatprep.mubr.msk.bf16.mxu1 %vm345_vm0, %v1452_v17 }
 0x187   : > { %6058 = vmatmul.mubr.msk.bf16.gmra.mrb[120].mxu0 %vm345_vm0, %v1453_v34  ;;  %6126 = vmatmul.mubr.msk.bf16.gmra.mrb[120].mxu1 %vm345_vm0, %v1453_v34 }
 0x188   : > { %v6682_v26 = vpop.eup %6681 }
 0x189   : > { %v6684_v40 = vpop.eup %6683  ;;  %v8108_v63 = vmul.f32 %v6682_v26, %v8020_v42 }
 0x18a   : > { %v8111_v55 = vmul.f32 %v6684_v40, %v8025_v7 }
 0x18b   : > { %9790 = vst [vmem:[#allocation34_spill] sm:$0xff] %v8108_v63  ;;  %v1455_v49 = vpack.c.bf16 %v8108_v63, %v8093_v58 }
 0x18c   : > { %9791 = vst [vmem:[#allocation35_spill] sm:$0xff] %v8111_v55  ;;  %v1454_v18 = vpack.c.bf16 %v8111_v55, %v8098_v37 }
 0x18e   : > { %6061 = vmatprep.mubr.msk.bf16.mxu0 %vm345_vm0, %v1454_v18  ;;  %6129 = vmatprep.mubr.msk.bf16.mxu1 %vm345_vm0, %v1454_v18 }
 0x18f   : > { %6062 = vmatmul.mubr.msk.bf16.gmra.mrb[124].mxu0 %vm345_vm0, %v1455_v49  ;;  %6130 = vmatmul.mubr.msk.bf16.gmra.mrb[124].mxu1 %vm345_vm0, %v1455_v49 }
 0x1e3   : > { %v8121_v42 = vpop.f32.mrb[64].mxu0  ;;  %v6071_v25 = vpop.f32.mrb[64].mxu1 }
 0x1e4   : > { %v2156_v21 = vsub.f32 0.0, %v6071_v25  ;;  %v8123_v7 = vpop.f32.mrb[65].mxu0  ;;  %v1899_v56 = vpop.f32.mrb[65].mxu1 }
 0x1e5   : > { %v2154_v50 = vsub.f32 0.0, %v1899_v56  ;;  %v8125_v32 = vpop.f32.mrb[66].mxu0  ;;  %v6072_v30 = vpop.f32.mrb[66].mxu1 }
 0x1e6   : > { %v2222_v36 = vmul.f32 1.442695, %v2156_v21  ;;  %v2157_v22 = vsub.f32 0.0, %v6072_v30  ;;  %v8127_v43 = vpop.f32.mrb[67].mxu0  ;;  %v1902_v34 = vpop.f32.mrb[67].mxu1 }
 0x1e7   : > { %v2218_v17 = vmul.f32 1.442695, %v2154_v50  ;;  %v2155_v47 = vsub.f32 0.0, %v1902_v34 }
 0x1e8   : > { %6685 = vpow2.f32 %v2222_v36  ;;  %v2224_v26 = vmul.f32 1.442695, %v2157_v22 }
 0x1e9   : > { %6687 = vpow2.f32 %v2218_v17  ;;  %v2220_v40 = vmul.f32 1.442695, %v2155_v47 }
 0x1ea   : > { %6689 = vpow2.f32 %v2224_v26 }
 0x1eb   : > { %6691 = vpow2.f32 %v2220_v40 }
 0x1ec   : > { %v8129_v49 = vpop.f32.mrb[68].mxu0  ;;  %v6075_v18 = vpop.f32.mrb[68].mxu1 }
 0x1ed   : > { %v2160_v25 = vsub.f32 0.0, %v6075_v18  ;;  %v8131_v56 = vpop.f32.mrb[69].mxu0  ;;  %v1915_v55 = vpop.f32.mrb[69].mxu1 }
 0x1ee   : > { %v2158_v21 = vsub.f32 0.0, %v1915_v55  ;;  %v8133_v30 = vpop.f32.mrb[70].mxu0  ;;  %v6076_v63 = vpop.f32.mrb[70].mxu1 }
 0x1ef   : > { %v2230_v37 = vmul.f32 1.442695, %v2160_v25  ;;  %v2161_v50 = vsub.f32 0.0, %v6076_v63  ;;  %v8135_v34 = vpop.f32.mrb[71].mxu0  ;;  %v1918_v36 = vpop.f32.mrb[71].mxu1 }
 0x1f0   : > { %v2226_v22 = vmul.f32 1.442695, %v2158_v21  ;;  %v2159_v17 = vsub.f32 0.0, %v1918_v36 }
 0x1f1   : > { %6693 = vpow2.f32 %v2230_v37  ;;  %v2232_v47 = vmul.f32 1.442695, %v2161_v50  ;;  %v8142_v50 = vmul.f32 0.70710677, %v7694_v61  ;;  %v2541_v61 = vmul.f32 0.70710677, %v7700_v6 }
 0x1f2   : > { %6695 = vpow2.f32 %v2226_v22  ;;  %v2228_v26 = vmul.f32 1.442695, %v2159_v17  ;;  %v6686_v40 = vpop.eup %6685  ;;  %v8163_v6 = vmul.f32 0.70710677, %v7740_v48 }
 0x1f3   : > { %6697 = vpow2.f32 %v2232_v47  ;;  %v6688_v18 = vpop.eup %6687  ;;  %v2348_v58 = vadd.f32 1.0, %v6686_v40 }
 0x1f4   : > { %6699 = vpow2.f32 %v2228_v26  ;;  %v6690_v55 = vpop.eup %6689  ;;  %v2346_v28 = vadd.f32 1.0, %v6688_v18  ;;  %v8137_v13 = vpop.f32.mrb[72].mxu0 }
 0x1f5   : > { %v6079_v25 = vpop.f32.mrb[72].mxu1  ;;  %v6692_v63 = vpop.eup %6691  ;;  %6701 = vrcp.f32 %v2348_v58  ;;  %v2349_v20 = vadd.f32 1.0, %v6690_v55  ;;  %v2538_v55 = vmul.f32 0.70710677, %v7697_v1 }
 0x1f6   : > { %v2164_v62 = vsub.f32 0.0, %v6079_v25  ;;  %v8139_v21 = vpop.f32.mrb[73].mxu0  ;;  %v1931_v37 = vpop.f32.mrb[73].mxu1  ;;  %6703 = vrcp.f32 %v2346_v28  ;;  %v2347_v36 = vadd.f32 1.0, %v6692_v63  ;;  %v8151_v28 = vmul.f32 0.70710677, %v7703_v8 }
 0x1f7   : > { %v2162_v22 = vsub.f32 0.0, %v1931_v37  ;;  %v8144_v17 = vpop.f32.mrb[74].mxu0  ;;  %v6080_v47 = vpop.f32.mrb[74].mxu1  ;;  %6705 = vrcp.f32 %v2349_v20  ;;  %v8154_v20 = vmul.f32 0.70710677, %v7726_v35 }
 0x1f8   : > { %v2238_v26 = vmul.f32 1.442695, %v2164_v62  ;;  %v2165_v40 = vsub.f32 0.0, %v6080_v47  ;;  %v8146_v18 = vpop.f32.mrb[75].mxu0  ;;  %v1934_v58 = vpop.f32.mrb[75].mxu1  ;;  %6707 = vrcp.f32 %v2347_v36 }
 0x1f9   : > { %v2234_v25 = vmul.f32 1.442695, %v2162_v22  ;;  %v2163_v2 = vsub.f32 0.0, %v1934_v58  ;;  %v8157_v62 = vmul.f32 0.70710677, %v7734_v41 }
 0x1fa   : > { %6709 = vpow2.f32 %v2238_v26  ;;  %v2240_v63 = vmul.f32 1.442695, %v2165_v40  ;;  %v8160_v36 = vmul.f32 0.70710677, %v7737_v44  ;;  %v8166_v26 = vmul.f32 0.70710677, %v7759_v53 }
 0x1fb   : > { %v6694_v37 = vpop.eup %6693  ;;  %6711 = vpow2.f32 %v2234_v25  ;;  %v2236_v47 = vmul.f32 1.442695, %v2163_v2  ;;  %v8171_v2 = vmul.f32 0.70710677, %v7762_v23 }
 0x1fc   : > { %v6696_v1 = vpop.eup %6695  ;;  %v2352_v8 = vadd.f32 1.0, %v6694_v37  ;;  %6713 = vpow2.f32 %v2240_v63  ;;  %v8176_v63 = vmul.f32 0.70710677, %v7765_v27 }
 0x1fd   : > { %v6698_v22 = vpop.eup %6697  ;;  %v2350_v35 = vadd.f32 1.0, %v6696_v1  ;;  %6715 = vpow2.f32 %v2236_v47  ;;  %v8168_v40 = vpop.f32.mrb[76].mxu0 }
 0x1fe   : > { %v6083_v41 = vpop.f32.mrb[76].mxu1  ;;  %v6700_v58 = vpop.eup %6699  ;;  %6717 = vrcp.f32 %v2352_v8  ;;  %v2353_v44 = vadd.f32 1.0, %v6698_v22 }
 0x1ff   : > { %v2168_v25 = vsub.f32 0.0, %v6083_v41  ;;  %v8173_v48 = vpop.f32.mrb[77].mxu0  ;;  %v1947_v37 = vpop.f32.mrb[77].mxu1  ;;  %6719 = vrcp.f32 %v2350_v35  ;;  %v2351_v53 = vadd.f32 1.0, %v6700_v58  ;;  %v8184_v35 = vmul.f32 0.70710677, %v7768_v31 }
 0x200   : > { %v2166_v1 = vsub.f32 0.0, %v1947_v37  ;;  %v8178_v47 = vpop.f32.mrb[78].mxu0  ;;  %v6084_v29 = vpop.f32.mrb[78].mxu1  ;;  %6721 = vrcp.f32 %v2353_v44 }
 0x201   : > { %v6702_v46 = vpop.eup %6701  ;;  %v2246_v39 = vmul.f32 1.442695, %v2168_v25  ;;  %v2169_v23 = vsub.f32 0.0, %v6084_v29  ;;  %v8180_v5 = vpop.f32.mrb[79].mxu0  ;;  %6723 = vrcp.f32 %v2351_v53 }
 0x202   : > { %v1950_v8 = vpop.f32.mrb[79].mxu1  ;;  %v6704_v22 = vpop.eup %6703  ;;  %v2476_v41 = vmul.f32 %v6702_v46, %v8121_v42  ;;  %v2242_v4 = vmul.f32 1.442695, %v2166_v1  ;;  %v8192_v42 = vmul.f32 0.70710677, %v7785_v3 }
 0x203   : > { %v2167_v27 = vsub.f32 0.0, %v1950_v8  ;;  %v6706_v54 = vpop.eup %6705  ;;  %6725 = vpow2.f32 %v2246_v39  ;;  %v2248_v58 = vmul.f32 1.442695, %v2169_v23  ;;  %v2474_v37 = vmul.f32 %v6704_v22, %v8123_v7 }
 0x204   : > { %v6708_v44 = vpop.eup %6707  ;;  %v8188_v29 = vadd.f32 %v8142_v50, %v2476_v41  ;;  %v2477_v25 = vmul.f32 %v6706_v54, %v8125_v32  ;;  %6727 = vpow2.f32 %v2242_v4  ;;  %v8198_v7 = vmul.f32 0.70710677, %v7790_v10 }
 0x205   : > { %v2244_v24 = vmul.f32 1.442695, %v2167_v27  ;;  %v6710_v46 = vpop.eup %6709  ;;  %6729 = vpow2.f32 %v2248_v58  ;;  %v2475_v31 = vmul.f32 %v6708_v44, %v8127_v43  ;;  %v8195_v53 = vadd.f32 %v2538_v55, %v2474_v37  ;;  %v8205_v3 = vpop.f32.mrb[80].mxu0 }
 0x206   : > { %v6712_v39 = vpop.eup %6711  ;;  %v8200_v1 = vadd.f32 %v2541_v61, %v2477_v25  ;;  %v2356_v50 = vadd.f32 1.0, %v6710_v46  ;;  %v8203_v4 = vmul.f32 0.70710677, %v7793_v14  ;;  %v6087_v23 = vpop.f32.mrb[80].mxu1 }
 0x207   : > { %6731 = vpow2.f32 %v2244_v24  ;;  %v6714_v54 = vpop.eup %6713  ;;  %v2354_v32 = vadd.f32 1.0, %v6712_v39  ;;  %v8208_v43 = vadd.f32 %v8151_v28, %v2475_v31  ;;  %v2172_v10 = vsub.f32 0.0, %v6087_v23  ;;  %v8210_v22 = vpop.f32.mrb[81].mxu0 }
 0x208   : > { %v6716_v55 = vpop.eup %6715  ;;  %6733 = vrcp.f32 %v2356_v50  ;;  %v2357_v8 = vadd.f32 1.0, %v6714_v54  ;;  %v1963_v61 = vpop.f32.mrb[81].mxu1  ;;  %v2677_v24 = vpack.c.bf16 %v8200_v1, %v8188_v29 }
 0x209   : > { %v6718_v41 = vpop.eup %6717  ;;  %6735 = vrcp.f32 %v2354_v32  ;;  %v2355_v14 = vadd.f32 1.0, %v6716_v55  ;;  %v2170_v27 = vsub.f32 0.0, %v1963_v61  ;;  %v8214_v58 = vpop.f32.mrb[82].mxu0  ;;  %v2676_v28 = vpack.c.bf16 %v8208_v43, %v8195_v53 }
 0x20a   : > { %v6088_v37 = vpop.f32.mrb[82].mxu1  ;;  %v6720_v44 = vpop.eup %6719  ;;  %6737 = vrcp.f32 %v2357_v8  ;;  %v2254_v25 = vmul.f32 1.442695, %v2172_v10  ;;  %v2480_v50 = vmul.f32 %v6718_v41, %v8129_v49  ;;  %v6425_v8 = vld [vmem:[%s9654_s4 + $0x20] sm:$0xff]   ;;  %v6427_v49 = vld [vmem:[%s9654_s4 + $0x28] sm:$0xff]  }
 0x20b   : > { %v2173_v46 = vsub.f32 0.0, %v6088_v37  ;;  %v8218_v31 = vpop.f32.mrb[83].mxu0  ;;  %v1966_v39 = vpop.f32.mrb[83].mxu1  ;;  %6739 = vrcp.f32 %v2355_v14  ;;  %v2250_v32 = vmul.f32 1.442695, %v2170_v27  ;;  %6137 = vmatprep.mubr.msk.bf16.mxu0 %vm345_vm0, %v2676_v28  ;;  %6205 = vmatprep.mubr.msk.bf16.mxu1 %vm345_vm0, %v2676_v28  ;;  %v2478_v55 = vmul.f32 %v6720_v44, %v8131_v56  ;;  %v6426_v10 = vld [vmem:[%s9653_s3 + $0x20] sm:$0xff]  }
 0x20c   : > { %v6722_v54 = vpop.eup %6721  ;;  %v2171_v23 = vsub.f32 0.0, %v1966_v39  ;;  %6741 = vpow2.f32 %v2254_v25  ;;  %6138 = vmatmul.mubr.msk.bf16.vlgmr.msra.gmra.mrb[128].mxu0 %vm345_vm0, %v2677_v24  ;;  %6206 = vmatmul.mubr.msk.bf16.vlgmr.msra.gmra.mrb[128].mxu1 %vm345_vm0, %v2677_v24  ;;  %v8237_v14 = vadd.f32 %v8154_v20, %v2480_v50  ;;  %v8250_v39 = vmul.f32 0.70710677, %v7815_v52 }
 0x20d   : > { %v6724_v61 = vpop.eup %6723  ;;  %v2256_v41 = vmul.f32 1.442695, %v2173_v46  ;;  %v2481_v56 = vmul.f32 %v6722_v54, %v8133_v30  ;;  %6743 = vpow2.f32 %v2250_v32  ;;  %v8241_v44 = vadd.f32 %v8157_v62, %v2478_v55  ;;  %6337 = vmatprep.subr.bf16.mxu1 %v6425_v8  ;;  %6269 = vmatprep.subr.bf16.mxu0 %v6426_v10 }
 0x20e   : > { %v6726_v27 = vpop.eup %6725  ;;  %v2252_v37 = vmul.f32 1.442695, %v2171_v23  ;;  %v2479_v28 = vmul.f32 %v6724_v61, %v8135_v34  ;;  %v8244_v46 = vmul.f32 0.70710677, %v7796_v15  ;;  %6338 = vmatpush3.bf16.msra.mxu1 %v6425_v8  ;;  %6270 = vmatpush3.bf16.msra.mxu0 %v6426_v10  ;;  %v8252_v62 = vpop.f32.mrb[84].mxu0 }
 0x20f   : > { %v6728_v25 = vpop.eup %6727  ;;  %v2360_v24 = vadd.f32 1.0, %v6726_v27  ;;  %6745 = vpow2.f32 %v2256_v41  ;;  %v8247_v30 = vadd.f32 %v8160_v36, %v2481_v56  ;;  %v6091_v50 = vpop.f32.mrb[84].mxu1  ;;  %6339 = vmatprep.subr.bf16.mxu1 %v6427_v49 }
 0x210   : > { %v6730_v20 = vpop.eup %6729  ;;  %v2358_v34 = vadd.f32 1.0, %v6728_v25  ;;  %6747 = vpow2.f32 %v2252_v37  ;;  %v8255_v54 = vadd.f32 %v8163_v6, %v2479_v28  ;;  %v2176_v36 = vsub.f32 0.0, %v6091_v50  ;;  %v8257_v23 = vpop.f32.mrb[85].mxu0 }
 0x211   : > { %v6732_v15 = vpop.eup %6731  ;;  %6749 = vrcp.f32 %v2360_v24  ;;  %v2361_v32 = vadd.f32 1.0, %v6730_v20  ;;  %v1979_v55 = vpop.f32.mrb[85].mxu1  ;;  %v2679_v52 = vpack.c.bf16 %v8247_v30, %v8237_v14 }
 0x212   : > { %6751 = vrcp.f32 %v2358_v34  ;;  %v2359_v8 = vadd.f32 1.0, %v6732_v15  ;;  %v2174_v10 = vsub.f32 0.0, %v1979_v55  ;;  %v8261_v61 = vpop.f32.mrb[86].mxu0  ;;  %v6092_v41 = vpop.f32.mrb[86].mxu1  ;;  %v2678_v6 = vpack.c.bf16 %v8255_v54, %v8241_v44  ;;  %6340 = vmatpush3.bf16.msra.mxu1 %v6427_v49 }
 0x213   : > { %v6734_v56 = vpop.eup %6733  ;;  %6753 = vrcp.f32 %v2361_v32  ;;  %v2262_v27 = vmul.f32 1.442695, %v2176_v36  ;;  %v2177_v37 = vsub.f32 0.0, %v6092_v41  ;;  %v8265_v28 = vpop.f32.mrb[87].mxu0  ;;  %v8271_v55 = vmul.f32 0.70710677, %v7818_v0 }
 0x214   : > { %v1982_v25 = vpop.f32.mrb[87].mxu1  ;;  %v6736_v24 = vpop.eup %6735  ;;  %6755 = vrcp.f32 %v2359_v8  ;;  %v2258_v20 = vmul.f32 1.442695, %v2174_v10  ;;  %6141 = vmatprep.mubr.msk.bf16.mxu0 %vm345_vm0, %v2678_v6  ;;  %6209 = vmatprep.mubr.msk.bf16.mxu1 %vm345_vm0, %v2678_v6  ;;  %v2484_v50 = vmul.f32 %v6734_v56, %v8137_v13  ;;  %v8281_v0 = vmul.f32 0.70710677, %v7821_v9 }
 0x215   : > { %v2175_v34 = vsub.f32 0.0, %v1982_v25  ;;  %v6738_v15 = vpop.eup %6737  ;;  %6757 = vpow2.f32 %v2262_v27  ;;  %v2264_v32 = vmul.f32 1.442695, %v2177_v37  ;;  %6142 = vmatmul.mubr.msk.bf16.gmra.mrb[132].mxu0 %vm345_vm0, %v2679_v52  ;;  %6210 = vmatmul.mubr.msk.bf16.gmra.mrb[132].mxu1 %vm345_vm0, %v2679_v52  ;;  %v2482_v49 = vmul.f32 %v6736_v24, %v8139_v21 }
 0x216   : > { %v6740_v36 = vpop.eup %6739  ;;  %6759 = vpow2.f32 %v2258_v20  ;;  %v2485_v10 = vmul.f32 %v6738_v15, %v8144_v17  ;;  %v8278_v41 = vadd.f32 %v8166_v26, %v2484_v50  ;;  %v8288_v21 = vmul.f32 0.70710677, %v7826_v12 }
 0x217   : > { %v2260_v8 = vmul.f32 1.442695, %v2175_v34  ;;  %v6742_v13 = vpop.eup %6741  ;;  %6761 = vpow2.f32 %v2264_v32  ;;  %v2483_v6 = vmul.f32 %v6740_v36, %v8146_v18  ;;  %v8285_v56 = vadd.f32 %v8171_v2, %v2482_v49  ;;  %v8296_v25 = vpop.f32.mrb[88].mxu0 }
 0x218   : > { %v6744_v52 = vpop.eup %6743  ;;  %v2364_v27 = vadd.f32 1.0, %v6742_v13  ;;  %v8291_v17 = vadd.f32 %v8176_v63, %v2485_v10  ;;  %v8294_v37 = vmul.f32 0.70710677, %v7841_v51  ;;  %v6095_v18 = vpop.f32.mrb[88].mxu1 }
 0x219   : > { %6763 = vpow2.f32 %v2260_v8  ;;  %v6746_v26 = vpop.eup %6745  ;;  %v2362_v9 = vadd.f32 1.0, %v6744_v52  ;;  %v8299_v2 = vadd.f32 %v8184_v35, %v2483_v6  ;;  %v2180_v20 = vsub.f32 0.0, %v6095_v18  ;;  %v8301_v34 = vpop.f32.mrb[89].mxu0 }
 0x21a   : > { %v6748_v24 = vpop.eup %6747  ;;  %6765 = vrcp.f32 %v2364_v27  ;;  %v2365_v12 = vadd.f32 1.0, %v6746_v26  ;;  %v1995_v50 = vpop.f32.mrb[89].mxu1  ;;  %v2681_v63 = vpack.c.bf16 %v8291_v17, %v8278_v41 }
 0x21b   : > { %v6750_v15 = vpop.eup %6749  ;;  %6767 = vrcp.f32 %v2362_v9  ;;  %v2363_v51 = vadd.f32 1.0, %v6748_v24  ;;  %v2178_v32 = vsub.f32 0.0, %v1995_v50  ;;  %v8305_v49 = vpop.f32.mrb[90].mxu0  ;;  %v2680_v35 = vpack.c.bf16 %v8299_v2, %v8285_v56 }
 0x21c   : > { %v6096_v36 = vpop.f32.mrb[90].mxu1  ;;  %v6752_v8 = vpop.eup %6751  ;;  %6769 = vrcp.f32 %v2365_v12  ;;  %v2270_v10 = vmul.f32 1.442695, %v2180_v20  ;;  %v2488_v27 = vmul.f32 %v6750_v15, %v8168_v40 }
 0x21d   : > { %v2181_v13 = vsub.f32 0.0, %v6096_v36  ;;  %v8309_v6 = vpop.f32.mrb[91].mxu0  ;;  %v1998_v52 = vpop.f32.mrb[91].mxu1  ;;  %6771 = vrcp.f32 %v2363_v51  ;;  %v2266_v9 = vmul.f32 1.442695, %v2178_v32  ;;  %6145 = vmatprep.mubr.msk.bf16.mxu0 %vm345_vm0, %v2680_v35  ;;  %6213 = vmatprep.mubr.msk.bf16.mxu1 %vm345_vm0, %v2680_v35  ;;  %v2486_v24 = vmul.f32 %v6752_v8, %v8173_v48 }
 0x21e   : > { %v6754_v26 = vpop.eup %6753  ;;  %v2179_v18 = vsub.f32 0.0, %v1998_v52  ;;  %6773 = vpow2.f32 %v2270_v10  ;;  %6146 = vmatmul.mubr.msk.bf16.gmra.mrb[136].mxu0 %vm345_vm0, %v2681_v63  ;;  %6214 = vmatmul.mubr.msk.bf16.gmra.mrb[136].mxu1 %vm345_vm0, %v2681_v63  ;;  %v8319_v40 = vadd.f32 %v8192_v42, %v2488_v27  ;;  %v8326_v35 = vmul.f32 0.70710677, %v7846_v57 }
 0x21f   : > { %v6756_v50 = vpop.eup %6755  ;;  %v2272_v12 = vmul.f32 1.442695, %v2181_v13  ;;  %v2489_v20 = vmul.f32 %v6754_v26, %v8178_v47  ;;  %6775 = vpow2.f32 %v2266_v9  ;;  %v8323_v36 = vadd.f32 %v8198_v7, %v2486_v24  ;;  %v8334_v13 = vpop.f32.mrb[92].mxu0 }
 0x220   : > { %v6758_v15 = vpop.eup %6757  ;;  %v2268_v51 = vmul.f32 1.442695, %v2179_v18  ;;  %v2487_v32 = vmul.f32 %v6756_v50, %v8180_v5  ;;  %v8332_v42 = vmul.f32 0.70710677, %v7849_v11  ;;  %v6099_v5 = vpop.f32.mrb[92].mxu1 }
 0x221   : > { %v6760_v48 = vpop.eup %6759  ;;  %v2368_v8 = vadd.f32 1.0, %v6758_v15  ;;  %6777 = vpow2.f32 %v2272_v12  ;;  %v8329_v63 = vadd.f32 %v8203_v4, %v2489_v20  ;;  %v2184_v27 = vsub.f32 0.0, %v6099_v5  ;;  %v8339_v26 = vpop.f32.mrb[93].mxu0 }
 0x222   : > { %v6762_v47 = vpop.eup %6761  ;;  %v2366_v10 = vadd.f32 1.0, %v6760_v48  ;;  %6779 = vpow2.f32 %v2268_v51  ;;  %v8337_v7 = vadd.f32 %v8244_v46, %v2487_v32  ;;  %v2011_v4 = vpop.f32.mrb[93].mxu1 }
 0x223   : > { %v6764_v52 = vpop.eup %6763  ;;  %6781 = vrcp.f32 %v2368_v8  ;;  %v2369_v57 = vadd.f32 1.0, %v6762_v47  ;;  %v2683_v9 = vpack.c.bf16 %v8329_v63, %v8319_v40  ;;  %v2182_v18 = vsub.f32 0.0, %v2011_v4  ;;  %v8343_v24 = vpop.f32.mrb[94].mxu0 }
 0x224   : > { %6783 = vrcp.f32 %v2366_v10  ;;  %v2367_v11 = vadd.f32 1.0, %v6764_v52  ;;  %v6100_v50 = vpop.f32.mrb[94].mxu1  ;;  %v2682_v46 = vpack.c.bf16 %v8337_v7, %v8323_v36  ;;  %v6766_v12 = vpop.eup %6765  ;;  %v2278_v20 = vmul.f32 1.442695, %v2184_v27 }
 0x225   : > { %6785 = vrcp.f32 %v2369_v57  ;;  %v2185_v15 = vsub.f32 0.0, %v6100_v50  ;;  %v8347_v51 = vpop.f32.mrb[95].mxu0  ;;  %v2014_v32 = vpop.f32.mrb[95].mxu1  ;;  %v2274_v8 = vmul.f32 1.442695, %v2182_v18  ;;  %v2492_v10 = vmul.f32 %v6766_v12, %v8205_v3 }
 0x226   : > { %v6768_v48 = vpop.eup %6767  ;;  %6787 = vrcp.f32 %v2367_v11  ;;  %v2183_v47 = vsub.f32 0.0, %v2014_v32  ;;  %6149 = vmatprep.mubr.msk.bf16.mxu0 %vm345_vm0, %v2682_v46  ;;  %6217 = vmatprep.mubr.msk.bf16.mxu1 %vm345_vm0, %v2682_v46  ;;  %v8353_v52 = vmul.f32 0.70710677, %v7854_v19  ;;  %v8363_v19 = vmul.f32 0.70710677, %v7871_v60  ;;  %v9796_v32 = vld [vmem:[#allocation3_spill] sm:$0xff] }
 0x227   : > { %v6770_v5 = vpop.eup %6769  ;;  %6789 = vpow2.f32 %v2278_v20  ;;  %v2280_v57 = vmul.f32 1.442695, %v2185_v15  ;;  %6150 = vmatmul.mubr.msk.bf16.gmra.mrb[140].mxu0 %vm345_vm0, %v2683_v9  ;;  %6218 = vmatmul.mubr.msk.bf16.gmra.mrb[140].mxu1 %vm345_vm0, %v2683_v9  ;;  %v2490_v27 = vmul.f32 %v6768_v48, %v8210_v22  ;;  %v8360_v50 = vadd.f32 %v8250_v39, %v2492_v10  ;;  %v9794_v22 = vld [vmem:[#allocation2_spill] sm:$0xff] }
 0x228   : > { %v6772_v4 = vpop.eup %6771  ;;  %6791 = vpow2.f32 %v2274_v8  ;;  %v2276_v11 = vmul.f32 1.442695, %v2183_v47  ;;  %v2493_v18 = vmul.f32 %v6770_v5, %v8214_v58  ;;  %v8370_v20 = vmul.f32 0.70710677, %v9794_v22  ;;  %v8378_v8 = vpop.f32.mrb[96].mxu0 }
 0x229   : > { %9792 = vst [vmem:[#allocation36_spill] sm:$0xff] %v8360_v50  ;;  %v6774_v3 = vpop.eup %6773  ;;  %6793 = vpow2.f32 %v2280_v57  ;;  %v2491_v46 = vmul.f32 %v6772_v4, %v8218_v31  ;;  %v8367_v12 = vadd.f32 %v8271_v55, %v2490_v27  ;;  %v8376_v48 = vmul.f32 0.70710677, %v9796_v32  ;;  %v6103_v31 = vpop.f32.mrb[96].mxu1 }
 0x22a   : > { %v6776_v9 = vpop.eup %6775  ;;  %v2372_v15 = vadd.f32 1.0, %v6774_v3  ;;  %6795 = vpow2.f32 %v2276_v11  ;;  %v8373_v58 = vadd.f32 %v8281_v0, %v2493_v18  ;;  %v2188_v5 = vsub.f32 0.0, %v6103_v31  ;;  %v8383_v57 = vpop.f32.mrb[97].mxu0 }
 0x22b   : > { %9793 = vst [vmem:[#allocation37_spill] sm:$0xff] %v8367_v12  ;;  %v6778_v39 = vpop.eup %6777  ;;  %v2370_v60 = vadd.f32 1.0, %v6776_v9  ;;  %v8381_v55 = vadd.f32 %v8288_v21, %v2491_v46  ;;  %v2027_v27 = vpop.f32.mrb[97].mxu1 }
 0x22c   : > { %9795 = vst [vmem:[#allocation2_spill] sm:$0xff] %v8373_v58  ;;  %v6780_v47 = vpop.eup %6779  ;;  %6797 = vrcp.f32 %v2372_v15  ;;  %v2373_v10 = vadd.f32 1.0, %v6778_v39  ;;  %v2685_v0 = vpack.c.bf16 %v8373_v58, %v8360_v50  ;;  %v2186_v18 = vsub.f32 0.0, %v2027_v27  ;;  %v8387_v3 = vpop.f32.mrb[98].mxu0 }
 0x22d   : > { %9797 = vst [vmem:[#allocation3_spill] sm:$0xff] %v8381_v55  ;;  %v6782_v4 = vpop.eup %6781  ;;  %6799 = vrcp.f32 %v2370_v60  ;;  %v2371_v11 = vadd.f32 1.0, %v6780_v47  ;;  %v6104_v9 = vpop.f32.mrb[98].mxu1  ;;  %v2684_v21 = vpack.c.bf16 %v8381_v55, %v8367_v12  ;;  %v2286_v22 = vmul.f32 1.442695, %v2188_v5 }
 0x22e   : > { %v6784_v46 = vpop.eup %6783  ;;  %6801 = vrcp.f32 %v2373_v10  ;;  %v2189_v15 = vsub.f32 0.0, %v6104_v9  ;;  %v8391_v39 = vpop.f32.mrb[99].mxu0  ;;  %v2496_v31 = vmul.f32 %v6782_v4, %v8252_v62  ;;  %v2282_v60 = vmul.f32 1.442695, %v2186_v18 }
 0x22f   : > { %v2030_v32 = vpop.f32.mrb[99].mxu1  ;;  %v6786_v58 = vpop.eup %6785  ;;  %6803 = vrcp.f32 %v2371_v11  ;;  %6153 = vmatprep.mubr.msk.bf16.mxu0 %vm345_vm0, %v2684_v21  ;;  %6221 = vmatprep.mubr.msk.bf16.mxu1 %vm345_vm0, %v2684_v21  ;;  %v2494_v27 = vmul.f32 %v6784_v46, %v8257_v23  ;;  %v9800_v21 = vld [vmem:[#allocation4_spill] sm:$0xff] }
 0x230   : > { %v2187_v47 = vsub.f32 0.0, %v2030_v32  ;;  %v6788_v50 = vpop.eup %6787  ;;  %6805 = vpow2.f32 %v2286_v22  ;;  %v2288_v10 = vmul.f32 1.442695, %v2189_v15  ;;  %6154 = vmatmul.mubr.msk.bf16.gmra.mrb[144].mxu0 %vm345_vm0, %v2685_v0  ;;  %6222 = vmatmul.mubr.msk.bf16.gmra.mrb[144].mxu1 %vm345_vm0, %v2685_v0  ;;  %v2497_v5 = vmul.f32 %v6786_v58, %v8261_v61  ;;  %v8416_v32 = vpop.f32.mrb[100].mxu0 }
 0x231   : > { %v8401_v62 = vadd.f32 %v8294_v37, %v2496_v31  ;;  %v6790_v4 = vpop.eup %6789  ;;  %6807 = vpow2.f32 %v2282_v60  ;;  %v2495_v18 = vmul.f32 %v6788_v50, %v8265_v28  ;;  %v8405_v9 = vadd.f32 %v8326_v35, %v2494_v27  ;;  %v9802_v37 = vld [vmem:[#allocation5_spill] sm:$0xff]  ;;  %v6107_v28 = vpop.f32.mrb[100].mxu1 }
 0x232   : > { %v2284_v11 = vmul.f32 1.442695, %v2187_v47  ;;  %v6792_v23 = vpop.eup %6791  ;;  %v8408_v46 = vmul.f32 0.70710677, %v9800_v21  ;;  %v2376_v22 = vadd.f32 1.0, %v6790_v4  ;;  %6809 = vpow2.f32 %v2288_v10  ;;  %v8421_v47 = vpop.f32.mrb[101].mxu0 }
 0x233   : > { %9798 = vst [vmem:[#allocation38_spill] sm:$0xff] %v8401_v62  ;;  %9799 = vst [vmem:[#allocation39_spill] sm:$0xff] %v8405_v9  ;;  %v8411_v0 = vadd.f32 %v8332_v42, %v2497_v5  ;;  %v6794_v61 = vpop.eup %6793  ;;  %v8414_v58 = vmul.f32 0.70710677, %v9802_v37  ;;  %v2374_v15 = vadd.f32 1.0, %v6792_v23  ;;  %v8419_v35 = vadd.f32 %v8353_v52, %v2495_v18  ;;  %v2043_v42 = vpop.f32.mrb[101].mxu1 }
 0x234   : > { %6811 = vpow2.f32 %v2284_v11  ;;  %v6796_v50 = vpop.eup %6795  ;;  %v2377_v31 = vadd.f32 1.0, %v6794_v61  ;;  %v2192_v60 = vsub.f32 0.0, %v6107_v28  ;;  %v2190_v5 = vsub.f32 0.0, %v2043_v42  ;;  %v8425_v4 = vpop.f32.mrb[102].mxu0  ;;  %v9804_v42 = vld [vmem:[#allocation6_spill] sm:$0xff] }
 0x235   : > { %9801 = vst [vmem:[#allocation4_spill] sm:$0xff] %v8411_v0  ;;  %9803 = vst [vmem:[#allocation5_spill] sm:$0xff] %v8419_v35  ;;  %6813 = vrcp.f32 %v2376_v22  ;;  %v2687_v27 = vpack.c.bf16 %v8411_v0, %v8401_v62  ;;  %v2375_v10 = vadd.f32 1.0, %v6796_v50  ;;  %v6108_v11 = vpop.f32.mrb[102].mxu1  ;;  %v2686_v52 = vpack.c.bf16 %v8419_v35, %v8405_v9  ;;  %v8429_v22 = vpop.f32.mrb[103].mxu0 }
 0x236   : > { %6815 = vrcp.f32 %v2374_v15  ;;  %v6798_v18 = vpop.eup %6797  ;;  %v2294_v23 = vmul.f32 1.442695, %v2192_v60  ;;  %v2193_v21 = vsub.f32 0.0, %v6108_v11  ;;  %v2046_v61 = vpop.f32.mrb[103].mxu1  ;;  %v2290_v28 = vmul.f32 1.442695, %v2190_v5 }
 0x237   : > { %6817 = vrcp.f32 %v2377_v31  ;;  %v6800_v37 = vpop.eup %6799  ;;  %v2191_v0 = vsub.f32 0.0, %v2046_v61  ;;  %6157 = vmatprep.mubr.msk.bf16.mxu0 %vm345_vm0, %v2686_v52  ;;  %6225 = vmatprep.mubr.msk.bf16.mxu1 %vm345_vm0, %v2686_v52  ;;  %v2500_v15 = vmul.f32 %v6798_v18, %v8296_v25  ;;  %v8435_v62 = vmul.f32 0.70710677, %v9804_v42  ;;  %v9806_v18 = vld [vmem:[#allocation7_spill] sm:$0xff]  ;;  %v9807_v42 = vld [vmem:[#allocation8_spill] sm:$0xff] }
 0x238   : > { %6819 = vrcp.f32 %v2375_v10  ;;  %v6802_v50 = vpop.eup %6801  ;;  %v2296_v31 = vmul.f32 1.442695, %v2193_v21  ;;  %6158 = vmatmul.mubr.msk.bf16.gmra.mrb[148].mxu0 %vm345_vm0, %v2687_v27  ;;  %6226 = vmatmul.mubr.msk.bf16.gmra.mrb[148].mxu1 %vm345_vm0, %v2687_v27  ;;  %v2498_v60 = vmul.f32 %v6800_v37, %v8301_v34  ;;  %v2569_v61 = vmul.f32 0.70710677, %v9806_v18 }
 0x239   : > { %6821 = vpow2.f32 %v2294_v23  ;;  %v6804_v10 = vpop.eup %6803  ;;  %v2292_v5 = vmul.f32 1.442695, %v2191_v0  ;;  %v2501_v11 = vmul.f32 %v6802_v50, %v8305_v49  ;;  %v8442_v52 = vadd.f32 %v8363_v19, %v2500_v15  ;;  %v8450_v0 = vpop.f32.mrb[104].mxu0  ;;  %v9809_v15 = vld [vmem:[#allocation9_spill] sm:$0xff] }
 0x23a   : > { %6823 = vpow2.f32 %v2290_v28  ;;  %v6806_v25 = vpop.eup %6805  ;;  %v2499_v23 = vmul.f32 %v6804_v10, %v8309_v6  ;;  %v8447_v21 = vadd.f32 %v8370_v20, %v2498_v60  ;;  %v2567_v34 = vmul.f32 0.70710677, %v9807_v42  ;;  %v6111_v49 = vpop.f32.mrb[104].mxu1 }
 0x23b   : > { %9805 = vst [vmem:[#allocation6_spill] sm:$0xff] %v8442_v52  ;;  %6825 = vpow2.f32 %v2296_v31  ;;  %v6808_v27 = vpop.eup %6807  ;;  %v2380_v37 = vadd.f32 1.0, %v6806_v25  ;;  %v8453_v19 = vadd.f32 %v8376_v48, %v2501_v11  ;;  %v8456_v50 = vmul.f32 0.70710677, %v9809_v15  ;;  %v8458_v10 = vpop.f32.mrb[105].mxu0 }
 0x23c   : > { %6827 = vpow2.f32 %v2292_v5  ;;  %v6810_v28 = vpop.eup %6809  ;;  %v2378_v31 = vadd.f32 1.0, %v6808_v27  ;;  %v2196_v6 = vsub.f32 0.0, %v6111_v49  ;;  %v2059_v20 = vpop.f32.mrb[105].mxu1  ;;  %v8461_v60 = vadd.f32 %v8408_v46, %v2499_v23 }
 0x23d   : > { %9808 = vst [vmem:[#allocation7_spill] sm:$0xff] %v8453_v19  ;;  %6829 = vrcp.f32 %v2380_v37  ;;  %v2381_v5 = vadd.f32 1.0, %v6810_v28  ;;  %v2194_v18 = vsub.f32 0.0, %v2059_v20  ;;  %v8463_v42 = vpop.f32.mrb[106].mxu0  ;;  %v6112_v48 = vpop.f32.mrb[106].mxu1  ;;  %v2689_v11 = vpack.c.bf16 %v8453_v19, %v8442_v52 }
 0x23e   : > { %9810 = vst [vmem:[#allocation8_spill] sm:$0xff] %v8461_v60  ;;  %v6812_v25 = vpop.eup %6811  ;;  %6831 = vrcp.f32 %v2378_v31  ;;  %v2302_v49 = vmul.f32 1.442695, %v2196_v6  ;;  %v2197_v35 = vsub.f32 0.0, %v6112_v48  ;;  %v8467_v9 = vpop.f32.mrb[107].mxu0  ;;  %v2688_v28 = vpack.c.bf16 %v8461_v60, %v8447_v21  ;;  %v9811_v6 = vld [vmem:[#allocation10_spill] sm:$0xff] }
 0x23f   : > { %v6814_v15 = vpop.eup %6813  ;;  %v2379_v27 = vadd.f32 1.0, %v6812_v25  ;;  %v2062_v55 = vpop.f32.mrb[107].mxu1  ;;  %6833 = vrcp.f32 %v2381_v5  ;;  %v2298_v23 = vmul.f32 1.442695, %v2194_v18  ;;  %v8474_v48 = vmul.f32 0.70710677, %v9811_v6 }
 0x240   : > { %v6816_v46 = vpop.eup %6815  ;;  %v2195_v37 = vsub.f32 0.0, %v2062_v55  ;;  %v2304_v12 = vmul.f32 1.442695, %v2197_v35  ;;  %v2504_v31 = vmul.f32 %v6814_v15, %v8334_v13  ;;  %6161 = vmatprep.mubr.msk.bf16.mxu0 %vm345_vm0, %v2688_v28  ;;  %6229 = vmatprep.mubr.msk.bf16.mxu1 %vm345_vm0, %v2688_v28  ;;  %v9814_v15 = vld [vmem:[#allocation11_spill] sm:$0xff] }
 0x241   : > { %v6818_v20 = vpop.eup %6817  ;;  %6835 = vrcp.f32 %v2379_v27  ;;  %v2502_v19 = vmul.f32 %v6816_v46, %v8339_v26  ;;  %6162 = vmatmul.mubr.msk.bf16.gmra.mrb[152].mxu0 %vm345_vm0, %v2689_v11  ;;  %6230 = vmatmul.mubr.msk.bf16.gmra.mrb[152].mxu1 %vm345_vm0, %v2689_v11  ;;  %v2573_v27 = vmul.f32 0.70710677, %v9814_v15  ;;  %v8492_v11 = vpop.f32.mrb[108].mxu0 }
 0x242   : > { %v6820_v25 = vpop.eup %6819  ;;  %6837 = vpow2.f32 %v2302_v49  ;;  %v2300_v52 = vmul.f32 1.442695, %v2195_v37  ;;  %v2505_v55 = vmul.f32 %v6818_v20, %v8343_v24  ;;  %v8486_v35 = vadd.f32 %v8414_v58, %v2504_v31  ;;  %v8496_v31 = vpop.f32.mrb[109].mxu0 }
 0x243   : > { %v6822_v5 = vpop.eup %6821  ;;  %6839 = vpow2.f32 %v2298_v23  ;;  %v2503_v13 = vmul.f32 %v6820_v25, %v8347_v51  ;;  %v8483_v26 = vadd.f32 %v8435_v62, %v2502_v19  ;;  %v9816_v23 = vld [vmem:[#allocation12_spill] sm:$0xff]  ;;  %v6115_v51 = vpop.f32.mrb[108].mxu1 }
 0x244   : > { %9813 = vst [vmem:[#allocation10_spill] sm:$0xff] %v8486_v35  ;;  %v6824_v18 = vpop.eup %6823  ;;  %v2384_v49 = vadd.f32 1.0, %v6822_v5  ;;  %6841 = vpow2.f32 %v2304_v12  ;;  %v8489_v24 = vadd.f32 %v2569_v61, %v2505_v55  ;;  %v2571_v37 = vmul.f32 0.70710677, %v9816_v23  ;;  %v2075_v25 = vpop.f32.mrb[109].mxu1 }
 0x245   : > { %9812 = vst [vmem:[#allocation9_spill] sm:$0xff] %v8483_v26  ;;  %v6826_v46 = vpop.eup %6825  ;;  %v2382_v28 = vadd.f32 1.0, %v6824_v18  ;;  %6843 = vpow2.f32 %v2300_v52  ;;  %v8494_v62 = vadd.f32 %v2567_v34, %v2503_v13  ;;  %v2200_v20 = vsub.f32 0.0, %v6115_v51  ;;  %v8500_v55 = vpop.f32.mrb[110].mxu0 }
 0x246   : > { %9815 = vst [vmem:[#allocation11_spill] sm:$0xff] %v8489_v24  ;;  %v6828_v19 = vpop.eup %6827  ;;  %6845 = vrcp.f32 %v2384_v49  ;;  %v2385_v58 = vadd.f32 1.0, %v6826_v46  ;;  %v2691_v12 = vpack.c.bf16 %v8489_v24, %v8486_v35  ;;  %v2198_v6 = vsub.f32 0.0, %v2075_v25  ;;  %v6116_v52 = vpop.f32.mrb[110].mxu1  ;;  %v9818_v25 = vld [vmem:[#allocation13_spill] sm:$0xff] }
 0x247   : > { %9817 = vst [vmem:[#allocation12_spill] sm:$0xff] %v8494_v62  ;;  %6847 = vrcp.f32 %v2382_v28  ;;  %v2383_v61 = vadd.f32 1.0, %v6828_v19  ;;  %v2690_v34 = vpack.c.bf16 %v8494_v62, %v8483_v26  ;;  %v6830_v5 = vpop.eup %6829  ;;  %v2310_v13 = vmul.f32 1.442695, %v2200_v20  ;;  %v8504_v15 = vpop.f32.mrb[111].mxu0 }
 0x248   : > { %6849 = vrcp.f32 %v2385_v58  ;;  %v2201_v18 = vsub.f32 0.0, %v6116_v52  ;;  %v2078_v49 = vpop.f32.mrb[111].mxu1  ;;  %v6832_v46 = vpop.eup %6831  ;;  %v2306_v23 = vmul.f32 1.442695, %v2198_v6  ;;  %v2508_v28 = vmul.f32 %v6830_v5, %v8378_v8 }
 0x249   : > { %6851 = vrcp.f32 %v2383_v61  ;;  %v2199_v51 = vsub.f32 0.0, %v2078_v49  ;;  %6165 = vmatprep.mubr.msk.bf16.mxu0 %vm345_vm0, %v2690_v34  ;;  %6233 = vmatprep.mubr.msk.bf16.mxu1 %vm345_vm0, %v2690_v34  ;;  %v6834_v19 = vpop.eup %6833  ;;  %v8510_v24 = vmul.f32 0.70710677, %v9818_v25  ;;  %v2506_v20 = vmul.f32 %v6832_v46, %v8383_v57  ;;  %v9819_v34 = vld [vmem:[#allocation14_spill] sm:$0xff]  ;;  %v9820_v49 = vld [vmem:[#allocation15_spill] sm:$0xff] }
 0x24a   : > { %6853 = vpow2.f32 %v2310_v13  ;;  %v2312_v58 = vmul.f32 1.442695, %v2201_v18  ;;  %6166 = vmatmul.mubr.msk.bf16.gmra.mrb[156].mxu0 %vm345_vm0, %v2691_v12  ;;  %6234 = vmatmul.mubr.msk.bf16.gmra.mrb[156].mxu1 %vm345_vm0, %v2691_v12  ;;  %v2509_v61 = vmul.f32 %v6834_v19, %v8387_v3  ;;  %v8517_v6 = vadd.f32 %v8456_v50, %v2508_v28  ;;  %v8525_v12 = vpop.f32.mrb[112].mxu0  ;;  %v6119_v3 = vpop.f32.mrb[112].mxu1  ;;  %v9822_v28 = vld [vmem:[#allocation16_spill] sm:$0xff] }
 0x24b   : > { %v6836_v52 = vpop.eup %6835  ;;  %6855 = vpow2.f32 %v2306_v23  ;;  %v2308_v35 = vmul.f32 1.442695, %v2199_v51  ;;  %v2574_v5 = vmul.f32 0.70710677, %v9819_v34  ;;  %v8522_v57 = vadd.f32 %v8474_v48, %v2506_v20  ;;  %v8530_v34 = vpop.f32.mrb[113].mxu0 }
 0x24c   : > { %v6838_v8 = vpop.eup %6837  ;;  %6857 = vpow2.f32 %v2312_v58  ;;  %v2507_v13 = vmul.f32 %v6836_v52, %v8391_v39  ;;  %v2577_v46 = vmul.f32 0.70710677, %v9820_v49  ;;  %v8527_v51 = vadd.f32 %v2573_v27, %v2509_v61  ;;  %v2091_v39 = vpop.f32.mrb[113].mxu1 }
 0x24d   : > { %v6840_v18 = vpop.eup %6839  ;;  %v2388_v23 = vadd.f32 1.0, %v6838_v8  ;;  %6859 = vpow2.f32 %v2308_v35  ;;  %v2575_v19 = vmul.f32 0.70710677, %v9822_v28  ;;  %v2204_v58 = vsub.f32 0.0, %v6119_v3  ;;  %v8534_v35 = vpop.f32.mrb[114].mxu0 }
 0x24e   : > { %9821 = vst [vmem:[#allocation13_spill] sm:$0xff] %v8527_v51  ;;  %v6842_v50 = vpop.eup %6841  ;;  %v2386_v25 = vadd.f32 1.0, %v6840_v18  ;;  %v8532_v48 = vadd.f32 %v2571_v37, %v2507_v13  ;;  %v2202_v8 = vsub.f32 0.0, %v2091_v39  ;;  %v6120_v49 = vpop.f32.mrb[114].mxu1  ;;  %v2693_v27 = vpack.c.bf16 %v8527_v51, %v8517_v6 }
 0x24f   : > { %v6844_v20 = vpop.eup %6843  ;;  %6861 = vrcp.f32 %v2388_v23  ;;  %v2389_v52 = vadd.f32 1.0, %v6842_v50  ;;  %v2318_v18 = vmul.f32 1.442695, %v2204_v58  ;;  %v2205_v3 = vsub.f32 0.0, %v6120_v49  ;;  %v8538_v62 = vpop.f32.mrb[115].mxu0 }
 0x250   : > { %v6846_v61 = vpop.eup %6845  ;;  %6863 = vrcp.f32 %v2386_v25  ;;  %v2387_v28 = vadd.f32 1.0, %v6844_v20  ;;  %v2094_v26 = vpop.f32.mrb[115].mxu1  ;;  %v2314_v13 = vmul.f32 1.442695, %v2202_v8  ;;  %v2692_v50 = vpack.c.bf16 %v8532_v48, %v8522_v57 }
 0x251   : > { %v6848_v37 = vpop.eup %6847  ;;  %6865 = vrcp.f32 %v2389_v52  ;;  %v2203_v23 = vsub.f32 0.0, %v2094_v26  ;;  %v2320_v60 = vmul.f32 1.442695, %v2205_v3  ;;  %v2512_v25 = vmul.f32 %v6846_v61, %v8416_v32  ;;  %v9824_v61 = vld [vmem:[#allocation17_spill] sm:$0xff] }
 0x252   : > { %v6850_v39 = vpop.eup %6849  ;;  %6867 = vrcp.f32 %v2387_v28  ;;  %v2510_v51 = vmul.f32 %v6848_v37, %v8421_v47  ;;  %v2580_v58 = vmul.f32 0.70710677, %v7977_v16  ;;  %6169 = vmatprep.mubr.msk.bf16.mxu0 %vm345_vm0, %v2692_v50  ;;  %6237 = vmatprep.mubr.msk.bf16.mxu1 %vm345_vm0, %v2692_v50  ;;  %v2578_v28 = vmul.f32 0.70710677, %v9824_v61  ;;  %v9826_v37 = vld [vmem:[#allocation18_spill] sm:$0xff] }
 0x253   : > { %v6852_v20 = vpop.eup %6851  ;;  %6869 = vpow2.f32 %v2318_v18  ;;  %v2316_v49 = vmul.f32 1.442695, %v2203_v23  ;;  %v2513_v26 = vmul.f32 %v6850_v39, %v8425_v4  ;;  %6170 = vmatmul.mubr.msk.bf16.gmra.mrb[160].mxu0 %vm345_vm0, %v2693_v27  ;;  %6238 = vmatmul.mubr.msk.bf16.gmra.mrb[160].mxu1 %vm345_vm0, %v2693_v27  ;;  %v8554_v16 = vadd.f32 %v8510_v24, %v2512_v25  ;;  %v8560_v27 = vpop.f32.mrb[116].mxu0 }
 0x254   : > { %v6854_v52 = vpop.eup %6853  ;;  %6871 = vpow2.f32 %v2314_v13  ;;  %v2511_v47 = vmul.f32 %v6852_v20, %v8429_v22  ;;  %v8551_v32 = vadd.f32 %v2574_v5, %v2510_v51  ;;  %v2581_v13 = vmul.f32 0.70710677, %v9826_v37  ;;  %v6123_v22 = vpop.f32.mrb[116].mxu1 }
 0x255   : > { %9823 = vst [vmem:[#allocation14_spill] sm:$0xff] %v8554_v16  ;;  %v6856_v8 = vpop.eup %6855  ;;  %v2392_v18 = vadd.f32 1.0, %v6854_v52  ;;  %6873 = vpow2.f32 %v2320_v60  ;;  %v8557_v3 = vadd.f32 %v2577_v46, %v2513_v26  ;;  %v2208_v50 = vsub.f32 0.0, %v6123_v22  ;;  %v8564_v39 = vpop.f32.mrb[117].mxu0 }
 0x256   : > { %v6858_v4 = vpop.eup %6857  ;;  %v2390_v23 = vadd.f32 1.0, %v6856_v8  ;;  %6875 = vpow2.f32 %v2316_v49  ;;  %v8562_v5 = vadd.f32 %v2575_v19, %v2511_v47  ;;  %v2107_v25 = vpop.f32.mrb[117].mxu1 }
 0x257   : > { %9825 = vst [vmem:[#allocation15_spill] sm:$0xff] %v8557_v3  ;;  %v6860_v51 = vpop.eup %6859  ;;  %6877 = vrcp.f32 %v2392_v18  ;;  %v2393_v24 = vadd.f32 1.0, %v6858_v4  ;;  %v2695_v60 = vpack.c.bf16 %v8557_v3, %v8554_v16  ;;  %v2206_v20 = vsub.f32 0.0, %v2107_v25  ;;  %v8568_v26 = vpop.f32.mrb[118].mxu0  ;;  %v9827_v25 = vld [vmem:[#allocation19_spill] sm:$0xff] }
 0x258   : > { %6879 = vrcp.f32 %v2390_v23  ;;  %v2391_v46 = vadd.f32 1.0, %v6860_v51  ;;  %v6124_v49 = vpop.f32.mrb[118].mxu1  ;;  %v2694_v19 = vpack.c.bf16 %v8562_v5, %v8551_v32  ;;  %v2326_v47 = vmul.f32 1.442695, %v2208_v50  ;;  %v8572_v61 = vpop.f32.mrb[119].mxu0 }
 0x259   : > { %v6862_v52 = vpop.eup %6861  ;;  %6881 = vrcp.f32 %v2393_v24  ;;  %v2209_v8 = vsub.f32 0.0, %v6124_v49  ;;  %v2110_v18 = vpop.f32.mrb[119].mxu1  ;;  %v2322_v37 = vmul.f32 1.442695, %v2206_v20  ;;  %v2579_v3 = vmul.f32 0.70710677, %v9827_v25 }
 0x25a   : > { %v6864_v4 = vpop.eup %6863  ;;  %6883 = vrcp.f32 %v2391_v46  ;;  %v2207_v22 = vsub.f32 0.0, %v2110_v18  ;;  %6173 = vmatprep.mubr.msk.bf16.mxu0 %vm345_vm0, %v2694_v19  ;;  %6241 = vmatprep.mubr.msk.bf16.mxu1 %vm345_vm0, %v2694_v19  ;;  %v2516_v23 = vmul.f32 %v6862_v52, %v8450_v0  ;;  %v2584_v0 = vmul.f32 0.70710677, %v8005_v38 }
 0x25b   : > { %v6866_v51 = vpop.eup %6865  ;;  %6885 = vpow2.f32 %v2326_v47  ;;  %v2328_v24 = vmul.f32 1.442695, %v2209_v8  ;;  %v2514_v50 = vmul.f32 %v6864_v4, %v8458_v10  ;;  %6174 = vmatmul.mubr.msk.bf16.gmra.mrb[164].mxu0 %vm345_vm0, %v2695_v60  ;;  %6242 = vmatmul.mubr.msk.bf16.gmra.mrb[164].mxu1 %vm345_vm0, %v2695_v60  ;;  %v2582_v8 = vmul.f32 0.70710677, %v8018_v59  ;;  %v8589_v4 = vpop.f32.mrb[120].mxu0 }
 0x25c   : > { %v6868_v49 = vpop.eup %6867  ;;  %6887 = vpow2.f32 %v2322_v37  ;;  %v2324_v16 = vmul.f32 1.442695, %v2207_v22  ;;  %v2517_v46 = vmul.f32 %v6866_v51, %v8463_v42  ;;  %v8582_v20 = vadd.f32 %v2580_v58, %v2516_v23  ;;  %v6127_v60 = vpop.f32.mrb[120].mxu1 }
 0x25d   : > { %v6870_v19 = vpop.eup %6869  ;;  %6889 = vpow2.f32 %v2328_v24  ;;  %v2515_v52 = vmul.f32 %v6868_v49, %v8467_v9  ;;  %v8586_v47 = vadd.f32 %v2578_v28, %v2514_v50  ;;  %v2585_v58 = vmul.f32 0.70710677, %v8023_v45  ;;  %v8594_v23 = vpop.f32.mrb[121].mxu0 }
 0x25e   : > { %v6872_v10 = vpop.eup %6871  ;;  %v2396_v18 = vadd.f32 1.0, %v6870_v19  ;;  %6891 = vpow2.f32 %v2324_v16  ;;  %v8591_v37 = vadd.f32 %v2581_v13, %v2517_v46  ;;  %v2212_v38 = vsub.f32 0.0, %v6127_v60  ;;  %v2123_v9 = vpop.f32.mrb[121].mxu1 }
 0x25f   : > { %v6874_v42 = vpop.eup %6873  ;;  %v2394_v22 = vadd.f32 1.0, %v6872_v10  ;;  %v8596_v28 = vadd.f32 %v2579_v3, %v2515_v52  ;;  %v2210_v25 = vsub.f32 0.0, %v2123_v9  ;;  %v8598_v16 = vpop.f32.mrb[122].mxu0 }
 0x260   : > { %9828 = vst [vmem:[#allocation16_spill] sm:$0xff] %v8591_v37  ;;  %v6876_v51 = vpop.eup %6875  ;;  %6893 = vrcp.f32 %v2396_v18  ;;  %v2397_v59 = vadd.f32 1.0, %v6874_v42  ;;  %v6128_v24 = vpop.f32.mrb[122].mxu1  ;;  %v2697_v13 = vpack.c.bf16 %v8591_v37, %v8582_v20  ;;  %v2334_v49 = vmul.f32 1.442695, %v2212_v38 }
 0x261   : > { %v6878_v50 = vpop.eup %6877  ;;  %6895 = vrcp.f32 %v2394_v22  ;;  %v2395_v45 = vadd.f32 1.0, %v6876_v51  ;;  %v2213_v46 = vsub.f32 0.0, %v6128_v24  ;;  %v8602_v19 = vpop.f32.mrb[123].mxu0  ;;  %v2330_v52 = vmul.f32 1.442695, %v2210_v25 }
 0x262   : > { %v2126_v10 = vpop.f32.mrb[123].mxu1  ;;  %v6880_v3 = vpop.eup %6879  ;;  %6897 = vrcp.f32 %v2397_v59  ;;  %v2696_v60 = vpack.c.bf16 %v8596_v28, %v8586_v47  ;;  %v2520_v22 = vmul.f32 %v6878_v50, %v8492_v11  ;;  %v2583_v38 = vmul.f32 0.70710677, %v8028_v33 }
 0x263   : > { %v2211_v18 = vsub.f32 0.0, %v2126_v10  ;;  %v6882_v42 = vpop.eup %6881  ;;  %6899 = vrcp.f32 %v2395_v45  ;;  %v2336_v9 = vmul.f32 1.442695, %v2213_v46  ;;  %v2518_v37 = vmul.f32 %v6880_v3, %v8496_v31  ;;  %v6131_v46 = vpop.f32.mrb[124].mxu1 }
 0x264   : > { %v6884_v51 = vpop.eup %6883  ;;  %6901 = vpow2.f32 %v2334_v49  ;;  %6177 = vmatprep.mubr.msk.bf16.mxu0 %vm345_vm0, %v2696_v60  ;;  %6245 = vmatprep.mubr.msk.bf16.mxu1 %vm345_vm0, %v2696_v60  ;;  %v2521_v59 = vmul.f32 %v6882_v42, %v8500_v55  ;;  %v8617_v50 = vadd.f32 %v2584_v0, %v2520_v22  ;;  %v8619_v49 = vpop.f32.mrb[124].mxu0 }
 0x265   : > { %v2332_v24 = vmul.f32 1.442695, %v2211_v18  ;;  %v6886_v25 = vpop.eup %6885  ;;  %6903 = vpow2.f32 %v2330_v52  ;;  %6178 = vmatmul.mubr.msk.bf16.gmra.mrb[168].mxu0 %vm345_vm0, %v2697_v13  ;;  %6246 = vmatmul.mubr.msk.bf16.gmra.mrb[168].mxu1 %vm345_vm0, %v2697_v13  ;;  %v2519_v31 = vmul.f32 %v6884_v51, %v8504_v15  ;;  %v8615_v11 = vadd.f32 %v2582_v8, %v2518_v37  ;;  %v8623_v18 = vpop.f32.mrb[125].mxu0 }
 0x266   : > { %9829 = vst [vmem:[#allocation17_spill] sm:$0xff] %v8617_v50  ;;  %v6888_v33 = vpop.eup %6887  ;;  %v2400_v45 = vadd.f32 1.0, %v6886_v25  ;;  %6905 = vpow2.f32 %v2336_v9  ;;  %v8621_v10 = vadd.f32 %v2585_v58, %v2521_v59  ;;  %v2216_v52 = vsub.f32 0.0, %v6131_v46  ;;  %v2139_v13 = vpop.f32.mrb[125].mxu1  ;;  %v9831_v46 = vld [vmem:[#allocation20_spill] sm:$0xff] }
 0x267   : > { %v6890_v55 = vpop.eup %6889  ;;  %v2398_v3 = vadd.f32 1.0, %v6888_v33  ;;  %6907 = vpow2.f32 %v2332_v24  ;;  %v8625_v15 = vadd.f32 %v2583_v38, %v2519_v31  ;;  %v2214_v37 = vsub.f32 0.0, %v2139_v13  ;;  %v8627_v60 = vpop.f32.mrb[126].mxu0 }
 0x268   : > { %9830 = vst [vmem:[#allocation18_spill] sm:$0xff] %v8621_v10  ;;  %v6892_v8 = vpop.eup %6891  ;;  %6909 = vrcp.f32 %v2400_v45  ;;  %v2401_v0 = vadd.f32 1.0, %v6890_v55  ;;  %v6132_v42 = vpop.f32.mrb[126].mxu1  ;;  %v2699_v58 = vpack.c.bf16 %v8621_v10, %v8617_v50  ;;  %v2342_v22 = vmul.f32 1.442695, %v2216_v52  ;;  %v9832_v52 = vld [vmem:[#allocation21_spill] sm:$0xff] }
 0x269   : > { %6911 = vrcp.f32 %v2398_v3  ;;  %v2399_v9 = vadd.f32 1.0, %v6892_v8  ;;  %v2217_v51 = vsub.f32 0.0, %v6132_v42  ;;  %v8631_v24 = vpop.f32.mrb[127].mxu0  ;;  %v2142_v59 = vpop.f32.mrb[127].mxu1  ;;  %v2338_v38 = vmul.f32 1.442695, %v2214_v37 }
 0x26a   : > { %v6894_v25 = vpop.eup %6893  ;;  %6913 = vrcp.f32 %v2401_v0  ;;  %v2215_v31 = vsub.f32 0.0, %v2142_v59  ;;  %v2698_v33 = vpack.c.bf16 %v8625_v15, %v8615_v11  ;;  %v2588_v55 = vmul.f32 0.70710677, %v9831_v46  ;;  %v9833_v59 = vld [vmem:[#allocation22_spill] sm:$0xff] }
 0x26b   : > { %v6896_v45 = vpop.eup %6895  ;;  %6915 = vrcp.f32 %v2399_v9  ;;  %v2344_v13 = vmul.f32 1.442695, %v2217_v51  ;;  %v2524_v3 = vmul.f32 %v6894_v25, %v8525_v12  ;;  %v2586_v42 = vmul.f32 0.70710677, %v9832_v52  ;;  %v9835_v51 = vld [vmem:[#allocation23_spill] sm:$0xff] }
 0x26c   : > { %v6898_v8 = vpop.eup %6897  ;;  %6917 = vpow2.f32 %v2342_v22  ;;  %v2340_v10 = vmul.f32 1.442695, %v2215_v31  ;;  %6181 = vmatprep.mubr.msk.bf16.mxu0 %vm345_vm0, %v2698_v33  ;;  %6249 = vmatprep.mubr.msk.bf16.mxu1 %vm345_vm0, %v2698_v33  ;;  %v2522_v0 = vmul.f32 %v6896_v45, %v8530_v34  ;;  %v2589_v50 = vmul.f32 0.70710677, %v9833_v59  ;;  %v9838_v59 = vld [vmem:[#allocation25_spill] sm:$0xff] }
 0x26d   : > { %v6900_v37 = vpop.eup %6899  ;;  %6919 = vpow2.f32 %v2338_v38  ;;  %6182 = vmatmul.mubr.msk.bf16.gmra.mrb[172].mxu0 %vm345_vm0, %v2699_v58  ;;  %6250 = vmatmul.mubr.msk.bf16.gmra.mrb[172].mxu1 %vm345_vm0, %v2699_v58  ;;  %v2525_v12 = vmul.f32 %v6898_v8, %v8534_v35  ;;  %v8645_v9 = vadd.f32 %v2588_v55, %v2524_v3  ;;  %v2587_v25 = vmul.f32 0.70710677, %v9835_v51 }
 0x26e   : > { %v6902_v22 = vpop.eup %6901  ;;  %6921 = vpow2.f32 %v2344_v13  ;;  %v2523_v31 = vmul.f32 %v6900_v37, %v8538_v62  ;;  %v8649_v33 = vadd.f32 %v2586_v42, %v2522_v0 }
 0x26f   : > { %9834 = vst [vmem:[#allocation19_spill] sm:$0xff] %v8645_v9  ;;  %v6904_v34 = vpop.eup %6903  ;;  %v2404_v45 = vadd.f32 1.0, %v6902_v22  ;;  %6923 = vpow2.f32 %v2340_v10  ;;  %v8651_v38 = vadd.f32 %v2589_v50, %v2525_v12  ;;  %v9837_v10 = vld [vmem:[#allocation24_spill] sm:$0xff]  ;;  %v2590_v12 = vmul.f32 0.70710677, %v9838_v59 }
 0x270   : > { %v6906_v46 = vpop.eup %6905  ;;  %v2402_v52 = vadd.f32 1.0, %v6904_v34  ;;  %v8653_v58 = vadd.f32 %v2587_v25, %v2523_v31  ;;  %v2592_v50 = vmul.f32 0.70710677, %v9837_v10  ;;  %v9839_v25 = vld [vmem:[#allocation26_spill] sm:$0xff] }
 0x271   : > { %9836 = vst [vmem:[#allocation20_spill] sm:$0xff] %v8651_v38  ;;  %v6908_v35 = vpop.eup %6907  ;;  %6925 = vrcp.f32 %v2404_v45  ;;  %v2405_v55 = vadd.f32 1.0, %v6906_v46  ;;  %v2701_v3 = vpack.c.bf16 %v8651_v38, %v8645_v9  ;;  %v2593_v31 = vmul.f32 0.70710677, %v9839_v25  ;;  %v9841_v46 = vld [vmem:[#allocation27_spill] sm:$0xff] }
 0x272   : > { %v6910_v13 = vpop.eup %6909  ;;  %6927 = vrcp.f32 %v2402_v52  ;;  %v2403_v62 = vadd.f32 1.0, %v6908_v35  ;;  %v2700_v8 = vpack.c.bf16 %v8653_v58, %v8649_v33  ;;  %v2591_v52 = vmul.f32 0.70710677, %v9841_v46 }
 0x273   : > { %v6912_v42 = vpop.eup %6911  ;;  %6929 = vrcp.f32 %v2405_v55  ;;  %v2528_v0 = vmul.f32 %v6910_v13, %v8560_v27 }
 0x274   : > { %v6914_v37 = vpop.eup %6913  ;;  %6931 = vrcp.f32 %v2403_v62  ;;  %6185 = vmatprep.mubr.msk.bf16.mxu0 %vm345_vm0, %v2700_v8  ;;  %6253 = vmatprep.mubr.msk.bf16.mxu1 %vm345_vm0, %v2700_v8  ;;  %v2526_v22 = vmul.f32 %v6912_v42, %v8564_v39 }
 0x275   : > { %v6916_v51 = vpop.eup %6915  ;;  %6186 = vmatmul.mubr.msk.bf16.gmra.mrb[176].mxu0 %vm345_vm0, %v2701_v3  ;;  %6254 = vmatmul.mubr.msk.bf16.gmra.mrb[176].mxu1 %vm345_vm0, %v2701_v3  ;;  %v2529_v34 = vmul.f32 %v6914_v37, %v8568_v26  ;;  %v8669_v27 = vadd.f32 %v2592_v50, %v2528_v0 }
 0x276   : > { %v6918_v45 = vpop.eup %6917  ;;  %v2527_v35 = vmul.f32 %v6916_v51, %v8572_v61  ;;  %v8673_v55 = vadd.f32 %v2590_v12, %v2526_v22  ;;  %v9845_v12 = vld [vmem:[#allocation28_spill] sm:$0xff] }
 0x277   : > { %9840 = vst [vmem:[#allocation21_spill] sm:$0xff] %v8669_v27  ;;  %v6920_v13 = vpop.eup %6919  ;;  %v2408_v39 = vadd.f32 1.0, %v6918_v45  ;;  %v8675_v62 = vadd.f32 %v2593_v31, %v2529_v34  ;;  %v2596_v22 = vmul.f32 0.70710677, %v9845_v12  ;;  %v9846_v31 = vld [vmem:[#allocation29_spill] sm:$0xff] }
 0x278   : > { %9842 = vst [vmem:[#allocation22_spill] sm:$0xff] %v8673_v55  ;;  %v6922_v8 = vpop.eup %6921  ;;  %v2406_v42 = vadd.f32 1.0, %v6920_v13  ;;  %v8677_v10 = vadd.f32 %v2591_v52, %v2527_v35  ;;  %v2594_v34 = vmul.f32 0.70710677, %v9846_v31  ;;  %v9847_v52 = vld [vmem:[#allocation30_spill] sm:$0xff] }
 0x279   : > { %9843 = vst [vmem:[#allocation23_spill] sm:$0xff] %v8675_v62  ;;  %v6924_v3 = vpop.eup %6923  ;;  %6933 = vrcp.f32 %v2408_v39  ;;  %v2409_v26 = vadd.f32 1.0, %v6922_v8  ;;  %v2703_v50 = vpack.c.bf16 %v8675_v62, %v8669_v27  ;;  %v2597_v35 = vmul.f32 0.70710677, %v9847_v52  ;;  %v9849_v8 = vld [vmem:[#allocation31_spill] sm:$0xff] }
 0x27a   : > { %9844 = vst [vmem:[#allocation24_spill] sm:$0xff] %v8677_v10  ;;  %6935 = vrcp.f32 %v2406_v42  ;;  %v2407_v0 = vadd.f32 1.0, %v6924_v3  ;;  %v2702_v61 = vpack.c.bf16 %v8677_v10, %v8673_v55  ;;  %v2595_v42 = vmul.f32 0.70710677, %v9849_v8 }
 0x27b   : > { %v6926_v37 = vpop.eup %6925  ;;  %6937 = vrcp.f32 %v2409_v26 }
 0x27c   : > { %v6928_v59 = vpop.eup %6927  ;;  %6939 = vrcp.f32 %v2407_v0  ;;  %6189 = vmatprep.mubr.msk.bf16.mxu0 %vm345_vm0, %v2702_v61  ;;  %6257 = vmatprep.mubr.msk.bf16.mxu1 %vm345_vm0, %v2702_v61  ;;  %v2532_v51 = vmul.f32 %v6926_v37, %v8589_v4 }
 0x27d   : > { %v6930_v25 = vpop.eup %6929  ;;  %6190 = vmatmul.mubr.msk.bf16.gmra.mrb[180].mxu0 %vm345_vm0, %v2703_v50  ;;  %6258 = vmatmul.mubr.msk.bf16.gmra.mrb[180].mxu1 %vm345_vm0, %v2703_v50  ;;  %v2530_v45 = vmul.f32 %v6928_v59, %v8594_v23  ;;  %v9853_v59 = vld [vmem:[#allocation32_spill] sm:$0xff] }
 0x27e   : > { %v6932_v46 = vpop.eup %6931  ;;  %v2533_v13 = vmul.f32 %v6930_v25, %v8598_v16  ;;  %v8693_v39 = vadd.f32 %v2596_v22, %v2532_v51  ;;  %v6428_v16 = vld [vmem:[%s9653_s3 + $0x28] sm:$0xff]   ;;  %v9854_v51 = vld [vmem:[#allocation33_spill] sm:$0xff] }
 0x27f   : > { %v2531_v4 = vmul.f32 %v6932_v46, %v8602_v19  ;;  %v8697_v3 = vadd.f32 %v2594_v34, %v2530_v45  ;;  %v2600_v19 = vmul.f32 0.70710677, %v9853_v59  ;;  %v2598_v25 = vmul.f32 0.70710677, %v9854_v51  ;;  %v9855_v45 = vld [vmem:[#allocation34_spill] sm:$0xff]  ;;  %6271 = vmatprep.subr.bf16.mxu0 %v6428_v16 }
 0x280   : > { %9848 = vst [vmem:[#allocation25_spill] sm:$0xff] %v8693_v39  ;;  %v8699_v26 = vadd.f32 %v2597_v35, %v2533_v13  ;;  %v2601_v46 = vmul.f32 0.70710677, %v9855_v45  ;;  %6272 = vmatpush3.bf16.msra.mxu0 %v6428_v16 }
 0x281   : > { %9850 = vst [vmem:[#allocation26_spill] sm:$0xff] %v8697_v3  ;;  %v8701_v0 = vadd.f32 %v2595_v42, %v2531_v4 }
 0x282   : > { %9851 = vst [vmem:[#allocation27_spill] sm:$0xff] %v8699_v26  ;;  %v2705_v23 = vpack.c.bf16 %v8699_v26, %v8693_v39  ;;  %v3792_v39 = vmul.f32 0.70710677, %v8188_v29 }
 0x283   : > { %9852 = vst [vmem:[#allocation28_spill] sm:$0xff] %v8701_v0  ;;  %v6934_v50 = vpop.eup %6933  ;;  %v2704_v61 = vpack.c.bf16 %v8701_v0, %v8697_v3 }
 0x284   : > { %v6936_v37 = vpop.eup %6935  ;;  %v2536_v12 = vmul.f32 %v6934_v50, %v8619_v49  ;;  %v9857_v49 = vld [vmem:[#allocation35_spill] sm:$0xff] }
 0x285   : > { %v6938_v22 = vpop.eup %6937  ;;  %6193 = vmatprep.mubr.msk.bf16.mxu0 %vm345_vm0, %v2704_v61  ;;  %6261 = vmatprep.mubr.msk.bf16.mxu1 %vm345_vm0, %v2704_v61  ;;  %v2534_v31 = vmul.f32 %v6936_v37, %v8623_v18  ;;  %v2599_v13 = vmul.f32 0.70710677, %v9857_v49 }
 0x286   : > { %v6940_v34 = vpop.eup %6939  ;;  %6194 = vmatmul.mubr.msk.bf16.gmra.mrb[184].mxu0 %vm345_vm0, %v2705_v23  ;;  %6262 = vmatmul.mubr.msk.bf16.gmra.mrb[184].mxu1 %vm345_vm0, %v2705_v23  ;;  %v2537_v52 = vmul.f32 %v6938_v22, %v8627_v60  ;;  %v8720_v35 = vadd.f32 %v2600_v19, %v2536_v12 }
 0x287   : > { %v2535_v8 = vmul.f32 %v6940_v34, %v8631_v24  ;;  %v8724_v42 = vadd.f32 %v2598_v25, %v2534_v31 }
 0x288   : > { %9856 = vst [vmem:[#allocation29_spill] sm:$0xff] %v8720_v35  ;;  %v8726_v4 = vadd.f32 %v2601_v46, %v2537_v52 }
 0x289   : > { %9858 = vst [vmem:[#allocation30_spill] sm:$0xff] %v8724_v42  ;;  %v8728_v18 = vadd.f32 %v2599_v13, %v2535_v8 }
 0x28a   : > { %9859 = vst [vmem:[#allocation31_spill] sm:$0xff] %v8726_v4  ;;  %v2707_v50 = vpack.c.bf16 %v8726_v4, %v8720_v35 }
 0x28b   : > { %9860 = vst [vmem:[#allocation32_spill] sm:$0xff] %v8728_v18  ;;  %v2706_v60 = vpack.c.bf16 %v8728_v18, %v8724_v42 }
 0x28d   : > { %6197 = vmatprep.mubr.msk.bf16.mxu0 %vm345_vm0, %v2706_v60  ;;  %6265 = vmatprep.mubr.msk.bf16.mxu1 %vm345_vm0, %v2706_v60 }
 0x28e   : > { %6198 = vmatmul.mubr.msk.bf16.gmra.mrb[188].mxu0 %vm345_vm0, %v2707_v50  ;;  %6266 = vmatmul.mubr.msk.bf16.gmra.mrb[188].mxu1 %vm345_vm0, %v2707_v50 }
 0x2df   : > { %v8738_v24 = vpop.f32.mrb[128].mxu0  ;;  %v6207_v23 = vpop.f32.mrb[128].mxu1 }
 0x2e0   : > { %v3408_v61 = vsub.f32 0.0, %v6207_v23  ;;  %v8740_v16 = vpop.f32.mrb[129].mxu0  ;;  %v3151_v37 = vpop.f32.mrb[129].mxu1 }
 0x2e1   : > { %v3406_v59 = vsub.f32 0.0, %v3151_v37  ;;  %v8742_v19 = vpop.f32.mrb[130].mxu0  ;;  %v6208_v12 = vpop.f32.mrb[130].mxu1 }
 0x2e2   : > { %v3474_v22 = vmul.f32 1.442695, %v3408_v61  ;;  %v3409_v51 = vsub.f32 0.0, %v6208_v12  ;;  %v8744_v25 = vpop.f32.mrb[131].mxu0  ;;  %v3154_v31 = vpop.f32.mrb[131].mxu1 }
 0x2e3   : > { %v3470_v34 = vmul.f32 1.442695, %v3406_v59  ;;  %v3407_v45 = vsub.f32 0.0, %v3154_v31 }
 0x2e4   : > { %6941 = vpow2.f32 %v3474_v22  ;;  %v3476_v46 = vmul.f32 1.442695, %v3409_v51 }
 0x2e5   : > { %6943 = vpow2.f32 %v3470_v34  ;;  %v3472_v52 = vmul.f32 1.442695, %v3407_v45 }
 0x2e6   : > { %6945 = vpow2.f32 %v3476_v46 }
 0x2e7   : > { %6947 = vpow2.f32 %v3472_v52 }
 0x2e8   : > { %v8746_v49 = vpop.f32.mrb[132].mxu0  ;;  %v6211_v13 = vpop.f32.mrb[132].mxu1 }
 0x2e9   : > { %v3412_v8 = vsub.f32 0.0, %v6211_v13  ;;  %v8748_v50 = vpop.f32.mrb[133].mxu0  ;;  %v3167_v60 = vpop.f32.mrb[133].mxu1 }
 0x2ea   : > { %v3410_v23 = vsub.f32 0.0, %v3167_v60  ;;  %v8750_v61 = vpop.f32.mrb[134].mxu0  ;;  %v6212_v37 = vpop.f32.mrb[134].mxu1 }
 0x2eb   : > { %v3482_v12 = vmul.f32 1.442695, %v3412_v8  ;;  %v3413_v59 = vsub.f32 0.0, %v6212_v37  ;;  %v8752_v31 = vpop.f32.mrb[135].mxu0  ;;  %v3170_v22 = vpop.f32.mrb[135].mxu1 }
 0x2ec   : > { %v3478_v51 = vmul.f32 1.442695, %v3410_v23  ;;  %v3411_v34 = vsub.f32 0.0, %v3170_v22 }
 0x2ed   : > { %6949 = vpow2.f32 %v3482_v12  ;;  %v3484_v45 = vmul.f32 1.442695, %v3413_v59 }
 0x2ee   : > { %6951 = vpow2.f32 %v3478_v51  ;;  %v3480_v46 = vmul.f32 1.442695, %v3411_v34  ;;  %v6942_v52 = vpop.eup %6941 }
 0x2ef   : > { %6953 = vpow2.f32 %v3484_v45  ;;  %v6944_v13 = vpop.eup %6943  ;;  %v3600_v18 = vadd.f32 1.0, %v6942_v52 }
 0x2f0   : > { %6955 = vpow2.f32 %v3480_v46  ;;  %v6946_v60 = vpop.eup %6945  ;;  %v3598_v4 = vadd.f32 1.0, %v6944_v13 }
 0x2f1   : > { %v8754_v42 = vpop.f32.mrb[136].mxu0  ;;  %v6215_v8 = vpop.f32.mrb[136].mxu1  ;;  %6957 = vrcp.f32 %v3600_v18  ;;  %v3601_v35 = vadd.f32 1.0, %v6946_v60 }
 0x2f2   : > { %v6948_v37 = vpop.eup %6947  ;;  %v3416_v0 = vsub.f32 0.0, %v6215_v8  ;;  %v8756_v23 = vpop.f32.mrb[137].mxu0  ;;  %6959 = vrcp.f32 %v3598_v4 }
 0x2f3   : > { %v3183_v12 = vpop.f32.mrb[137].mxu1  ;;  %v3599_v59 = vadd.f32 1.0, %v6948_v37  ;;  %v8758_v51 = vpop.f32.mrb[138].mxu0  ;;  %6961 = vrcp.f32 %v3601_v35 }
 0x2f4   : > { %v3414_v22 = vsub.f32 0.0, %v3183_v12  ;;  %v6216_v34 = vpop.f32.mrb[138].mxu1  ;;  %v3490_v45 = vmul.f32 1.442695, %v3416_v0  ;;  %v8760_v52 = vpop.f32.mrb[139].mxu0 }
 0x2f5   : > { %v3417_v46 = vsub.f32 0.0, %v6216_v34  ;;  %v3186_v13 = vpop.f32.mrb[139].mxu1  ;;  %6963 = vrcp.f32 %v3599_v59 }
 0x2f6   : > { %v3486_v26 = vmul.f32 1.442695, %v3414_v22  ;;  %v3415_v18 = vsub.f32 0.0, %v3186_v13  ;;  %6965 = vpow2.f32 %v3490_v45  ;;  %v3793_v13 = vmul.f32 0.70710677, %v8200_v1 }
 0x2f7   : > { %v3492_v60 = vmul.f32 1.442695, %v3417_v46  ;;  %v6950_v8 = vpop.eup %6949 }
 0x2f8   : > { %6967 = vpow2.f32 %v3486_v26  ;;  %v3488_v3 = vmul.f32 1.442695, %v3415_v18  ;;  %v6952_v4 = vpop.eup %6951  ;;  %v3604_v37 = vadd.f32 1.0, %v6950_v8  ;;  %v3790_v26 = vmul.f32 0.70710677, %v8195_v53 }
 0x2f9   : > { %6969 = vpow2.f32 %v3492_v60  ;;  %v6954_v12 = vpop.eup %6953  ;;  %v3602_v35 = vadd.f32 1.0, %v6952_v4 }
 0x2fa   : > { %6971 = vpow2.f32 %v3488_v3  ;;  %v8763_v0 = vpop.f32.mrb[140].mxu0  ;;  %v6219_v34 = vpop.f32.mrb[140].mxu1  ;;  %v3605_v59 = vadd.f32 1.0, %v6954_v12 }
 0x2fb   : > { %v6956_v10 = vpop.eup %6955  ;;  %6973 = vrcp.f32 %v3604_v37  ;;  %v3420_v22 = vsub.f32 0.0, %v6219_v34  ;;  %v8765_v45 = vpop.f32.mrb[141].mxu0 }
 0x2fc   : > { %v3199_v46 = vpop.f32.mrb[141].mxu1  ;;  %6975 = vrcp.f32 %v3602_v35  ;;  %v3603_v18 = vadd.f32 1.0, %v6956_v10  ;;  %v8769_v29 = vpop.f32.mrb[142].mxu0 }
 0x2fd   : > { %v3418_v60 = vsub.f32 0.0, %v3199_v46  ;;  %v6220_v3 = vpop.f32.mrb[142].mxu1  ;;  %v6958_v8 = vpop.eup %6957  ;;  %6977 = vrcp.f32 %v3605_v59  ;;  %v3498_v4 = vmul.f32 1.442695, %v3420_v22  ;;  %v3791_v46 = vmul.f32 0.70710677, %v8208_v43 }
 0x2fe   : > { %v3421_v62 = vsub.f32 0.0, %v6220_v3  ;;  %v8771_v37 = vpop.f32.mrb[143].mxu0  ;;  %v3202_v12 = vpop.f32.mrb[143].mxu1  ;;  %v3728_v55 = vmul.f32 %v6958_v8, %v8738_v24  ;;  %6979 = vrcp.f32 %v3603_v18  ;;  %v3795_v43 = vmul.f32 0.70710677, %v8255_v54 }
 0x2ff   : > { %v6960_v34 = vpop.eup %6959  ;;  %v3494_v53 = vmul.f32 1.442695, %v3418_v60  ;;  %v3419_v27 = vsub.f32 0.0, %v3202_v12  ;;  %6981 = vpow2.f32 %v3498_v4  ;;  %v3794_v60 = vmul.f32 0.70710677, %v8241_v44 }
 0x300   : > { %v6962_v1 = vpop.eup %6961  ;;  %v3500_v10 = vmul.f32 1.442695, %v3421_v62  ;;  %v3726_v35 = vmul.f32 %v6960_v34, %v8740_v16  ;;  %v8776_v59 = vadd.f32 %v3792_v39, %v3728_v55 }
 0x301   : > { %v6964_v38 = vpop.eup %6963  ;;  %v3729_v22 = vmul.f32 %v6962_v1, %v8742_v19  ;;  %6983 = vpow2.f32 %v3494_v53  ;;  %v3496_v3 = vmul.f32 1.442695, %v3419_v27 }
 0x302   : > { %v6966_v9 = vpop.eup %6965  ;;  %6985 = vpow2.f32 %v3500_v10  ;;  %v3727_v24 = vmul.f32 %v6964_v38, %v8744_v25  ;;  %v8780_v18 = vadd.f32 %v3790_v26, %v3726_v35  ;;  %v3796_v38 = vmul.f32 0.70710677, %v8237_v14 }
 0x303   : > { %v6968_v62 = vpop.eup %6967  ;;  %v8783_v8 = vadd.f32 %v3793_v13, %v3729_v22  ;;  %v3608_v16 = vadd.f32 1.0, %v6966_v9  ;;  %6987 = vpow2.f32 %v3496_v3  ;;  %v8786_v19 = vpop.f32.mrb[144].mxu0 }
 0x304   : > { %v6970_v55 = vpop.eup %6969  ;;  %v3606_v39 = vadd.f32 1.0, %v6968_v62  ;;  %v6223_v27 = vpop.f32.mrb[144].mxu1  ;;  %v8788_v4 = vadd.f32 %v3791_v46, %v3727_v24 }
 0x305   : > { %v6972_v25 = vpop.eup %6971  ;;  %6989 = vrcp.f32 %v3608_v16  ;;  %v3609_v26 = vadd.f32 1.0, %v6970_v55  ;;  %v3424_v44 = vsub.f32 0.0, %v6223_v27  ;;  %v8791_v12 = vpop.f32.mrb[145].mxu0  ;;  %v3929_v9 = vpack.c.bf16 %v8783_v8, %v8776_v59 }
 0x306   : > { %v3215_v13 = vpop.f32.mrb[145].mxu1  ;;  %v6974_v54 = vpop.eup %6973  ;;  %6991 = vrcp.f32 %v3606_v39  ;;  %v3607_v34 = vadd.f32 1.0, %v6972_v25  ;;  %v3928_v14 = vpack.c.bf16 %v8788_v4, %v8780_v18  ;;  %v3797_v27 = vmul.f32 0.70710677, %v8247_v30 }
 0x307   : > { %v3422_v53 = vsub.f32 0.0, %v3215_v13  ;;  %v8795_v1 = vpop.f32.mrb[146].mxu0  ;;  %v6224_v10 = vpop.f32.mrb[146].mxu1  ;;  %6993 = vrcp.f32 %v3609_v26  ;;  %v3506_v46 = vmul.f32 1.442695, %v3424_v44  ;;  %v3732_v62 = vmul.f32 %v6974_v54, %v8746_v49 }
 0x308   : > { %v6976_v35 = vpop.eup %6975  ;;  %v3425_v22 = vsub.f32 0.0, %v6224_v10  ;;  %v8799_v3 = vpop.f32.mrb[147].mxu0  ;;  %6995 = vrcp.f32 %v3607_v34  ;;  %6273 = vmatprep.mubr.msk.bf16.mxu0 %vm345_vm0, %v3928_v14  ;;  %6341 = vmatprep.mubr.msk.bf16.mxu1 %vm345_vm0, %v3928_v14 }
 0x309   : > { %v3218_v24 = vpop.f32.mrb[147].mxu1  ;;  %v6978_v16 = vpop.eup %6977  ;;  %v3502_v55 = vmul.f32 1.442695, %v3422_v53  ;;  %6997 = vpow2.f32 %v3506_v46  ;;  %6274 = vmatmul.mubr.msk.bf16.vlgmr.msra.gmra.mrb[192].mxu0 %vm345_vm0, %v3929_v9  ;;  %6342 = vmatmul.mubr.msk.bf16.vlgmr.msra.gmra.mrb[192].mxu1 %vm345_vm0, %v3929_v9  ;;  %v3730_v44 = vmul.f32 %v6976_v35, %v8748_v50  ;;  %v8810_v53 = vadd.f32 %v3796_v38, %v3732_v62 }
 0x30a   : > { %v3423_v39 = vsub.f32 0.0, %v3218_v24  ;;  %v6980_v25 = vpop.eup %6979  ;;  %v3508_v26 = vmul.f32 1.442695, %v3425_v22  ;;  %v3733_v49 = vmul.f32 %v6978_v16, %v8750_v61 }
 0x30b   : > { %v6982_v13 = vpop.eup %6981  ;;  %6999 = vpow2.f32 %v3502_v55  ;;  %v3731_v34 = vmul.f32 %v6980_v25, %v8752_v31  ;;  %v8812_v14 = vadd.f32 %v3794_v60, %v3730_v44  ;;  %v8816_v50 = vpop.f32.mrb[148].mxu0  ;;  %v3798_v60 = vmul.f32 0.70710677, %v8285_v56 }
 0x30c   : > { %v3504_v54 = vmul.f32 1.442695, %v3423_v39  ;;  %v6984_v10 = vpop.eup %6983  ;;  %v3612_v30 = vadd.f32 1.0, %v6982_v13  ;;  %7001 = vpow2.f32 %v3508_v26  ;;  %v8814_v46 = vadd.f32 %v3797_v27, %v3733_v49  ;;  %v6227_v61 = vpop.f32.mrb[148].mxu1 }
 0x30d   : > { %v6986_v22 = vpop.eup %6985  ;;  %v3610_v9 = vadd.f32 1.0, %v6984_v10  ;;  %v8818_v35 = vadd.f32 %v3795_v43, %v3731_v34  ;;  %v3428_v38 = vsub.f32 0.0, %v6227_v61  ;;  %v8820_v62 = vpop.f32.mrb[149].mxu0 }
 0x30e   : > { %7003 = vpow2.f32 %v3504_v54  ;;  %v6988_v24 = vpop.eup %6987  ;;  %v3613_v31 = vadd.f32 1.0, %v6986_v22  ;;  %v3231_v16 = vpop.f32.mrb[149].mxu1  ;;  %v3931_v34 = vpack.c.bf16 %v8814_v46, %v8810_v53  ;;  %v3800_v22 = vmul.f32 0.70710677, %v8278_v41 }
 0x30f   : > { %7005 = vrcp.f32 %v3612_v30  ;;  %v3611_v55 = vadd.f32 1.0, %v6988_v24  ;;  %v3426_v39 = vsub.f32 0.0, %v3231_v16  ;;  %v8823_v27 = vpop.f32.mrb[150].mxu0  ;;  %v6228_v25 = vpop.f32.mrb[150].mxu1  ;;  %v3930_v26 = vpack.c.bf16 %v8818_v35, %v8812_v14 }
 0x310   : > { %7007 = vrcp.f32 %v3610_v9  ;;  %v6990_v43 = vpop.eup %6989  ;;  %v3514_v44 = vmul.f32 1.442695, %v3428_v38  ;;  %v3429_v49 = vsub.f32 0.0, %v6228_v25  ;;  %v8827_v13 = vpop.f32.mrb[151].mxu0 }
 0x311   : > { %7009 = vrcp.f32 %v3613_v31  ;;  %v3234_v54 = vpop.f32.mrb[151].mxu1  ;;  %v6992_v56 = vpop.eup %6991  ;;  %v3510_v10 = vmul.f32 1.442695, %v3426_v39  ;;  %6277 = vmatprep.mubr.msk.bf16.mxu0 %vm345_vm0, %v3930_v26  ;;  %6345 = vmatprep.mubr.msk.bf16.mxu1 %vm345_vm0, %v3930_v26  ;;  %v3801_v31 = vmul.f32 0.70710677, %v8291_v17 }
 0x312   : > { %7011 = vrcp.f32 %v3611_v55  ;;  %v3427_v30 = vsub.f32 0.0, %v3234_v54  ;;  %v6994_v9 = vpop.eup %6993  ;;  %v3516_v61 = vmul.f32 1.442695, %v3429_v49  ;;  %6278 = vmatmul.mubr.msk.bf16.gmra.mrb[196].mxu0 %vm345_vm0, %v3931_v34  ;;  %6346 = vmatmul.mubr.msk.bf16.gmra.mrb[196].mxu1 %vm345_vm0, %v3931_v34  ;;  %v3734_v24 = vmul.f32 %v6992_v56, %v8756_v23 }
 0x313   : > { %7013 = vpow2.f32 %v3514_v44  ;;  %v6996_v38 = vpop.eup %6995  ;;  %v3736_v55 = vmul.f32 %v6990_v43, %v8754_v42  ;;  %v3737_v39 = vmul.f32 %v6994_v9, %v8758_v51  ;;  %v3799_v26 = vmul.f32 0.70710677, %v8299_v2 }
 0x314   : > { %7015 = vpow2.f32 %v3510_v10  ;;  %v3512_v16 = vmul.f32 1.442695, %v3427_v30  ;;  %v6998_v25 = vpop.eup %6997  ;;  %v3735_v41 = vmul.f32 %v6996_v38, %v8760_v52  ;;  %v8842_v44 = vadd.f32 %v3798_v60, %v3734_v24  ;;  %v8851_v10 = vpop.f32.mrb[152].mxu0 }
 0x315   : > { %7017 = vpow2.f32 %v3516_v61  ;;  %v7000_v49 = vpop.eup %6999  ;;  %v3616_v54 = vadd.f32 1.0, %v6998_v25  ;;  %v8844_v23 = vadd.f32 %v3800_v22, %v3736_v55  ;;  %v8846_v17 = vadd.f32 %v3801_v31, %v3737_v39  ;;  %v6231_v2 = vpop.f32.mrb[152].mxu1 }
 0x316   : > { %7019 = vpow2.f32 %v3512_v16  ;;  %v7002_v34 = vpop.eup %7001  ;;  %v3614_v56 = vadd.f32 1.0, %v7000_v49  ;;  %v8848_v42 = vadd.f32 %v3799_v26, %v3735_v41  ;;  %v3802_v51 = vmul.f32 0.70710677, %v8323_v36  ;;  %v8856_v24 = vpop.f32.mrb[153].mxu0 }
 0x317   : > { %9861 = vst [vmem:[#allocation33_spill] sm:$0xff] %v8846_v17  ;;  %7021 = vrcp.f32 %v3616_v54  ;;  %v3617_v52 = vadd.f32 1.0, %v7002_v34  ;;  %v3933_v60 = vpack.c.bf16 %v8846_v17, %v8844_v23  ;;  %v3803_v30 = vmul.f32 0.70710677, %v8337_v7  ;;  %v3247_v31 = vpop.f32.mrb[153].mxu1  ;;  %v8860_v55 = vpop.f32.mrb[154].mxu0 }
 0x318   : > { %9862 = vst [vmem:[#allocation34_spill] sm:$0xff] %v8848_v42  ;;  %v7004_v43 = vpop.eup %7003  ;;  %7023 = vrcp.f32 %v3614_v56  ;;  %v3432_v61 = vsub.f32 0.0, %v6231_v2  ;;  %v3932_v36 = vpack.c.bf16 %v8848_v42, %v8842_v44  ;;  %v3430_v16 = vsub.f32 0.0, %v3247_v31  ;;  %v6232_v39 = vpop.f32.mrb[154].mxu1 }
 0x319   : > { %v7006_v22 = vpop.eup %7005  ;;  %v3615_v9 = vadd.f32 1.0, %v7004_v43  ;;  %7025 = vrcp.f32 %v3617_v52  ;;  %v3804_v7 = vmul.f32 0.70710677, %v8319_v40  ;;  %v3433_v49 = vsub.f32 0.0, %v6232_v39  ;;  %v8864_v54 = vpop.f32.mrb[155].mxu0 }
 0x31a   : > { %v7008_v38 = vpop.eup %7007  ;;  %v3740_v25 = vmul.f32 %v7006_v22, %v8763_v0  ;;  %v3522_v26 = vmul.f32 1.442695, %v3432_v61  ;;  %v3250_v34 = vpop.f32.mrb[155].mxu1  ;;  %6281 = vmatprep.mubr.msk.bf16.mxu0 %vm345_vm0, %v3932_v36  ;;  %6349 = vmatprep.mubr.msk.bf16.mxu1 %vm345_vm0, %v3932_v36  ;;  %v3518_v52 = vmul.f32 1.442695, %v3430_v16  ;;  %v9865_v16 = vld [vmem:[#allocation37_spill] sm:$0xff] }
 0x31b   : > { %v7010_v41 = vpop.eup %7009  ;;  %7027 = vrcp.f32 %v3615_v9  ;;  %v3738_v56 = vmul.f32 %v7008_v38, %v8765_v45  ;;  %v3431_v2 = vsub.f32 0.0, %v3250_v34  ;;  %6282 = vmatmul.mubr.msk.bf16.gmra.mrb[200].mxu0 %vm345_vm0, %v3933_v60  ;;  %6350 = vmatmul.mubr.msk.bf16.gmra.mrb[200].mxu1 %vm345_vm0, %v3933_v60  ;;  %v3805_v0 = vmul.f32 0.70710677, %v8329_v63  ;;  %v9867_v63 = vld [vmem:[#allocation3_spill] sm:$0xff] }
 0x31c   : > { %v7012_v43 = vpop.eup %7011  ;;  %v3741_v40 = vmul.f32 %v7010_v41, %v8769_v29  ;;  %7029 = vpow2.f32 %v3522_v26  ;;  %v3524_v9 = vmul.f32 1.442695, %v3433_v49  ;;  %v8876_v38 = vadd.f32 %v3804_v7, %v3740_v25 }
 0x31d   : > { %v7014_v22 = vpop.eup %7013  ;;  %v3739_v61 = vmul.f32 %v7012_v43, %v8771_v37  ;;  %v8874_v31 = vadd.f32 %v3802_v51, %v3738_v56  ;;  %7031 = vpow2.f32 %v3518_v52  ;;  %v3806_v39 = vmul.f32 0.70710677, %v9865_v16  ;;  %v8882_v51 = vpop.f32.mrb[156].mxu0 }
 0x31e   : > { %v7016_v36 = vpop.eup %7015  ;;  %v3620_v45 = vadd.f32 1.0, %v7014_v22  ;;  %9864 = vst [vmem:[#allocation40_spill] sm:$0xff] %v8876_v38  ;;  %7033 = vpow2.f32 %v3524_v9  ;;  %v3807_v41 = vmul.f32 0.70710677, %v9867_v63  ;;  %v3520_v37 = vmul.f32 1.442695, %v3431_v2 }
 0x31f   : > { %9863 = vst [vmem:[#allocation35_spill] sm:$0xff] %v8874_v31  ;;  %v7018_v34 = vpop.eup %7017  ;;  %v3618_v60 = vadd.f32 1.0, %v7016_v36  ;;  %v8879_v29 = vadd.f32 %v3803_v30, %v3739_v61  ;;  %v6235_v56 = vpop.f32.mrb[156].mxu1  ;;  %v8884_v43 = vadd.f32 %v3805_v0, %v3741_v40  ;;  %v9869_v40 = vld [vmem:[#allocation36_spill] sm:$0xff] }
 0x320   : > { %v7020_v26 = vpop.eup %7019  ;;  %7035 = vrcp.f32 %v3620_v45  ;;  %v3621_v49 = vadd.f32 1.0, %v7018_v34  ;;  %v3436_v7 = vsub.f32 0.0, %v6235_v56  ;;  %v8886_v52 = vpop.f32.mrb[157].mxu0  ;;  %v3808_v0 = vmul.f32 0.70710677, %v9869_v40 }
 0x321   : > { %9866 = vst [vmem:[#allocation37_spill] sm:$0xff] %v8879_v29  ;;  %9868 = vst [vmem:[#allocation3_spill] sm:$0xff] %v8884_v43  ;;  %7037 = vrcp.f32 %v3618_v60  ;;  %v3619_v25 = vadd.f32 1.0, %v7020_v26  ;;  %v3263_v22 = vpop.f32.mrb[157].mxu1  ;;  %v3934_v30 = vpack.c.bf16 %v8879_v29, %v8874_v31  ;;  %v7022_v9 = vpop.eup %7021  ;;  %v3935_v45 = vpack.c.bf16 %v8884_v43, %v8876_v38  ;;  %v9890_v38 = vld [vmem:[#allocation10_spill] sm:$0xff] }
 0x322   : > { %7039 = vrcp.f32 %v3621_v49  ;;  %v3434_v61 = vsub.f32 0.0, %v3263_v22  ;;  %v8890_v36 = vpop.f32.mrb[158].mxu0  ;;  %v6236_v2 = vpop.f32.mrb[158].mxu1  ;;  %v3530_v34 = vmul.f32 1.442695, %v3436_v7  ;;  %v3744_v49 = vmul.f32 %v7022_v9, %v8786_v19 }
 0x323   : > { %v7024_v16 = vpop.eup %7023  ;;  %7041 = vrcp.f32 %v3619_v25  ;;  %v3437_v60 = vsub.f32 0.0, %v6236_v2  ;;  %v8895_v63 = vpop.f32.mrb[159].mxu0  ;;  %6285 = vmatprep.mubr.msk.bf16.mxu0 %vm345_vm0, %v3934_v30  ;;  %6353 = vmatprep.mubr.msk.bf16.mxu1 %vm345_vm0, %v3934_v30  ;;  %v9870_v25 = vld [vmem:[#allocation2_spill] sm:$0xff]  ;;  %v3820_v17 = vmul.f32 0.70710677, %v9890_v38 }
 0x324   : > { %v3266_v26 = vpop.f32.mrb[159].mxu1  ;;  %v7026_v56 = vpop.eup %7025  ;;  %7043 = vpow2.f32 %v3520_v37  ;;  %v3526_v22 = vmul.f32 1.442695, %v3434_v61  ;;  %6286 = vmatmul.mubr.msk.bf16.gmra.mrb[204].mxu0 %vm345_vm0, %v3935_v45  ;;  %6354 = vmatmul.mubr.msk.bf16.gmra.mrb[204].mxu1 %vm345_vm0, %v3935_v45  ;;  %v3809_v7 = vmul.f32 0.70710677, %v9870_v25  ;;  %v3742_v43 = vmul.f32 %v7024_v16, %v8791_v12 }
 0x325   : > { %v3435_v29 = vsub.f32 0.0, %v3266_v26  ;;  %v7028_v2 = vpop.eup %7027  ;;  %7045 = vpow2.f32 %v3530_v34  ;;  %v3532_v40 = vmul.f32 1.442695, %v3437_v60  ;;  %v3745_v31 = vmul.f32 %v7026_v56, %v8795_v1 }
 0x326   : > { %7047 = vpow2.f32 %v3526_v22  ;;  %v3743_v19 = vmul.f32 %v7028_v2, %v8799_v3  ;;  %v8906_v37 = vadd.f32 %v3808_v0, %v3744_v49  ;;  %v7030_v9 = vpop.eup %7029  ;;  %v8908_v61 = vadd.f32 %v3806_v39, %v3742_v43  ;;  %v8914_v1 = vpop.f32.mrb[160].mxu0  ;;  %v9875_v0 = vld [vmem:[#allocation39_spill] sm:$0xff] }
 0x327   : > { %v3528_v30 = vmul.f32 1.442695, %v3435_v29  ;;  %7049 = vpow2.f32 %v3532_v40  ;;  %v8910_v45 = vadd.f32 %v3809_v7, %v3745_v31  ;;  %v7032_v26 = vpop.eup %7031  ;;  %v3624_v25 = vadd.f32 1.0, %v7030_v9  ;;  %v6239_v29 = vpop.f32.mrb[160].mxu1 }
 0x328   : > { %9871 = vst [vmem:[#allocation36_spill] sm:$0xff] %v8906_v37  ;;  %9872 = vst [vmem:[#allocation2_spill] sm:$0xff] %v8908_v61  ;;  %v8912_v34 = vadd.f32 %v3807_v41, %v3743_v19  ;;  %v7034_v12 = vpop.eup %7033  ;;  %v3622_v16 = vadd.f32 1.0, %v7032_v26  ;;  %v3810_v60 = vmul.f32 0.70710677, %v9875_v0  ;;  %v3440_v31 = vsub.f32 0.0, %v6239_v29 }
 0x329   : > { %9873 = vst [vmem:[#allocation41_spill] sm:$0xff] %v8910_v45  ;;  %7051 = vpow2.f32 %v3528_v30  ;;  %v3937_v3 = vpack.c.bf16 %v8910_v45, %v8906_v37  ;;  %v3625_v39 = vadd.f32 1.0, %v7034_v12  ;;  %v8919_v43 = vpop.f32.mrb[161].mxu0  ;;  %v3279_v56 = vpop.f32.mrb[161].mxu1  ;;  %v9876_v30 = vld [vmem:[#allocation5_spill] sm:$0xff] }
 0x32a   : > { %9874 = vst [vmem:[#allocation42_spill] sm:$0xff] %v8912_v34  ;;  %v7036_v49 = vpop.eup %7035  ;;  %7053 = vrcp.f32 %v3624_v25  ;;  %v3936_v41 = vpack.c.bf16 %v8912_v34, %v8908_v61  ;;  %v3438_v7 = vsub.f32 0.0, %v3279_v56  ;;  %v8923_v2 = vpop.f32.mrb[162].mxu0  ;;  %v3811_v19 = vmul.f32 0.70710677, %v9876_v30 }
 0x32b   : > { %v7038_v22 = vpop.eup %7037  ;;  %7055 = vrcp.f32 %v3622_v16  ;;  %v6240_v40 = vpop.f32.mrb[162].mxu1  ;;  %v3748_v9 = vmul.f32 %v7036_v49, %v8816_v50  ;;  %v3538_v25 = vmul.f32 1.442695, %v3440_v31  ;;  %v9877_v49 = vld [vmem:[#allocation38_spill] sm:$0xff] }
 0x32c   : > { %v7040_v26 = vpop.eup %7039  ;;  %7057 = vrcp.f32 %v3625_v39  ;;  %v3441_v12 = vsub.f32 0.0, %v6240_v40  ;;  %v8927_v29 = vpop.f32.mrb[163].mxu0  ;;  %6289 = vmatprep.mubr.msk.bf16.mxu0 %vm345_vm0, %v3936_v41  ;;  %6357 = vmatprep.mubr.msk.bf16.mxu1 %vm345_vm0, %v3936_v41  ;;  %v3746_v16 = vmul.f32 %v7038_v22, %v8820_v62  ;;  %v3534_v45 = vmul.f32 1.442695, %v3438_v7  ;;  %v9879_v22 = vld [vmem:[#allocation4_spill] sm:$0xff] }
 0x32d   : > { %v3282_v0 = vpop.f32.mrb[163].mxu1  ;;  %v7042_v56 = vpop.eup %7041  ;;  %6290 = vmatmul.mubr.msk.bf16.gmra.mrb[208].mxu0 %vm345_vm0, %v3937_v3  ;;  %6358 = vmatmul.mubr.msk.bf16.gmra.mrb[208].mxu1 %vm345_vm0, %v3937_v3  ;;  %v3749_v50 = vmul.f32 %v7040_v26, %v8823_v27  ;;  %v3812_v39 = vmul.f32 0.70710677, %v9877_v49  ;;  %7059 = vpow2.f32 %v3538_v25  ;;  %v3813_v7 = vmul.f32 0.70710677, %v9879_v22 }
 0x32e   : > { %v3439_v34 = vsub.f32 0.0, %v3282_v0  ;;  %v7044_v31 = vpop.eup %7043  ;;  %v3540_v40 = vmul.f32 1.442695, %v3441_v12  ;;  %v3747_v30 = vmul.f32 %v7042_v56, %v8827_v13  ;;  %v8937_v61 = vadd.f32 %v3810_v60, %v3746_v16  ;;  %v8944_v49 = vpop.f32.mrb[164].mxu0 }
 0x32f   : > { %v7046_v41 = vpop.eup %7045  ;;  %v3623_v62 = vadd.f32 1.0, %v7044_v31  ;;  %7061 = vpow2.f32 %v3534_v45  ;;  %v8940_v0 = vadd.f32 %v3812_v39, %v3748_v9  ;;  %v6243_v13 = vpop.f32.mrb[164].mxu1  ;;  %v8946_v60 = vadd.f32 %v3813_v7, %v3749_v50 }
 0x330   : > { %9878 = vst [vmem:[#allocation39_spill] sm:$0xff] %v8937_v61  ;;  %v7048_v37 = vpop.eup %7047  ;;  %v3628_v3 = vadd.f32 1.0, %v7046_v41  ;;  %7063 = vpow2.f32 %v3540_v40  ;;  %v8942_v27 = vadd.f32 %v3811_v19, %v3747_v30  ;;  %v3536_v12 = vmul.f32 1.442695, %v3439_v34  ;;  %v8948_v9 = vpop.f32.mrb[165].mxu0 }
 0x331   : > { %9880 = vst [vmem:[#allocation5_spill] sm:$0xff] %v8940_v0  ;;  %v7050_v26 = vpop.eup %7049  ;;  %7065 = vrcp.f32 %v3623_v62  ;;  %v3626_v25 = vadd.f32 1.0, %v7048_v37  ;;  %9882 = vst [vmem:[#allocation4_spill] sm:$0xff] %v8946_v60  ;;  %v3444_v56 = vsub.f32 0.0, %v6243_v13  ;;  %v3295_v39 = vpop.f32.mrb[165].mxu1 }
 0x332   : > { %9881 = vst [vmem:[#allocation38_spill] sm:$0xff] %v8942_v27  ;;  %7067 = vrcp.f32 %v3628_v3  ;;  %v3629_v45 = vadd.f32 1.0, %v7050_v26  ;;  %v3938_v19 = vpack.c.bf16 %v8942_v27, %v8937_v61  ;;  %v3442_v40 = vsub.f32 0.0, %v3295_v39  ;;  %v8952_v37 = vpop.f32.mrb[166].mxu0  ;;  %v6244_v34 = vpop.f32.mrb[166].mxu1 }
 0x333   : > { %v7052_v16 = vpop.eup %7051  ;;  %7069 = vrcp.f32 %v3626_v25  ;;  %v3814_v30 = vmul.f32 0.70710677, %v8447_v21  ;;  %v3546_v41 = vmul.f32 1.442695, %v3444_v56  ;;  %v3445_v62 = vsub.f32 0.0, %v6244_v34  ;;  %v8955_v22 = vpop.f32.mrb[167].mxu0 }
 0x334   : > { %v3627_v31 = vadd.f32 1.0, %v7052_v16  ;;  %v7054_v50 = vpop.eup %7053  ;;  %7071 = vrcp.f32 %v3629_v45  ;;  %v3298_v7 = vpop.f32.mrb[167].mxu1  ;;  %6293 = vmatprep.mubr.msk.bf16.mxu0 %vm345_vm0, %v3938_v19  ;;  %6361 = vmatprep.mubr.msk.bf16.mxu1 %vm345_vm0, %v3938_v19  ;;  %v3939_v3 = vpack.c.bf16 %v8946_v60, %v8940_v0  ;;  %v3542_v25 = vmul.f32 1.442695, %v3442_v40  ;;  %v9883_v16 = vld [vmem:[#allocation6_spill] sm:$0xff] }
 0x335   : > { %v7056_v26 = vpop.eup %7055  ;;  %v3443_v13 = vsub.f32 0.0, %v3298_v7  ;;  %v3816_v21 = vmul.f32 0.70710677, %v9883_v16  ;;  %v3548_v45 = vmul.f32 1.442695, %v3445_v62  ;;  %v3752_v19 = vmul.f32 %v7054_v50, %v8851_v10 }
 0x336   : > { %7073 = vrcp.f32 %v3627_v31  ;;  %v7058_v39 = vpop.eup %7057  ;;  %6294 = vmatmul.mubr.msk.bf16.gmra.mrb[212].mxu0 %vm345_vm0, %v3939_v3  ;;  %6362 = vmatmul.mubr.msk.bf16.gmra.mrb[212].mxu1 %vm345_vm0, %v3939_v3  ;;  %v3750_v56 = vmul.f32 %v7056_v26, %v8856_v24  ;;  %v9884_v31 = vld [vmem:[#allocation7_spill] sm:$0xff]  ;;  %v9886_v3 = vld [vmem:[#allocation8_spill] sm:$0xff]  ;;  %v9888_v26 = vld [vmem:[#allocation9_spill] sm:$0xff] }
 0x337   : > { %7075 = vpow2.f32 %v3536_v12  ;;  %v3544_v34 = vmul.f32 1.442695, %v3443_v13  ;;  %v3753_v27 = vmul.f32 %v7058_v39, %v8860_v55  ;;  %v3817_v40 = vmul.f32 0.70710677, %v9884_v31  ;;  %v7060_v7 = vpop.eup %7059 }
 0x338   : > { %7077 = vpow2.f32 %v3546_v41  ;;  %v8968_v16 = vadd.f32 %v3814_v30, %v3750_v56  ;;  %v8970_v12 = vadd.f32 %v3816_v21, %v3752_v19  ;;  %v3632_v60 = vadd.f32 1.0, %v7060_v7  ;;  %v8975_v41 = vpop.f32.mrb[168].mxu0  ;;  %v6247_v55 = vpop.f32.mrb[168].mxu1  ;;  %v9889_v7 = vld [vmem:[#allocation12_spill] sm:$0xff] }
 0x339   : > { %7079 = vpow2.f32 %v3542_v25  ;;  %v7062_v62 = vpop.eup %7061  ;;  %v3815_v61 = vmul.f32 0.70710677, %v9886_v3  ;;  %v8973_v24 = vadd.f32 %v3817_v40, %v3753_v27  ;;  %v3818_v13 = vmul.f32 0.70710677, %v9888_v26  ;;  %v8978_v39 = vpop.f32.mrb[169].mxu0 }
 0x33a   : > { %9885 = vst [vmem:[#allocation6_spill] sm:$0xff] %v8970_v12  ;;  %7081 = vpow2.f32 %v3548_v45  ;;  %v7064_v10 = vpop.eup %7063  ;;  %v3630_v50 = vadd.f32 1.0, %v7062_v62  ;;  %v3448_v21 = vsub.f32 0.0, %v6247_v55  ;;  %v3311_v56 = vpop.f32.mrb[169].mxu1  ;;  %v3819_v62 = vmul.f32 0.70710677, %v9889_v7 }
 0x33b   : > { %9887 = vst [vmem:[#allocation7_spill] sm:$0xff] %v8973_v24  ;;  %7083 = vpow2.f32 %v3544_v34  ;;  %v7066_v25 = vpop.eup %7065  ;;  %v3633_v30 = vadd.f32 1.0, %v7064_v10  ;;  %v3941_v45 = vpack.c.bf16 %v8973_v24, %v8970_v12  ;;  %v3446_v19 = vsub.f32 0.0, %v3311_v56  ;;  %v8982_v31 = vpop.f32.mrb[170].mxu0 }
 0x33c   : > { %7085 = vrcp.f32 %v3632_v60  ;;  %v7068_v27 = vpop.eup %7067  ;;  %v6248_v34 = vpop.f32.mrb[170].mxu1  ;;  %v3751_v40 = vmul.f32 %v7066_v25, %v8864_v54  ;;  %v3554_v60 = vmul.f32 1.442695, %v3448_v21 }
 0x33d   : > { %7087 = vrcp.f32 %v3630_v50  ;;  %v7070_v3 = vpop.eup %7069  ;;  %v3449_v10 = vsub.f32 0.0, %v6248_v34  ;;  %v8986_v55 = vpop.f32.mrb[171].mxu0  ;;  %v3756_v0 = vmul.f32 %v7068_v27, %v8882_v51  ;;  %v3550_v12 = vmul.f32 1.442695, %v3446_v19  ;;  %v9891_v27 = vld [vmem:[#allocation11_spill] sm:$0xff] }
 0x33e   : > { %7089 = vrcp.f32 %v3633_v30  ;;  %v3314_v26 = vpop.f32.mrb[171].mxu1  ;;  %v7072_v24 = vpop.eup %7071  ;;  %v8989_v56 = vadd.f32 %v3815_v61, %v3751_v40  ;;  %v3754_v25 = vmul.f32 %v7070_v3, %v8886_v52  ;;  %v3821_v19 = vmul.f32 0.70710677, %v9891_v27 }
 0x33f   : > { %v3447_v50 = vsub.f32 0.0, %v3314_v26  ;;  %7091 = vpow2.f32 %v3554_v60  ;;  %v3556_v54 = vmul.f32 1.442695, %v3449_v10  ;;  %v3757_v30 = vmul.f32 %v7072_v24, %v8890_v36 }
 0x340   : > { %v7074_v42 = vpop.eup %7073  ;;  %7093 = vpow2.f32 %v3550_v12  ;;  %v3940_v51 = vpack.c.bf16 %v8989_v56, %v8968_v16  ;;  %v8998_v40 = vadd.f32 %v3818_v13, %v3754_v25  ;;  %v9002_v52 = vpop.f32.mrb[172].mxu0  ;;  %v9004_v12 = vadd.f32 %v3820_v17, %v3756_v0 }
 0x341   : > { %v7076_v21 = vpop.eup %7075  ;;  %v3552_v34 = vmul.f32 1.442695, %v3447_v50  ;;  %7095 = vpow2.f32 %v3556_v54  ;;  %v3755_v38 = vmul.f32 %v7074_v42, %v8895_v63  ;;  %v6251_v36 = vpop.f32.mrb[172].mxu1  ;;  %v9006_v24 = vadd.f32 %v3821_v19, %v3757_v30 }
 0x342   : > { %v7078_v7 = vpop.eup %7077  ;;  %v3631_v61 = vadd.f32 1.0, %v7076_v21  ;;  %6297 = vmatprep.mubr.msk.bf16.mxu0 %vm345_vm0, %v3940_v51  ;;  %6365 = vmatprep.mubr.msk.bf16.mxu1 %vm345_vm0, %v3940_v51  ;;  %9892 = vst [vmem:[#allocation8_spill] sm:$0xff] %v9004_v12  ;;  %v3452_v42 = vsub.f32 0.0, %v6251_v36  ;;  %v9010_v63 = vpop.f32.mrb[173].mxu0 }
 0x343   : > { %v7080_v60 = vpop.eup %7079  ;;  %v3636_v10 = vadd.f32 1.0, %v7078_v7  ;;  %7097 = vpow2.f32 %v3552_v34  ;;  %9893 = vst [vmem:[#allocation9_spill] sm:$0xff] %v9006_v24  ;;  %6298 = vmatmul.mubr.msk.bf16.gmra.mrb[216].mxu0 %vm345_vm0, %v3941_v45  ;;  %6366 = vmatmul.mubr.msk.bf16.gmra.mrb[216].mxu1 %vm345_vm0, %v3941_v45  ;;  %v3327_v13 = vpop.f32.mrb[173].mxu1  ;;  %v9012_v50 = vadd.f32 %v3819_v62, %v3755_v38  ;;  %v3943_v36 = vpack.c.bf16 %v9006_v24, %v9004_v12 }
 0x344   : > { %v7082_v3 = vpop.eup %7081  ;;  %7099 = vrcp.f32 %v3631_v61  ;;  %v3634_v26 = vadd.f32 1.0, %v7080_v60  ;;  %v3450_v17 = vsub.f32 0.0, %v3327_v13  ;;  %v9014_v0 = vpop.f32.mrb[174].mxu0  ;;  %v3562_v51 = vmul.f32 1.442695, %v3452_v42 }
 0x345   : > { %9894 = vst [vmem:[#allocation12_spill] sm:$0xff] %v9012_v50  ;;  %v7084_v54 = vpop.eup %7083  ;;  %7101 = vrcp.f32 %v3636_v10  ;;  %v3637_v25 = vadd.f32 1.0, %v7082_v3  ;;  %v6252_v30 = vpop.f32.mrb[174].mxu1  ;;  %v3942_v38 = vpack.c.bf16 %v9012_v50, %v8998_v40  ;;  %v3822_v3 = vmul.f32 0.70710677, %v8522_v57 }
 0x346   : > { %v7086_v21 = vpop.eup %7085  ;;  %7103 = vrcp.f32 %v3634_v26  ;;  %v3635_v34 = vadd.f32 1.0, %v7084_v54  ;;  %v3453_v27 = vsub.f32 0.0, %v6252_v30  ;;  %v9016_v19 = vpop.f32.mrb[175].mxu0  ;;  %v3558_v61 = vmul.f32 1.442695, %v3450_v17 }
 0x347   : > { %v3330_v45 = vpop.f32.mrb[175].mxu1  ;;  %v7088_v7 = vpop.eup %7087  ;;  %7105 = vrcp.f32 %v3637_v25  ;;  %6301 = vmatprep.mubr.msk.bf16.mxu0 %vm345_vm0, %v3942_v38  ;;  %6369 = vmatprep.mubr.msk.bf16.mxu1 %vm345_vm0, %v3942_v38  ;;  %v3823_v42 = vmul.f32 0.70710677, %v8532_v48  ;;  %v3824_v13 = vmul.f32 0.70710677, %v8517_v6  ;;  %v3760_v17 = vmul.f32 %v7086_v21, %v8914_v1 }
 0x348   : > { %v3451_v62 = vsub.f32 0.0, %v3330_v45  ;;  %v7090_v60 = vpop.eup %7089  ;;  %7107 = vrcp.f32 %v3635_v34  ;;  %v3564_v10 = vmul.f32 1.442695, %v3453_v27  ;;  %v3758_v25 = vmul.f32 %v7088_v7, %v8919_v43  ;;  %v6255_v27 = vpop.f32.mrb[176].mxu1  ;;  %v9895_v45 = vld [vmem:[#allocation13_spill] sm:$0xff] }
 0x349   : > { %7109 = vpow2.f32 %v3562_v51  ;;  %v7092_v54 = vpop.eup %7091  ;;  %v3761_v30 = vmul.f32 %v7090_v60, %v8923_v2  ;;  %v9030_v51 = vpop.f32.mrb[176].mxu0  ;;  %v3456_v6 = vsub.f32 0.0, %v6255_v27 }
 0x34a   : > { %v3560_v26 = vmul.f32 1.442695, %v3451_v62  ;;  %7111 = vpow2.f32 %v3558_v61  ;;  %v7094_v34 = vpop.eup %7093  ;;  %v3640_v57 = vadd.f32 1.0, %v7092_v54  ;;  %v3825_v62 = vmul.f32 0.70710677, %v9895_v45  ;;  %v9035_v43 = vpop.f32.mrb[177].mxu0 }
 0x34b   : > { %7113 = vpow2.f32 %v3564_v10  ;;  %v7096_v38 = vpop.eup %7095  ;;  %v3638_v48 = vadd.f32 1.0, %v7094_v34  ;;  %6302 = vmatmul.mubr.msk.bf16.gmra.mrb[220].mxu0 %vm345_vm0, %v3943_v36  ;;  %6370 = vmatmul.mubr.msk.bf16.gmra.mrb[220].mxu1 %vm345_vm0, %v3943_v36  ;;  %v3343_v1 = vpop.f32.mrb[177].mxu1  ;;  %v9037_v2 = vadd.f32 %v3822_v3, %v3758_v25  ;;  %v9041_v54 = vadd.f32 %v3824_v13, %v3760_v17 }
 0x34c   : > { %7115 = vpow2.f32 %v3560_v26  ;;  %v3641_v7 = vadd.f32 1.0, %v7096_v38  ;;  %v3454_v61 = vsub.f32 0.0, %v3343_v1  ;;  %v9039_v60 = vpop.f32.mrb[178].mxu0  ;;  %v6256_v10 = vpop.f32.mrb[178].mxu1  ;;  %v3570_v45 = vmul.f32 1.442695, %v3456_v6 }
 0x34d   : > { %v7098_v21 = vpop.eup %7097  ;;  %7117 = vrcp.f32 %v3640_v57  ;;  %9896 = vst [vmem:[#allocation10_spill] sm:$0xff] %v9041_v54  ;;  %v3457_v36 = vsub.f32 0.0, %v6256_v10  ;;  %v9043_v27 = vpop.f32.mrb[179].mxu0  ;;  %v9046_v50 = vadd.f32 %v3825_v62, %v3761_v30  ;;  %v3826_v13 = vmul.f32 0.70710677, %v8551_v32 }
 0x34e   : > { %v7100_v26 = vpop.eup %7099  ;;  %7119 = vrcp.f32 %v3638_v48  ;;  %v3639_v34 = vadd.f32 1.0, %v7098_v21  ;;  %v3346_v24 = vpop.f32.mrb[179].mxu1  ;;  %v3566_v3 = vmul.f32 1.442695, %v3454_v61  ;;  %v3827_v21 = vmul.f32 0.70710677, %v8562_v5 }
 0x34f   : > { %v7102_v12 = vpop.eup %7101  ;;  %7121 = vrcp.f32 %v3641_v7  ;;  %v3455_v25 = vsub.f32 0.0, %v3346_v24  ;;  %v3759_v57 = vmul.f32 %v7100_v26, %v8927_v29  ;;  %v3572_v1 = vmul.f32 1.442695, %v3457_v36  ;;  %9897 = vst [vmem:[#allocation11_spill] sm:$0xff] %v9046_v50  ;;  %v9899_v7 = vld [vmem:[#allocation14_spill] sm:$0xff]  ;;  %v9900_v5 = vld [vmem:[#allocation15_spill] sm:$0xff] }
 0x350   : > { %v7104_v38 = vpop.eup %7103  ;;  %7123 = vrcp.f32 %v3639_v34  ;;  %v3945_v24 = vpack.c.bf16 %v9046_v50, %v9041_v54  ;;  %v3828_v61 = vmul.f32 0.70710677, %v9899_v7  ;;  %v9058_v62 = vpop.f32.mrb[180].mxu0  ;;  %v3829_v34 = vmul.f32 0.70710677, %v9900_v5 }
 0x351   : > { %v7106_v17 = vpop.eup %7105  ;;  %7125 = vpow2.f32 %v3570_v45  ;;  %v3568_v48 = vmul.f32 1.442695, %v3455_v25  ;;  %v9049_v6 = vadd.f32 %v3823_v42, %v3759_v57  ;;  %v3762_v29 = vmul.f32 %v7104_v38, %v8948_v9  ;;  %v6259_v42 = vpop.f32.mrb[180].mxu1 }
 0x352   : > { %v7108_v10 = vpop.eup %7107  ;;  %7127 = vpow2.f32 %v3566_v3  ;;  %v3460_v3 = vsub.f32 0.0, %v6259_v42  ;;  %v9062_v25 = vpop.f32.mrb[181].mxu0 }
 0x353   : > { %9898 = vst [vmem:[#allocation13_spill] sm:$0xff] %v9049_v6  ;;  %v7110_v30 = vpop.eup %7109  ;;  %7129 = vpow2.f32 %v3572_v1  ;;  %v3944_v32 = vpack.c.bf16 %v9049_v6, %v9037_v2  ;;  %v3763_v26 = vmul.f32 %v7108_v10, %v8955_v22  ;;  %v3359_v9 = vpop.f32.mrb[181].mxu1  ;;  %v9064_v57 = vadd.f32 %v3826_v13, %v3762_v29 }
 0x354   : > { %v7112_v45 = vpop.eup %7111  ;;  %v3644_v36 = vadd.f32 1.0, %v7110_v30  ;;  %7131 = vpow2.f32 %v3568_v48  ;;  %v3458_v7 = vsub.f32 0.0, %v3359_v9  ;;  %v9068_v50 = vpop.f32.mrb[182].mxu0  ;;  %v3764_v48 = vmul.f32 %v7102_v12, %v8944_v49 }
 0x355   : > { %v7114_v38 = vpop.eup %7113  ;;  %v3642_v1 = vadd.f32 1.0, %v7112_v45  ;;  %6305 = vmatprep.mubr.msk.bf16.mxu0 %vm345_vm0, %v3944_v32  ;;  %6373 = vmatprep.mubr.msk.bf16.mxu1 %vm345_vm0, %v3944_v32  ;;  %v6260_v22 = vpop.f32.mrb[182].mxu1  ;;  %v9070_v10 = vadd.f32 %v3827_v21, %v3763_v26  ;;  %v3578_v13 = vmul.f32 1.442695, %v3460_v3  ;;  %v3765_v3 = vmul.f32 %v7106_v17, %v8952_v37 }
 0x356   : > { %v7116_v30 = vpop.eup %7115  ;;  %7133 = vrcp.f32 %v3644_v36  ;;  %v3645_v42 = vadd.f32 1.0, %v7114_v38  ;;  %6306 = vmatmul.mubr.msk.bf16.gmra.mrb[224].mxu0 %vm345_vm0, %v3945_v24  ;;  %6374 = vmatmul.mubr.msk.bf16.gmra.mrb[224].mxu1 %vm345_vm0, %v3945_v24  ;;  %v3461_v29 = vsub.f32 0.0, %v6260_v22  ;;  %v9075_v5 = vpop.f32.mrb[183].mxu0  ;;  %v3574_v6 = vmul.f32 1.442695, %v3458_v7 }
 0x357   : > { %v3362_v32 = vpop.f32.mrb[183].mxu1  ;;  %v7118_v45 = vpop.eup %7117  ;;  %7135 = vrcp.f32 %v3642_v1  ;;  %v3643_v9 = vadd.f32 1.0, %v7116_v30  ;;  %v3946_v12 = vpack.c.bf16 %v9070_v10, %v9064_v57  ;;  %v3830_v36 = vmul.f32 0.70710677, %v8586_v47 }
 0x358   : > { %v3459_v21 = vsub.f32 0.0, %v3362_v32  ;;  %v7120_v26 = vpop.eup %7119  ;;  %7137 = vrcp.f32 %v3645_v42  ;;  %v3580_v49 = vmul.f32 1.442695, %v3461_v29  ;;  %v3831_v22 = vmul.f32 0.70710677, %v8596_v28 }
 0x359   : > { %v7122_v38 = vpop.eup %7121  ;;  %7139 = vrcp.f32 %v3643_v9  ;;  %6309 = vmatprep.mubr.msk.bf16.mxu0 %vm345_vm0, %v3946_v12  ;;  %6377 = vmatprep.mubr.msk.bf16.mxu1 %vm345_vm0, %v3946_v12  ;;  %v9084_v1 = vadd.f32 %v3828_v61, %v3764_v48  ;;  %v3766_v7 = vmul.f32 %v7120_v26, %v8978_v39  ;;  %v3768_v30 = vmul.f32 %v7118_v45, %v8975_v41  ;;  %v9092_v29 = vpop.f32.mrb[184].mxu0 }
 0x35a   : > { %v3576_v24 = vmul.f32 1.442695, %v3459_v21  ;;  %v7124_v54 = vpop.eup %7123  ;;  %7141 = vpow2.f32 %v3578_v13  ;;  %v9088_v42 = vadd.f32 %v3829_v34, %v3765_v3  ;;  %v3769_v28 = vmul.f32 %v7122_v38, %v8982_v31  ;;  %v6263_v32 = vpop.f32.mrb[184].mxu1  ;;  %v9901_v31 = vld [vmem:[#allocation16_spill] sm:$0xff] }
 0x35b   : > { %v7126_v47 = vpop.eup %7125  ;;  %7143 = vpow2.f32 %v3574_v6  ;;  %v3767_v37 = vmul.f32 %v7124_v54, %v8986_v55  ;;  %v9094_v61 = vadd.f32 %v3830_v36, %v3766_v7  ;;  %v3832_v39 = vmul.f32 0.70710677, %v8582_v20  ;;  %v9099_v34 = vpop.f32.mrb[185].mxu0 }
 0x35c   : > { %v7128_v17 = vpop.eup %7127  ;;  %v3648_v13 = vadd.f32 1.0, %v7126_v47  ;;  %7145 = vpow2.f32 %v3580_v49  ;;  %v3947_v6 = vpack.c.bf16 %v9088_v42, %v9084_v1  ;;  %v3375_v55 = vpop.f32.mrb[185].mxu1  ;;  %v3833_v54 = vmul.f32 0.70710677, %v9901_v31 }
 0x35d   : > { %v7130_v48 = vpop.eup %7129  ;;  %v3646_v41 = vadd.f32 1.0, %v7128_v17  ;;  %7147 = vpow2.f32 %v3576_v24  ;;  %v3464_v21 = vsub.f32 0.0, %v6263_v32  ;;  %v3462_v26 = vsub.f32 0.0, %v3375_v55  ;;  %v9102_v49 = vpop.f32.mrb[186].mxu0 }
 0x35e   : > { %v7132_v45 = vpop.eup %7131  ;;  %7149 = vrcp.f32 %v3648_v13  ;;  %v3649_v9 = vadd.f32 1.0, %v7130_v48  ;;  %v6264_v12 = vpop.f32.mrb[186].mxu1  ;;  %6310 = vmatmul.mubr.msk.bf16.gmra.mrb[228].mxu0 %vm345_vm0, %v3947_v6  ;;  %6378 = vmatmul.mubr.msk.bf16.gmra.mrb[228].mxu1 %vm345_vm0, %v3947_v6  ;;  %v9108_v3 = vadd.f32 %v3831_v22, %v3767_v37  ;;  %v3834_v55 = vmul.f32 0.70710677, %v8615_v11 }
 0x35f   : > { %7151 = vrcp.f32 %v3646_v41  ;;  %v3647_v20 = vadd.f32 1.0, %v7132_v45  ;;  %v3465_v36 = vsub.f32 0.0, %v6264_v12  ;;  %v9106_v38 = vpop.f32.mrb[187].mxu0  ;;  %v3378_v24 = vpop.f32.mrb[187].mxu1  ;;  %v3586_v47 = vmul.f32 1.442695, %v3464_v21 }
 0x360   : > { %9902 = vst [vmem:[#allocation14_spill] sm:$0xff] %v9108_v3  ;;  %v7134_v7 = vpop.eup %7133  ;;  %7153 = vrcp.f32 %v3649_v9  ;;  %v3582_v17 = vmul.f32 1.442695, %v3462_v26  ;;  %v3463_v13 = vsub.f32 0.0, %v3378_v24  ;;  %v3948_v41 = vpack.c.bf16 %v9108_v3, %v9094_v61 }
 0x361   : > { %v7136_v32 = vpop.eup %7135  ;;  %7155 = vrcp.f32 %v3647_v20  ;;  %v3588_v48 = vmul.f32 1.442695, %v3465_v36  ;;  %v9113_v45 = vadd.f32 %v3832_v39, %v3768_v30  ;;  %v3835_v22 = vmul.f32 0.70710677, %v8625_v15  ;;  %v9122_v12 = vpop.f32.mrb[188].mxu0  ;;  %v9904_v20 = vld [vmem:[#allocation17_spill] sm:$0xff] }
 0x362   : > { %v7138_v6 = vpop.eup %7137  ;;  %7157 = vpow2.f32 %v3586_v47  ;;  %v3584_v31 = vmul.f32 1.442695, %v3463_v13  ;;  %6313 = vmatprep.mubr.msk.bf16.mxu0 %vm345_vm0, %v3948_v41  ;;  %6381 = vmatprep.mubr.msk.bf16.mxu1 %vm345_vm0, %v3948_v41  ;;  %v9118_v9 = vadd.f32 %v3833_v54, %v3769_v28  ;;  %v3770_v21 = vmul.f32 %v7136_v32, %v9010_v63  ;;  %v6267_v30 = vpop.f32.mrb[188].mxu1  ;;  %v9905_v54 = vld [vmem:[#allocation18_spill] sm:$0xff] }
 0x363   : > { %v7140_v37 = vpop.eup %7139  ;;  %7159 = vpow2.f32 %v3582_v17  ;;  %v3772_v26 = vmul.f32 %v7134_v7, %v9002_v52  ;;  %v3773_v15 = vmul.f32 %v7138_v6, %v9014_v0  ;;  %v3836_v36 = vmul.f32 0.70710677, %v9904_v20  ;;  %v9129_v63 = vpop.f32.mrb[189].mxu0 }
 0x364   : > { %9903 = vst [vmem:[#allocation15_spill] sm:$0xff] %v9118_v9  ;;  %v7142_v11 = vpop.eup %7141  ;;  %7161 = vpow2.f32 %v3588_v48  ;;  %v3771_v39 = vmul.f32 %v7140_v37, %v9016_v19  ;;  %v3949_v28 = vpack.c.bf16 %v9118_v9, %v9113_v45  ;;  %v3391_v52 = vpop.f32.mrb[189].mxu1  ;;  %v3837_v7 = vmul.f32 0.70710677, %v9905_v54 }
 0x365   : > { %v7144_v24 = vpop.eup %7143  ;;  %v3652_v47 = vadd.f32 1.0, %v7142_v11  ;;  %7163 = vpow2.f32 %v3584_v31  ;;  %v3468_v32 = vsub.f32 0.0, %v6267_v30  ;;  %v3466_v48 = vsub.f32 0.0, %v3391_v52  ;;  %v9132_v19 = vpop.f32.mrb[190].mxu0 }
 0x366   : > { %v7146_v17 = vpop.eup %7145  ;;  %v3650_v13 = vadd.f32 1.0, %v7144_v24  ;;  %v6268_v0 = vpop.f32.mrb[190].mxu1  ;;  %v9134_v41 = vadd.f32 %v3834_v55, %v3770_v21  ;;  %6314 = vmatmul.mubr.msk.bf16.gmra.mrb[232].mxu0 %vm345_vm0, %v3949_v28  ;;  %6382 = vmatmul.mubr.msk.bf16.gmra.mrb[232].mxu1 %vm345_vm0, %v3949_v28  ;;  %v9140_v54 = vadd.f32 %v3835_v22, %v3771_v39  ;;  %v9144_v28 = vadd.f32 %v3836_v36, %v3772_v26 }
 0x367   : > { %v7148_v6 = vpop.eup %7147  ;;  %7165 = vrcp.f32 %v3652_v47  ;;  %v3653_v31 = vadd.f32 1.0, %v7146_v17  ;;  %v3469_v37 = vsub.f32 0.0, %v6268_v0  ;;  %v9138_v11 = vpop.f32.mrb[191].mxu0  ;;  %v3594_v52 = vmul.f32 1.442695, %v3468_v32 }
 0x368   : > { %v3394_v20 = vpop.f32.mrb[191].mxu1  ;;  %v7150_v30 = vpop.eup %7149  ;;  %7167 = vrcp.f32 %v3650_v13  ;;  %v3651_v24 = vadd.f32 1.0, %v7148_v6  ;;  %v3590_v3 = vmul.f32 1.442695, %v3466_v48  ;;  %v3950_v17 = vpack.c.bf16 %v9140_v54, %v9134_v41 }
 0x369   : > { %v7152_v55 = vpop.eup %7151  ;;  %7169 = vrcp.f32 %v3653_v31  ;;  %v3596_v21 = vmul.f32 1.442695, %v3469_v37  ;;  %v3467_v47 = vsub.f32 0.0, %v3394_v20  ;;  %v3838_v0 = vmul.f32 0.70710677, %v8649_v33  ;;  %v9906_v33 = vld [vmem:[#allocation19_spill] sm:$0xff] }
 0x36a   : > { %v7154_v9 = vpop.eup %7153  ;;  %7171 = vrcp.f32 %v3651_v24  ;;  %v3839_v22 = vmul.f32 0.70710677, %v8653_v58  ;;  %6317 = vmatprep.mubr.msk.bf16.mxu0 %vm345_vm0, %v3950_v17  ;;  %6385 = vmatprep.mubr.msk.bf16.mxu1 %vm345_vm0, %v3950_v17  ;;  %v9150_v32 = vadd.f32 %v3837_v7, %v3773_v15  ;;  %v3774_v48 = vmul.f32 %v7152_v55, %v9035_v43  ;;  %v9907_v24 = vld [vmem:[#allocation20_spill] sm:$0xff] }
 0x36b   : > { %v7156_v39 = vpop.eup %7155  ;;  %7173 = vpow2.f32 %v3594_v52  ;;  %v3592_v13 = vmul.f32 1.442695, %v3467_v47  ;;  %v3776_v36 = vmul.f32 %v7150_v30, %v9030_v51  ;;  %v3840_v31 = vmul.f32 0.70710677, %v9906_v33 }
 0x36c   : > { %v7158_v6 = vpop.eup %7157  ;;  %7175 = vpow2.f32 %v3590_v3  ;;  %v3775_v26 = vmul.f32 %v7156_v39, %v9043_v27  ;;  %v3951_v20 = vpack.c.bf16 %v9150_v32, %v9144_v28  ;;  %v3841_v52 = vmul.f32 0.70710677, %v9907_v24 }
 0x36d   : > { %v7160_v58 = vpop.eup %7159  ;;  %v3656_v37 = vadd.f32 1.0, %v7158_v6  ;;  %7177 = vpow2.f32 %v3596_v21  ;;  %v9159_v43 = vadd.f32 %v3838_v0, %v3774_v48  ;;  %v3777_v30 = vmul.f32 %v7154_v9, %v9039_v60  ;;  %v9908_v60 = vld [vmem:[#allocation21_spill] sm:$0xff] }
 0x36e   : > { %v7162_v15 = vpop.eup %7161  ;;  %v3654_v7 = vadd.f32 1.0, %v7160_v58  ;;  %7179 = vpow2.f32 %v3592_v13  ;;  %v9161_v3 = vadd.f32 %v3839_v22, %v3775_v26  ;;  %6318 = vmatmul.mubr.msk.bf16.gmra.mrb[236].mxu0 %vm345_vm0, %v3951_v20  ;;  %6386 = vmatmul.mubr.msk.bf16.gmra.mrb[236].mxu1 %vm345_vm0, %v3951_v20  ;;  %v9166_v55 = vadd.f32 %v3840_v31, %v3776_v36  ;;  %v9909_v26 = vld [vmem:[#allocation22_spill] sm:$0xff]  ;;  %v9910_v58 = vld [vmem:[#allocation23_spill] sm:$0xff] }
 0x36f   : > { %v7164_v27 = vpop.eup %7163  ;;  %7181 = vrcp.f32 %v3656_v37  ;;  %v3657_v51 = vadd.f32 1.0, %v7162_v15  ;;  %v9170_v0 = vadd.f32 %v3841_v52, %v3777_v30  ;;  %v3844_v9 = vmul.f32 0.70710677, %v9908_v60  ;;  %v9911_v52 = vld [vmem:[#allocation24_spill] sm:$0xff] }
 0x370   : > { %7183 = vrcp.f32 %v3654_v7  ;;  %v3655_v21 = vadd.f32 1.0, %v7164_v27  ;;  %v3952_v47 = vpack.c.bf16 %v9161_v3, %v9159_v43  ;;  %v3842_v36 = vmul.f32 0.70710677, %v9909_v26 }
 0x371   : > { %v7166_v17 = vpop.eup %7165  ;;  %7185 = vrcp.f32 %v3657_v51  ;;  %v3953_v48 = vpack.c.bf16 %v9170_v0, %v9166_v55  ;;  %v3845_v37 = vmul.f32 0.70710677, %v9910_v58  ;;  %v3843_v15 = vmul.f32 0.70710677, %v9911_v52 }
 0x372   : > { %v7168_v22 = vpop.eup %7167  ;;  %7187 = vrcp.f32 %v3655_v21  ;;  %6321 = vmatprep.mubr.msk.bf16.mxu0 %vm345_vm0, %v3952_v47  ;;  %6389 = vmatprep.mubr.msk.bf16.mxu1 %vm345_vm0, %v3952_v47  ;;  %v3780_v39 = vmul.f32 %v7166_v17, %v9058_v62 }
 0x373   : > { %v7170_v13 = vpop.eup %7169  ;;  %v3778_v6 = vmul.f32 %v7168_v22, %v9062_v25 }
 0x374   : > { %v7172_v33 = vpop.eup %7171  ;;  %v3781_v31 = vmul.f32 %v7170_v13, %v9068_v50  ;;  %v9182_v20 = vadd.f32 %v3844_v9, %v3780_v39 }
 0x375   : > { %v7174_v24 = vpop.eup %7173  ;;  %v3779_v62 = vmul.f32 %v7172_v33, %v9075_v5  ;;  %v9186_v7 = vadd.f32 %v3842_v36, %v3778_v6  ;;  %v9913_v6 = vld [vmem:[#allocation25_spill] sm:$0xff]  ;;  %v9914_v33 = vld [vmem:[#allocation26_spill] sm:$0xff] }
 0x376   : > { %v7176_v27 = vpop.eup %7175  ;;  %v3660_v51 = vadd.f32 1.0, %v7174_v24  ;;  %v9188_v30 = vadd.f32 %v3845_v37, %v3781_v31  ;;  %6322 = vmatmul.mubr.msk.bf16.gmra.mrb[240].mxu0 %vm345_vm0, %v3953_v48  ;;  %6390 = vmatmul.mubr.msk.bf16.gmra.mrb[240].mxu1 %vm345_vm0, %v3953_v48  ;;  %v3848_v48 = vmul.f32 0.70710677, %v9913_v6  ;;  %v3846_v31 = vmul.f32 0.70710677, %v9914_v33  ;;  %v9915_v24 = vld [vmem:[#allocation27_spill] sm:$0xff] }
 0x377   : > { %v7178_v25 = vpop.eup %7177  ;;  %v3658_v21 = vadd.f32 1.0, %v7176_v27  ;;  %v9192_v50 = vadd.f32 %v3843_v15, %v3779_v62  ;;  %v3849_v62 = vmul.f32 0.70710677, %v9915_v24  ;;  %v9917_v15 = vld [vmem:[#allocation28_spill] sm:$0xff] }
 0x378   : > { %v7180_v47 = vpop.eup %7179  ;;  %7189 = vrcp.f32 %v3660_v51  ;;  %v3661_v17 = vadd.f32 1.0, %v7178_v25  ;;  %v3955_v5 = vpack.c.bf16 %v9188_v30, %v9182_v20  ;;  %v3847_v27 = vmul.f32 0.70710677, %v9917_v15 }
 0x379   : > { %9912 = vst [vmem:[#allocation16_spill] sm:$0xff] %v9192_v50  ;;  %v7182_v22 = vpop.eup %7181  ;;  %7191 = vrcp.f32 %v3658_v21  ;;  %v3659_v39 = vadd.f32 1.0, %v7180_v47  ;;  %v3954_v60 = vpack.c.bf16 %v9192_v50, %v9186_v7 }
 0x37a   : > { %v7184_v9 = vpop.eup %7183  ;;  %7193 = vrcp.f32 %v3661_v17  ;;  %v3784_v13 = vmul.f32 %v7182_v22, %v9092_v29  ;;  %v9921_v22 = vld [vmem:[#allocation29_spill] sm:$0xff] }
 0x37b   : > { %v7186_v26 = vpop.eup %7185  ;;  %7195 = vrcp.f32 %v3659_v39  ;;  %6325 = vmatprep.mubr.msk.bf16.mxu0 %vm345_vm0, %v3954_v60  ;;  %6393 = vmatprep.mubr.msk.bf16.mxu1 %vm345_vm0, %v3954_v60  ;;  %v3782_v36 = vmul.f32 %v7184_v9, %v9099_v34  ;;  %v3852_v39 = vmul.f32 0.70710677, %v9921_v22  ;;  %v9922_v9 = vld [vmem:[#allocation30_spill] sm:$0xff] }
 0x37c   : > { %v7188_v58 = vpop.eup %7187  ;;  %v3785_v37 = vmul.f32 %v7186_v26, %v9102_v49  ;;  %v9206_v52 = vadd.f32 %v3848_v48, %v3784_v13  ;;  %v3850_v13 = vmul.f32 0.70710677, %v9922_v9  ;;  %v9923_v26 = vld [vmem:[#allocation31_spill] sm:$0xff] }
 0x37d   : > { %v3783_v29 = vmul.f32 %v7188_v58, %v9106_v38  ;;  %v9210_v51 = vadd.f32 %v3846_v31, %v3782_v36  ;;  %v3853_v36 = vmul.f32 0.70710677, %v9923_v26  ;;  %v9925_v58 = vld [vmem:[#allocation32_spill] sm:$0xff] }
 0x37e   : > { %9916 = vst [vmem:[#allocation17_spill] sm:$0xff] %v9206_v52  ;;  %v9212_v25 = vadd.f32 %v3849_v62, %v3785_v37  ;;  %6326 = vmatmul.mubr.msk.bf16.gmra.mrb[244].mxu0 %vm345_vm0, %v3955_v5  ;;  %6394 = vmatmul.mubr.msk.bf16.gmra.mrb[244].mxu1 %vm345_vm0, %v3955_v5  ;;  %v3851_v37 = vmul.f32 0.70710677, %v9925_v58 }
 0x37f   : > { %9918 = vst [vmem:[#allocation18_spill] sm:$0xff] %v9210_v51  ;;  %v9216_v34 = vadd.f32 %v3847_v27, %v3783_v29 }
 0x380   : > { %9919 = vst [vmem:[#allocation19_spill] sm:$0xff] %v9212_v25  ;;  %v3957_v49 = vpack.c.bf16 %v9212_v25, %v9206_v52  ;;  %v5044_v25 = vmul.f32 0.70710677, %v8776_v59 }
 0x381   : > { %9920 = vst [vmem:[#allocation20_spill] sm:$0xff] %v9216_v34  ;;  %v3956_v21 = vpack.c.bf16 %v9216_v34, %v9210_v51 }
 0x382   : > { %v7190_v47 = vpop.eup %7189 }
 0x383   : > { %v7192_v38 = vpop.eup %7191  ;;  %6329 = vmatprep.mubr.msk.bf16.mxu0 %vm345_vm0, %v3956_v21  ;;  %6397 = vmatprep.mubr.msk.bf16.mxu1 %vm345_vm0, %v3956_v21  ;;  %v3788_v17 = vmul.f32 %v7190_v47, %v9122_v12 }
 0x384   : > { %v7194_v60 = vpop.eup %7193  ;;  %v3786_v5 = vmul.f32 %v7192_v38, %v9129_v63 }
 0x385   : > { %v7196_v6 = vpop.eup %7195  ;;  %v3789_v48 = vmul.f32 %v7194_v60, %v9132_v19  ;;  %v9230_v33 = vadd.f32 %v3852_v39, %v3788_v17 }
 0x386   : > { %v3787_v31 = vmul.f32 %v7196_v6, %v9138_v11  ;;  %v9234_v24 = vadd.f32 %v3850_v13, %v3786_v5  ;;  %6330 = vmatmul.mubr.msk.bf16.gmra.mrb[248].mxu0 %vm345_vm0, %v3957_v49  ;;  %6398 = vmatmul.mubr.msk.bf16.gmra.mrb[248].mxu1 %vm345_vm0, %v3957_v49 }
 0x387   : > { %9924 = vst [vmem:[#allocation21_spill] sm:$0xff] %v9230_v33  ;;  %v9238_v12 = vadd.f32 %v3853_v36, %v3789_v48 }
 0x388   : > { %9926 = vst [vmem:[#allocation22_spill] sm:$0xff] %v9234_v24  ;;  %v9240_v63 = vadd.f32 %v3851_v37, %v3787_v31 }
 0x389   : > { %9927 = vst [vmem:[#allocation23_spill] sm:$0xff] %v9238_v12  ;;  %v3959_v19 = vpack.c.bf16 %v9238_v12, %v9230_v33 }
 0x38a   : > { %9928 = vst [vmem:[#allocation24_spill] sm:$0xff] %v9240_v63  ;;  %v3958_v62 = vpack.c.bf16 %v9240_v63, %v9234_v24 }
 0x38c   : > { %6333 = vmatprep.mubr.msk.bf16.mxu0 %vm345_vm0, %v3958_v62  ;;  %6401 = vmatprep.mubr.msk.bf16.mxu1 %vm345_vm0, %v3958_v62 }
 0x38e   : > { %6334 = vmatmul.mubr.msk.bf16.gmra.mrb[252].mxu0 %vm345_vm0, %v3959_v19  ;;  %6402 = vmatmul.mubr.msk.bf16.gmra.mrb[252].mxu1 %vm345_vm0, %v3959_v19 }
 0x3dc   : > { %v9250_v11 = vpop.f32.mrb[192].mxu0  ;;  %v6343_v29 = vpop.f32.mrb[192].mxu1 }
 0x3dd   : > { %v4660_v15 = vsub.f32 0.0, %v6343_v29  ;;  %v9252_v27 = vpop.f32.mrb[193].mxu0  ;;  %v4403_v49 = vpop.f32.mrb[193].mxu1 }
 0x3de   : > { %v4658_v21 = vsub.f32 0.0, %v4403_v49  ;;  %v9254_v47 = vpop.f32.mrb[194].mxu0  ;;  %v6344_v38 = vpop.f32.mrb[194].mxu1 }
 0x3df   : > { %v4726_v17 = vmul.f32 1.442695, %v4660_v15  ;;  %v4661_v22 = vsub.f32 0.0, %v6344_v38  ;;  %v9256_v39 = vpop.f32.mrb[195].mxu0  ;;  %v4406_v60 = vpop.f32.mrb[195].mxu1 }
 0x3e0   : > { %v4722_v5 = vmul.f32 1.442695, %v4658_v21  ;;  %v4659_v9 = vsub.f32 0.0, %v4406_v60 }
 0x3e1   : > { %7197 = vpow2.f32 %v4726_v17  ;;  %v4728_v13 = vmul.f32 1.442695, %v4661_v22 }
 0x3e2   : > { %7199 = vpow2.f32 %v4722_v5  ;;  %v4724_v6 = vmul.f32 1.442695, %v4659_v9 }
 0x3e3   : > { %7201 = vpow2.f32 %v4728_v13 }
 0x3e4   : > { %7203 = vpow2.f32 %v4724_v6 }
 0x3e5   : > { %v9258_v48 = vpop.f32.mrb[196].mxu0  ;;  %v6347_v26 = vpop.f32.mrb[196].mxu1 }
 0x3e6   : > { %v4664_v36 = vsub.f32 0.0, %v6347_v26  ;;  %v9260_v31 = vpop.f32.mrb[197].mxu0  ;;  %v4419_v58 = vpop.f32.mrb[197].mxu1 }
 0x3e7   : > { %v4662_v37 = vsub.f32 0.0, %v4419_v58  ;;  %v9262_v19 = vpop.f32.mrb[198].mxu0  ;;  %v6348_v62 = vpop.f32.mrb[198].mxu1 }
 0x3e8   : > { %v4734_v29 = vmul.f32 1.442695, %v4664_v36  ;;  %v4665_v15 = vsub.f32 0.0, %v6348_v62  ;;  %v9264_v49 = vpop.f32.mrb[199].mxu0  ;;  %v4422_v21 = vpop.f32.mrb[199].mxu1 }
 0x3e9   : > { %v4730_v38 = vmul.f32 1.442695, %v4662_v37  ;;  %v4663_v17 = vsub.f32 0.0, %v4422_v21 }
 0x3ea   : > { %7205 = vpow2.f32 %v4734_v29  ;;  %v4736_v22 = vmul.f32 1.442695, %v4665_v15 }
 0x3eb   : > { %7207 = vpow2.f32 %v4730_v38  ;;  %v4732_v60 = vmul.f32 1.442695, %v4663_v17  ;;  %v7198_v5 = vpop.eup %7197 }
 0x3ec   : > { %7209 = vpow2.f32 %v4736_v22  ;;  %v7200_v9 = vpop.eup %7199  ;;  %v4852_v13 = vadd.f32 1.0, %v7198_v5 }
 0x3ed   : > { %7211 = vpow2.f32 %v4732_v60  ;;  %v7202_v6 = vpop.eup %7201  ;;  %v4850_v26 = vadd.f32 1.0, %v7200_v9 }
 0x3ee   : > { %v9266_v58 = vpop.f32.mrb[200].mxu0  ;;  %v6351_v36 = vpop.f32.mrb[200].mxu1  ;;  %7213 = vrcp.f32 %v4852_v13  ;;  %v4853_v63 = vadd.f32 1.0, %v7202_v6 }
 0x3ef   : > { %v7204_v62 = vpop.eup %7203  ;;  %v4668_v12 = vsub.f32 0.0, %v6351_v36  ;;  %v9268_v37 = vpop.f32.mrb[201].mxu0  ;;  %7215 = vrcp.f32 %v4850_v26 }
 0x3f0   : > { %v4435_v29 = vpop.f32.mrb[201].mxu1  ;;  %v4851_v15 = vadd.f32 1.0, %v7204_v62  ;;  %v9270_v38 = vpop.f32.mrb[202].mxu0  ;;  %7217 = vrcp.f32 %v4853_v63 }
 0x3f1   : > { %v4666_v21 = vsub.f32 0.0, %v4435_v29  ;;  %v6352_v17 = vpop.f32.mrb[202].mxu1  ;;  %v4742_v22 = vmul.f32 1.442695, %v4668_v12  ;;  %v9272_v5 = vpop.f32.mrb[203].mxu0 }
 0x3f2   : > { %v4669_v60 = vsub.f32 0.0, %v6352_v17  ;;  %v4438_v9 = vpop.f32.mrb[203].mxu1  ;;  %7219 = vrcp.f32 %v4851_v15 }
 0x3f3   : > { %v4738_v24 = vmul.f32 1.442695, %v4666_v21  ;;  %v4667_v13 = vsub.f32 0.0, %v4438_v9  ;;  %7221 = vpow2.f32 %v4742_v22 }
 0x3f4   : > { %v4744_v6 = vmul.f32 1.442695, %v4669_v60  ;;  %v7206_v36 = vpop.eup %7205 }
 0x3f5   : > { %7223 = vpow2.f32 %v4738_v24  ;;  %v4740_v33 = vmul.f32 1.442695, %v4667_v13  ;;  %v7208_v26 = vpop.eup %7207  ;;  %v4856_v62 = vadd.f32 1.0, %v7206_v36  ;;  %v5042_v24 = vmul.f32 0.70710677, %v8780_v18 }
 0x3f6   : > { %7225 = vpow2.f32 %v4744_v6  ;;  %v7210_v29 = vpop.eup %7209  ;;  %v4854_v34 = vadd.f32 1.0, %v7208_v26 }
 0x3f7   : > { %7227 = vpow2.f32 %v4740_v33  ;;  %v9274_v63 = vpop.f32.mrb[204].mxu0  ;;  %v6355_v12 = vpop.f32.mrb[204].mxu1  ;;  %v4857_v15 = vadd.f32 1.0, %v7210_v29 }
 0x3f8   : > { %v7212_v17 = vpop.eup %7211  ;;  %7229 = vrcp.f32 %v4856_v62  ;;  %v4672_v21 = vsub.f32 0.0, %v6355_v12  ;;  %v9277_v22 = vpop.f32.mrb[205].mxu0 }
 0x3f9   : > { %v4451_v60 = vpop.f32.mrb[205].mxu1  ;;  %7231 = vrcp.f32 %v4854_v34  ;;  %v4855_v9 = vadd.f32 1.0, %v7212_v17  ;;  %v9280_v6 = vpop.f32.mrb[206].mxu0 }
 0x3fa   : > { %v4670_v13 = vsub.f32 0.0, %v4451_v60  ;;  %v6356_v33 = vpop.f32.mrb[206].mxu1  ;;  %v7214_v36 = vpop.eup %7213  ;;  %7233 = vrcp.f32 %v4857_v15  ;;  %v4750_v26 = vmul.f32 1.442695, %v4672_v21  ;;  %v5045_v15 = vmul.f32 0.70710677, %v8783_v8 }
 0x3fb   : > { %v4673_v51 = vsub.f32 0.0, %v6356_v33  ;;  %v9282_v59 = vpop.f32.mrb[207].mxu0  ;;  %v4454_v62 = vpop.f32.mrb[207].mxu1  ;;  %v4980_v12 = vmul.f32 %v7214_v36, %v9250_v11  ;;  %7235 = vrcp.f32 %v4855_v9  ;;  %v5043_v36 = vmul.f32 0.70710677, %v8788_v4 }
 0x3fc   : > { %v7216_v29 = vpop.eup %7215  ;;  %v4746_v52 = vmul.f32 1.442695, %v4670_v13  ;;  %v4671_v18 = vsub.f32 0.0, %v4454_v62  ;;  %7237 = vpow2.f32 %v4750_v26  ;;  %v5048_v8 = vmul.f32 0.70710677, %v8810_v53 }
 0x3fd   : > { %v7218_v34 = vpop.eup %7217  ;;  %v4978_v17 = vmul.f32 %v7216_v29, %v9252_v27  ;;  %v4752_v21 = vmul.f32 1.442695, %v4673_v51  ;;  %v5108_v33 = vadd.f32 %v5044_v25, %v4980_v12  ;;  %v5047_v12 = vmul.f32 0.70710677, %v8818_v35 }
 0x3fe   : > { %v7220_v60 = vpop.eup %7219  ;;  %v4981_v11 = vmul.f32 %v7218_v34, %v9254_v47  ;;  %7239 = vpow2.f32 %v4746_v52  ;;  %v4748_v9 = vmul.f32 1.442695, %v4671_v18  ;;  %v5046_v52 = vmul.f32 0.70710677, %v8812_v14 }
 0x3ff   : > { %v7222_v13 = vpop.eup %7221  ;;  %v5106_v62 = vadd.f32 %v5042_v24, %v4978_v17  ;;  %v4979_v50 = vmul.f32 %v7220_v60, %v9256_v39  ;;  %7241 = vpow2.f32 %v4752_v21  ;;  %5172 = vst.msk [vmem:[%s9290_s12 + $0x10] sm:$0xff] %vm345_vm0, %v5108_v33 }
 0x400   : > { %v7224_v27 = vpop.eup %7223  ;;  %v5109_v51 = vadd.f32 %v5045_v15, %v4981_v11  ;;  %v4860_v25 = vadd.f32 1.0, %v7222_v13  ;;  %7243 = vpow2.f32 %v4748_v9  ;;  %v9303_v26 = vpop.f32.mrb[208].mxu0  ;;  %v5049_v15 = vmul.f32 0.70710677, %v8814_v46 }
 0x401   : > { %v7226_v47 = vpop.eup %7225  ;;  %5170 = vst.msk [vmem:[%s9290_s12] sm:$0xff] %vm345_vm0, %v5106_v62  ;;  %v5107_v4 = vadd.f32 %v5043_v36, %v4979_v50  ;;  %v4858_v24 = vadd.f32 1.0, %v7224_v27  ;;  %v6359_v39 = vpop.f32.mrb[208].mxu1 }
 0x402   : > { %v7228_v29 = vpop.eup %7227  ;;  %5173 = vst.msk [vmem:[%s9290_s12 + $0x18] sm:$0xff] %vm345_vm0, %v5109_v51  ;;  %7245 = vrcp.f32 %v4860_v25  ;;  %v4861_v53 = vadd.f32 1.0, %v7226_v47  ;;  %v4676_v18 = vsub.f32 0.0, %v6359_v39  ;;  %v9308_v34 = vpop.f32.mrb[209].mxu0 }
 0x403   : > { %v4467_v17 = vpop.f32.mrb[209].mxu1  ;;  %v7230_v14 = vpop.eup %7229  ;;  %5171 = vst.msk [vmem:[%s9290_s12 + $0x8] sm:$0xff] %vm345_vm0, %v5107_v4  ;;  %7247 = vrcp.f32 %v4858_v24  ;;  %v4859_v50 = vadd.f32 1.0, %v7228_v29 }
 0x404   : > { %v4674_v21 = vsub.f32 0.0, %v4467_v17  ;;  %v9313_v60 = vpop.f32.mrb[210].mxu0  ;;  %v6360_v33 = vpop.f32.mrb[210].mxu1  ;;  %v4984_v11 = vmul.f32 %v7230_v14, %v9258_v48  ;;  %7249 = vrcp.f32 %v4861_v53  ;;  %v4758_v9 = vmul.f32 1.442695, %v4676_v18 }
 0x405   : > { %v7232_v35 = vpop.eup %7231  ;;  %v4677_v13 = vsub.f32 0.0, %v6360_v33  ;;  %v9316_v36 = vpop.f32.mrb[211].mxu0  ;;  %7251 = vrcp.f32 %v4859_v50 }
 0x406   : > { %v4470_v62 = vpop.f32.mrb[211].mxu1  ;;  %v7234_v27 = vpop.eup %7233  ;;  %v4982_v46 = vmul.f32 %v7232_v35, %v9260_v31  ;;  %v4754_v51 = vmul.f32 1.442695, %v4674_v21  ;;  %v5112_v4 = vadd.f32 %v5048_v8, %v4984_v11  ;;  %7253 = vpow2.f32 %v4758_v9 }
 0x407   : > { %v4675_v25 = vsub.f32 0.0, %v4470_v62  ;;  %v7236_v47 = vpop.eup %7235  ;;  %v4985_v24 = vmul.f32 %v7234_v27, %v9262_v19  ;;  %v4760_v48 = vmul.f32 1.442695, %v4677_v13  ;;  %v9929_v27 = vld [vmem:[#allocation34_spill] sm:$0xff] }
 0x408   : > { %v7238_v39 = vpop.eup %7237  ;;  %v5110_v29 = vadd.f32 %v5046_v52, %v4982_v46  ;;  %v4983_v53 = vmul.f32 %v7236_v47, %v9264_v49  ;;  %7255 = vpow2.f32 %v4754_v51  ;;  %5176 = vst.msk [vmem:[%s9290_s12 + $0x30] sm:$0xff] %vm345_vm0, %v5112_v4  ;;  %v5050_v52 = vmul.f32 0.70710677, %v8842_v44 }
 0x409   : > { %v4756_v18 = vmul.f32 1.442695, %v4675_v25  ;;  %v7240_v17 = vpop.eup %7239  ;;  %v5113_v31 = vadd.f32 %v5049_v15, %v4985_v24  ;;  %v4864_v14 = vadd.f32 1.0, %v7238_v39  ;;  %7257 = vpow2.f32 %v4760_v48  ;;  %v9328_v33 = vpop.f32.mrb[212].mxu0 }
 0x40a   : > { %v7242_v50 = vpop.eup %7241  ;;  %5174 = vst.msk [vmem:[%s9290_s12 + $0x20] sm:$0xff] %vm345_vm0, %v5110_v29  ;;  %v5111_v19 = vadd.f32 %v5047_v12, %v4983_v53  ;;  %v4862_v8 = vadd.f32 1.0, %v7240_v17  ;;  %v6363_v35 = vpop.f32.mrb[212].mxu1  ;;  %v5052_v15 = vmul.f32 0.70710677, %v8844_v23  ;;  %v9930_v53 = vld [vmem:[#allocation33_spill] sm:$0xff] }
 0x40b   : > { %7259 = vpow2.f32 %v4756_v18  ;;  %v7244_v21 = vpop.eup %7243  ;;  %5177 = vst.msk [vmem:[%s9290_s12 + $0x38] sm:$0xff] %vm345_vm0, %v5113_v31  ;;  %v4865_v49 = vadd.f32 1.0, %v7242_v50  ;;  %v4680_v9 = vsub.f32 0.0, %v6363_v35  ;;  %v9333_v12 = vpop.f32.mrb[213].mxu0  ;;  %v5051_v44 = vmul.f32 0.70710677, %v9929_v27 }
 0x40c   : > { %7261 = vrcp.f32 %v4864_v14  ;;  %5175 = vst.msk [vmem:[%s9290_s12 + $0x28] sm:$0xff] %vm345_vm0, %v5111_v19  ;;  %v4863_v11 = vadd.f32 1.0, %v7244_v21  ;;  %v4483_v13 = vpop.f32.mrb[213].mxu1  ;;  %v7246_v62 = vpop.eup %7245  ;;  %v5053_v18 = vmul.f32 0.70710677, %v9930_v53 }
 0x40d   : > { %7263 = vrcp.f32 %v4862_v8  ;;  %v4678_v46 = vsub.f32 0.0, %v4483_v13  ;;  %v9336_v51 = vpop.f32.mrb[214].mxu0  ;;  %v6364_v25 = vpop.f32.mrb[214].mxu1  ;;  %v4988_v4 = vmul.f32 %v7246_v62, %v9266_v58  ;;  %v4766_v23 = vmul.f32 1.442695, %v4680_v9 }
 0x40e   : > { %7265 = vrcp.f32 %v4865_v49  ;;  %v7248_v47 = vpop.eup %7247  ;;  %v4681_v24 = vsub.f32 0.0, %v6364_v25  ;;  %v9339_v48 = vpop.f32.mrb[215].mxu0 }
 0x40f   : > { %7267 = vrcp.f32 %v4863_v11  ;;  %v4486_v39 = vpop.f32.mrb[215].mxu1  ;;  %v7250_v29 = vpop.eup %7249  ;;  %v4986_v17 = vmul.f32 %v7248_v47, %v9268_v37  ;;  %v4762_v31 = vmul.f32 1.442695, %v4678_v46  ;;  %v5116_v19 = vadd.f32 %v5052_v15, %v4988_v4  ;;  %v9931_v47 = vld [vmem:[#allocation40_spill] sm:$0xff] }
 0x410   : > { %v4679_v14 = vsub.f32 0.0, %v4486_v39  ;;  %v7252_v50 = vpop.eup %7251  ;;  %v4989_v8 = vmul.f32 %v7250_v29, %v9270_v38  ;;  %7269 = vpow2.f32 %v4766_v23  ;;  %v4768_v58 = vmul.f32 1.442695, %v4681_v24 }
 0x411   : > { %v7254_v21 = vpop.eup %7253  ;;  %v5114_v49 = vadd.f32 %v5050_v52, %v4986_v17  ;;  %v4987_v35 = vmul.f32 %v7252_v50, %v9272_v5  ;;  %7271 = vpow2.f32 %v4762_v31  ;;  %5180 = vst.msk [vmem:[%s9290_s12 + $0x50] sm:$0xff] %vm345_vm0, %v5116_v19  ;;  %v5056_v4 = vmul.f32 0.70710677, %v9931_v47 }
 0x412   : > { %v4764_v11 = vmul.f32 1.442695, %v4679_v14  ;;  %v7256_v9 = vpop.eup %7255  ;;  %v5117_v37 = vadd.f32 %v5053_v18, %v4989_v8  ;;  %v4868_v13 = vadd.f32 1.0, %v7254_v21  ;;  %7273 = vpow2.f32 %v4768_v58  ;;  %v9933_v18 = vld [vmem:[#allocation3_spill] sm:$0xff]  ;;  %v9934_v8 = vld [vmem:[#allocation37_spill] sm:$0xff] }
 0x413   : > { %v7258_v62 = vpop.eup %7257  ;;  %5178 = vst.msk [vmem:[%s9290_s12 + $0x40] sm:$0xff] %vm345_vm0, %v5114_v49  ;;  %v5115_v38 = vadd.f32 %v5051_v44, %v4987_v35  ;;  %v4866_v15 = vadd.f32 1.0, %v7256_v9  ;;  %v9932_v44 = vld [vmem:[#allocation35_spill] sm:$0xff]  ;;  %v5057_v17 = vmul.f32 0.70710677, %v9933_v18 }
 0x414   : > { %7275 = vpow2.f32 %v4764_v11  ;;  %5181 = vst.msk [vmem:[%s9290_s12 + $0x58] sm:$0xff] %vm345_vm0, %v5117_v37  ;;  %v4869_v5 = vadd.f32 1.0, %v7258_v62  ;;  %v5054_v39 = vmul.f32 0.70710677, %v9932_v44 }
 0x415   : > { %v7260_v27 = vpop.eup %7259  ;;  %7277 = vrcp.f32 %v4868_v13  ;;  %5179 = vst.msk [vmem:[%s9290_s12 + $0x48] sm:$0xff] %vm345_vm0, %v5115_v38 }
 0x416   : > { %v7262_v52 = vpop.eup %7261  ;;  %7279 = vrcp.f32 %v4866_v15  ;;  %v4867_v46 = vadd.f32 1.0, %v7260_v27  ;;  %v9359_v50 = vpop.f32.mrb[216].mxu0 }
 0x417   : > { %v7264_v25 = vpop.eup %7263  ;;  %v4992_v23 = vmul.f32 %v7262_v52, %v9274_v63  ;;  %7281 = vrcp.f32 %v4869_v5  ;;  %v6367_v19 = vpop.f32.mrb[216].mxu1  ;;  %v5055_v63 = vmul.f32 0.70710677, %v9934_v8 }
 0x418   : > { %v7266_v24 = vpop.eup %7265  ;;  %v4990_v29 = vmul.f32 %v7264_v25, %v9277_v22  ;;  %7283 = vrcp.f32 %v4867_v46  ;;  %v4684_v49 = vsub.f32 0.0, %v6367_v19  ;;  %v9363_v35 = vpop.f32.mrb[217].mxu0 }
 0x419   : > { %v7268_v53 = vpop.eup %7267  ;;  %v5120_v31 = vadd.f32 %v5056_v4, %v4992_v23  ;;  %v4993_v14 = vmul.f32 %v7266_v24, %v9280_v6  ;;  %v4499_v22 = vpop.f32.mrb[217].mxu1  ;;  %v9935_v4 = vld [vmem:[#allocation36_spill] sm:$0xff] }
 0x41a   : > { %v5118_v58 = vadd.f32 %v5054_v39, %v4990_v29  ;;  %v4991_v21 = vmul.f32 %v7268_v53, %v9282_v59  ;;  %v7270_v11 = vpop.eup %7269  ;;  %v4682_v37 = vsub.f32 0.0, %v4499_v22  ;;  %v9367_v6 = vpop.f32.mrb[218].mxu0  ;;  %v5060_v23 = vmul.f32 0.70710677, %v9935_v4  ;;  %v9936_v29 = vld [vmem:[#allocation2_spill] sm:$0xff] }
 0x41b   : > { %5184 = vst.msk [vmem:[%s9290_s12 + $0x70] sm:$0xff] %vm345_vm0, %v5120_v31  ;;  %v5121_v9 = vadd.f32 %v5057_v17, %v4993_v14  ;;  %v6368_v13 = vpop.f32.mrb[218].mxu1  ;;  %v7272_v62 = vpop.eup %7271  ;;  %v4872_v15 = vadd.f32 1.0, %v7270_v11  ;;  %v4774_v44 = vmul.f32 1.442695, %v4684_v49  ;;  %v9937_v14 = vld [vmem:[#allocation42_spill] sm:$0xff] }
 0x41c   : > { %5182 = vst.msk [vmem:[%s9290_s12 + $0x60] sm:$0xff] %vm345_vm0, %v5118_v58  ;;  %v5119_v38 = vadd.f32 %v5055_v63, %v4991_v21  ;;  %v4685_v59 = vsub.f32 0.0, %v6368_v13  ;;  %v9371_v27 = vpop.f32.mrb[219].mxu0  ;;  %v4502_v5 = vpop.f32.mrb[219].mxu1  ;;  %v4870_v46 = vadd.f32 1.0, %v7272_v62  ;;  %v9938_v21 = vld [vmem:[#allocation41_spill] sm:$0xff] }
 0x41d   : > { %v7274_v52 = vpop.eup %7273  ;;  %5185 = vst.msk [vmem:[%s9290_s12 + $0x78] sm:$0xff] %vm345_vm0, %v5121_v9  ;;  %v4683_v25 = vsub.f32 0.0, %v4502_v5  ;;  %7285 = vrcp.f32 %v4872_v15  ;;  %v5058_v53 = vmul.f32 0.70710677, %v9936_v29  ;;  %v4770_v17 = vmul.f32 1.442695, %v4682_v37 }
 0x41e   : > { %v7276_v47 = vpop.eup %7275  ;;  %5183 = vst.msk [vmem:[%s9290_s12 + $0x68] sm:$0xff] %vm345_vm0, %v5119_v38  ;;  %v4873_v24 = vadd.f32 1.0, %v7274_v52  ;;  %7287 = vrcp.f32 %v4870_v46  ;;  %v5059_v19 = vmul.f32 0.70710677, %v9937_v14  ;;  %v4776_v63 = vmul.f32 1.442695, %v4685_v59 }
 0x41f   : > { %v7278_v39 = vpop.eup %7277  ;;  %v4871_v18 = vadd.f32 1.0, %v7276_v47  ;;  %v5061_v22 = vmul.f32 0.70710677, %v9938_v21  ;;  %v4772_v49 = vmul.f32 1.442695, %v4683_v25  ;;  %v9383_v9 = vpop.f32.mrb[220].mxu0 }
 0x420   : > { %v7280_v31 = vpop.eup %7279  ;;  %v4996_v8 = vmul.f32 %v7278_v39, %v9303_v26  ;;  %7289 = vrcp.f32 %v4873_v24  ;;  %v6371_v13 = vpop.f32.mrb[220].mxu1 }
 0x421   : > { %v7282_v58 = vpop.eup %7281  ;;  %v4994_v11 = vmul.f32 %v7280_v31, %v9308_v34  ;;  %7291 = vrcp.f32 %v4871_v18  ;;  %v4688_v15 = vsub.f32 0.0, %v6371_v13  ;;  %v9386_v26 = vpop.f32.mrb[221].mxu0  ;;  %v9939_v31 = vld [vmem:[#allocation5_spill] sm:$0xff] }
 0x422   : > { %v7284_v62 = vpop.eup %7283  ;;  %v5124_v37 = vadd.f32 %v5060_v23, %v4996_v8  ;;  %v4997_v38 = vmul.f32 %v7282_v58, %v9313_v60  ;;  %7293 = vpow2.f32 %v4774_v44  ;;  %v4515_v59 = vpop.f32.mrb[221].mxu1  ;;  %v5064_v14 = vmul.f32 0.70710677, %v9939_v31 }
 0x423   : > { %v5122_v5 = vadd.f32 %v5058_v53, %v4994_v11  ;;  %v4995_v52 = vmul.f32 %v7284_v62, %v9316_v36  ;;  %7295 = vpow2.f32 %v4770_v17  ;;  %v4686_v34 = vsub.f32 0.0, %v4515_v59  ;;  %v9389_v46 = vpop.f32.mrb[222].mxu0  ;;  %v6372_v25 = vpop.f32.mrb[222].mxu1  ;;  %v9941_v11 = vld [vmem:[#allocation4_spill] sm:$0xff]  ;;  %v9942_v59 = vld [vmem:[#allocation38_spill] sm:$0xff] }
 0x424   : > { %5188 = vst.msk [vmem:[%s9290_s12 + $0x90] sm:$0xff] %vm345_vm0, %v5124_v37  ;;  %v5125_v47 = vadd.f32 %v5061_v22, %v4997_v38  ;;  %7297 = vpow2.f32 %v4776_v63  ;;  %v4782_v60 = vmul.f32 1.442695, %v4688_v15  ;;  %v4689_v4 = vsub.f32 0.0, %v6372_v25  ;;  %v9393_v23 = vpop.f32.mrb[223].mxu0  ;;  %v4518_v24 = vpop.f32.mrb[223].mxu1 }
 0x425   : > { %5186 = vst.msk [vmem:[%s9290_s12 + $0x80] sm:$0xff] %vm345_vm0, %v5122_v5  ;;  %v5123_v44 = vadd.f32 %v5059_v19, %v4995_v52  ;;  %7299 = vpow2.f32 %v4772_v49  ;;  %v4778_v36 = vmul.f32 1.442695, %v4686_v34  ;;  %v4687_v39 = vsub.f32 0.0, %v4518_v24  ;;  %v9940_v63 = vld [vmem:[#allocation39_spill] sm:$0xff] }
 0x426   : > { %5189 = vst.msk [vmem:[%s9290_s12 + $0x98] sm:$0xff] %vm345_vm0, %v5125_v47  ;;  %7301 = vpow2.f32 %v4782_v60  ;;  %v4784_v29 = vmul.f32 1.442695, %v4689_v4  ;;  %v5062_v58 = vmul.f32 0.70710677, %v9940_v63 }
 0x427   : > { %5187 = vst.msk [vmem:[%s9290_s12 + $0x88] sm:$0xff] %vm345_vm0, %v5123_v44  ;;  %7303 = vpow2.f32 %v4778_v36  ;;  %v4780_v53 = vmul.f32 1.442695, %v4687_v39  ;;  %v7286_v18 = vpop.eup %7285  ;;  %v5065_v49 = vmul.f32 0.70710677, %v9941_v11 }
 0x428   : > { %7305 = vpow2.f32 %v4784_v29  ;;  %v7288_v17 = vpop.eup %7287  ;;  %v5000_v8 = vmul.f32 %v7286_v18, %v9328_v33  ;;  %v5063_v33 = vmul.f32 0.70710677, %v9942_v59 }
 0x429   : > { %7307 = vpow2.f32 %v4780_v53  ;;  %v4998_v21 = vmul.f32 %v7288_v17, %v9333_v12  ;;  %v9407_v37 = vpop.f32.mrb[224].mxu0  ;;  %v6375_v38 = vpop.f32.mrb[224].mxu1 }
 0x42a   : > { %v7290_v19 = vpop.eup %7289  ;;  %v5128_v13 = vadd.f32 %v5064_v14, %v5000_v8  ;;  %v9411_v34 = vpop.f32.mrb[225].mxu0  ;;  %v4692_v18 = vsub.f32 0.0, %v6375_v38 }
 0x42b   : > { %v7292_v22 = vpop.eup %7291  ;;  %v5001_v62 = vmul.f32 %v7290_v19, %v9336_v51  ;;  %v5126_v5 = vadd.f32 %v5062_v58, %v4998_v21  ;;  %v4531_v12 = vpop.f32.mrb[225].mxu1 }
 0x42c   : > { %v7294_v15 = vpop.eup %7293  ;;  %v4999_v52 = vmul.f32 %v7292_v22, %v9339_v48  ;;  %5192 = vst.msk [vmem:[%s9290_s12 + $0xb0] sm:$0xff] %vm345_vm0, %v5128_v13  ;;  %v9415_v60 = vpop.f32.mrb[226].mxu0  ;;  %v4690_v14 = vsub.f32 0.0, %v4531_v12  ;;  %v4790_v13 = vmul.f32 1.442695, %v4692_v18 }
 0x42d   : > { %v7296_v25 = vpop.eup %7295  ;;  %v5129_v47 = vadd.f32 %v5065_v49, %v5001_v62  ;;  %v4876_v51 = vadd.f32 1.0, %v7294_v15  ;;  %v6376_v4 = vpop.f32.mrb[226].mxu1  ;;  %5190 = vst.msk [vmem:[%s9290_s12 + $0xa0] sm:$0xff] %vm345_vm0, %v5126_v5 }
 0x42e   : > { %v7298_v24 = vpop.eup %7297  ;;  %v5127_v44 = vadd.f32 %v5063_v33, %v4999_v52  ;;  %v4874_v36 = vadd.f32 1.0, %v7296_v25  ;;  %v9419_v39 = vpop.f32.mrb[227].mxu0  ;;  %v4693_v63 = vsub.f32 0.0, %v6376_v4  ;;  %v4786_v38 = vmul.f32 1.442695, %v4690_v14 }
 0x42f   : > { %v4534_v48 = vpop.f32.mrb[227].mxu1  ;;  %v7300_v29 = vpop.eup %7299  ;;  %5193 = vst.msk [vmem:[%s9290_s12 + $0xb8] sm:$0xff] %vm345_vm0, %v5129_v47  ;;  %7309 = vrcp.f32 %v4876_v51  ;;  %v4877_v53 = vadd.f32 1.0, %v7298_v24 }
 0x430   : > { %v7302_v17 = vpop.eup %7301  ;;  %5191 = vst.msk [vmem:[%s9290_s12 + $0xa8] sm:$0xff] %vm345_vm0, %v5127_v44  ;;  %7311 = vrcp.f32 %v4874_v36  ;;  %v4875_v31 = vadd.f32 1.0, %v7300_v29  ;;  %v4691_v22 = vsub.f32 0.0, %v4534_v48  ;;  %v4792_v33 = vmul.f32 1.442695, %v4693_v63 }
 0x431   : > { %v7304_v8 = vpop.eup %7303  ;;  %7313 = vrcp.f32 %v4877_v53  ;;  %v4880_v19 = vadd.f32 1.0, %v7302_v17  ;;  %v9425_v15 = vpop.f32.mrb[228].mxu0  ;;  %v5066_v29 = vmul.f32 0.70710677, %v8968_v16  ;;  %v5070_v16 = vmul.f32 0.70710677, %v8998_v40 }
 0x432   : > { %v7306_v58 = vpop.eup %7305  ;;  %7315 = vrcp.f32 %v4875_v31  ;;  %v4878_v21 = vadd.f32 1.0, %v7304_v8  ;;  %v6379_v59 = vpop.f32.mrb[228].mxu1  ;;  %v4788_v25 = vmul.f32 1.442695, %v4691_v22  ;;  %v9943_v31 = vld [vmem:[#allocation6_spill] sm:$0xff]  ;;  %v9944_v8 = vld [vmem:[#allocation7_spill] sm:$0xff] }
 0x433   : > { %v7308_v11 = vpop.eup %7307  ;;  %7317 = vrcp.f32 %v4880_v19  ;;  %v4881_v49 = vadd.f32 1.0, %v7306_v58  ;;  %v4696_v5 = vsub.f32 0.0, %v6379_v59  ;;  %v9427_v52 = vpop.f32.mrb[229].mxu0  ;;  %v5068_v14 = vmul.f32 0.70710677, %v9943_v31 }
 0x434   : > { %7319 = vrcp.f32 %v4878_v21  ;;  %v4879_v62 = vadd.f32 1.0, %v7308_v11  ;;  %v4547_v12 = vpop.f32.mrb[229].mxu1  ;;  %v9429_v51 = vpop.f32.mrb[230].mxu0  ;;  %v5069_v19 = vmul.f32 0.70710677, %v9944_v8 }
 0x435   : > { %7321 = vrcp.f32 %v4881_v49  ;;  %v4694_v47 = vsub.f32 0.0, %v4547_v12  ;;  %v6380_v4 = vpop.f32.mrb[230].mxu1  ;;  %v4798_v24 = vmul.f32 1.442695, %v4696_v5  ;;  %v9431_v36 = vpop.f32.mrb[231].mxu0  ;;  %v9946_v5 = vld [vmem:[#allocation8_spill] sm:$0xff] }
 0x436   : > { %7323 = vrcp.f32 %v4879_v62  ;;  %v4697_v44 = vsub.f32 0.0, %v6380_v4  ;;  %v4550_v48 = vpop.f32.mrb[231].mxu1  ;;  %v5067_v21 = vmul.f32 0.70710677, %v8989_v56 }
 0x437   : > { %7325 = vpow2.f32 %v4790_v13  ;;  %v4794_v53 = vmul.f32 1.442695, %v4694_v47  ;;  %v4695_v18 = vsub.f32 0.0, %v4550_v48  ;;  %v9945_v13 = vld [vmem:[#allocation12_spill] sm:$0xff] }
 0x438   : > { %7327 = vpow2.f32 %v4786_v38  ;;  %v4800_v63 = vmul.f32 1.442695, %v4697_v44  ;;  %v5071_v62 = vmul.f32 0.70710677, %v9945_v13 }
 0x439   : > { %v7310_v17 = vpop.eup %7309  ;;  %7329 = vpow2.f32 %v4792_v33  ;;  %v4796_v11 = vmul.f32 1.442695, %v4695_v18  ;;  %v5072_v33 = vmul.f32 0.70710677, %v9946_v5  ;;  %v9443_v56 = vpop.f32.mrb[232].mxu0 }
 0x43a   : > { %v7312_v58 = vpop.eup %7311  ;;  %v5004_v22 = vmul.f32 %v7310_v17, %v9359_v50  ;;  %7331 = vpow2.f32 %v4788_v25  ;;  %v6383_v50 = vpop.f32.mrb[232].mxu1 }
 0x43b   : > { %v7314_v49 = vpop.eup %7313  ;;  %v5002_v38 = vmul.f32 %v7312_v58, %v9363_v35  ;;  %7333 = vpow2.f32 %v4798_v24  ;;  %v4700_v44 = vsub.f32 0.0, %v6383_v50  ;;  %v9446_v35 = vpop.f32.mrb[233].mxu0 }
 0x43c   : > { %v7316_v59 = vpop.eup %7315  ;;  %v5132_v12 = vadd.f32 %v5068_v14, %v5004_v22  ;;  %v5005_v47 = vmul.f32 %v7314_v49, %v9367_v6  ;;  %7335 = vpow2.f32 %v4794_v53  ;;  %v4563_v24 = vpop.f32.mrb[233].mxu1 }
 0x43d   : > { %v7318_v25 = vpop.eup %7317  ;;  %v5130_v4 = vadd.f32 %v5066_v29, %v5002_v38  ;;  %v5003_v40 = vmul.f32 %v7316_v59, %v9371_v27  ;;  %7337 = vpow2.f32 %v4800_v63  ;;  %v4698_v53 = vsub.f32 0.0, %v4563_v24  ;;  %v9451_v17 = vpop.f32.mrb[234].mxu0 }
 0x43e   : > { %v7320_v48 = vpop.eup %7319  ;;  %5196 = vst.msk [vmem:[%s9290_s12 + $0xd0] sm:$0xff] %vm345_vm0, %v5132_v12  ;;  %v5133_v18 = vadd.f32 %v5069_v19, %v5005_v47  ;;  %v5008_v6 = vmul.f32 %v7318_v25, %v9383_v9  ;;  %7339 = vpow2.f32 %v4796_v11  ;;  %v6384_v31 = vpop.f32.mrb[234].mxu1  ;;  %v4806_v8 = vmul.f32 1.442695, %v4700_v44  ;;  %v9947_v9 = vld [vmem:[#allocation9_spill] sm:$0xff] }
 0x43f   : > { %v7322_v29 = vpop.eup %7321  ;;  %5194 = vst.msk [vmem:[%s9290_s12 + $0xc0] sm:$0xff] %vm345_vm0, %v5130_v4  ;;  %v5131_v27 = vadd.f32 %v5067_v21, %v5003_v40  ;;  %v5006_v14 = vmul.f32 %v7320_v48, %v9386_v26  ;;  %v4701_v63 = vsub.f32 0.0, %v6384_v31  ;;  %v9456_v58 = vpop.f32.mrb[235].mxu0  ;;  %v5073_v11 = vmul.f32 0.70710677, %v9947_v9 }
 0x440   : > { %v4566_v19 = vpop.f32.mrb[235].mxu1  ;;  %v7324_v22 = vpop.eup %7323  ;;  %5197 = vst.msk [vmem:[%s9290_s12 + $0xd8] sm:$0xff] %vm345_vm0, %v5133_v18  ;;  %v5136_v49 = vadd.f32 %v5072_v33, %v5008_v6  ;;  %v5009_v13 = vmul.f32 %v7322_v29, %v9389_v46  ;;  %v4802_v38 = vmul.f32 1.442695, %v4698_v53  ;;  %7341 = vpow2.f32 %v4806_v8 }
 0x441   : > { %v7326_v59 = vpop.eup %7325  ;;  %5195 = vst.msk [vmem:[%s9290_s12 + $0xc8] sm:$0xff] %vm345_vm0, %v5131_v27  ;;  %v5134_v26 = vadd.f32 %v5070_v16, %v5006_v14  ;;  %v5007_v21 = vmul.f32 %v7324_v22, %v9393_v23  ;;  %v4808_v5 = vmul.f32 1.442695, %v4701_v63  ;;  %v4699_v16 = vsub.f32 0.0, %v4566_v19  ;;  %v9471_v40 = vpop.f32.mrb[236].mxu0 }
 0x442   : > { %v7328_v12 = vpop.eup %7327  ;;  %5200 = vst.msk [vmem:[%s9290_s12 + $0xf0] sm:$0xff] %vm345_vm0, %v5136_v49  ;;  %v5137_v47 = vadd.f32 %v5073_v11, %v5009_v13  ;;  %v4884_v50 = vadd.f32 1.0, %v7326_v59  ;;  %7343 = vpow2.f32 %v4802_v38  ;;  %v6387_v44 = vpop.f32.mrb[236].mxu1  ;;  %v5074_v8 = vmul.f32 0.70710677, %v9037_v2  ;;  %v9948_v11 = vld [vmem:[#allocation10_spill] sm:$0xff] }
 0x443   : > { %v7330_v33 = vpop.eup %7329  ;;  %5198 = vst.msk [vmem:[%s9290_s12 + $0xe0] sm:$0xff] %vm345_vm0, %v5134_v26  ;;  %v5135_v46 = vadd.f32 %v5071_v62, %v5007_v21  ;;  %v4882_v25 = vadd.f32 1.0, %v7328_v12  ;;  %7345 = vpow2.f32 %v4808_v5  ;;  %v4704_v18 = vsub.f32 0.0, %v6387_v44  ;;  %v9475_v6 = vpop.f32.mrb[237].mxu0  ;;  %v9949_v5 = vld [vmem:[#allocation13_spill] sm:$0xff] }
 0x444   : > { %v7332_v4 = vpop.eup %7331  ;;  %5201 = vst.msk [vmem:[%s9290_s12 + $0xf8] sm:$0xff] %vm345_vm0, %v5137_v47  ;;  %7347 = vrcp.f32 %v4884_v50  ;;  %v4885_v23 = vadd.f32 1.0, %v7330_v33  ;;  %v4579_v62 = vpop.f32.mrb[237].mxu1  ;;  %v5076_v49 = vmul.f32 0.70710677, %v9948_v11  ;;  %v9950_v47 = vld [vmem:[#allocation11_spill] sm:$0xff] }
 0x445   : > { %v7334_v24 = vpop.eup %7333  ;;  %5199 = vst.msk [vmem:[%s9290_s12 + $0xe8] sm:$0xff] %vm345_vm0, %v5135_v46  ;;  %7349 = vrcp.f32 %v4882_v25  ;;  %v4883_v48 = vadd.f32 1.0, %v7332_v4  ;;  %v9477_v29 = vpop.f32.mrb[238].mxu0  ;;  %v4804_v38 = vmul.f32 1.442695, %v4699_v16  ;;  %v4702_v21 = vsub.f32 0.0, %v4579_v62 }
 0x446   : > { %v7336_v53 = vpop.eup %7335  ;;  %7351 = vrcp.f32 %v4885_v23  ;;  %v4888_v31 = vadd.f32 1.0, %v7334_v24  ;;  %v6388_v27 = vpop.f32.mrb[238].mxu1  ;;  %v4814_v26 = vmul.f32 1.442695, %v4704_v18  ;;  %v5075_v12 = vmul.f32 0.70710677, %v9949_v5 }
 0x447   : > { %v7338_v14 = vpop.eup %7337  ;;  %7353 = vrcp.f32 %v4883_v48  ;;  %v4886_v63 = vadd.f32 1.0, %v7336_v53  ;;  %v9480_v19 = vpop.f32.mrb[239].mxu0  ;;  %v5077_v50 = vmul.f32 0.70710677, %v9950_v47  ;;  %v4705_v2 = vsub.f32 0.0, %v6388_v27 }
 0x448   : > { %v4582_v22 = vpop.f32.mrb[239].mxu1  ;;  %v7340_v9 = vpop.eup %7339  ;;  %7355 = vrcp.f32 %v4888_v31  ;;  %v4889_v13 = vadd.f32 1.0, %v7338_v14  ;;  %v9486_v46 = vmul.f32 0.70710677, %v9064_v57  ;;  %v9489_v25 = vmul.f32 0.70710677, %v9070_v10 }
 0x449   : > { %7357 = vrcp.f32 %v4886_v63  ;;  %v4887_v59 = vadd.f32 1.0, %v7340_v9  ;;  %v4703_v4 = vsub.f32 0.0, %v4582_v22  ;;  %v5080_v16 = vmul.f32 0.70710677, %v9084_v1  ;;  %v9492_v24 = vpop.f32.mrb[240].mxu0  ;;  %v6391_v48 = vpop.f32.mrb[240].mxu1 }
 0x44a   : > { %7359 = vrcp.f32 %v4889_v13  ;;  %v7342_v33 = vpop.eup %7341  ;;  %v4810_v53 = vmul.f32 1.442695, %v4702_v21  ;;  %v4708_v31 = vsub.f32 0.0, %v6391_v48  ;;  %v9494_v57 = vpop.f32.mrb[241].mxu0  ;;  %v4816_v63 = vmul.f32 1.442695, %v4705_v2 }
 0x44b   : > { %7361 = vrcp.f32 %v4887_v59  ;;  %v4892_v44 = vadd.f32 1.0, %v7342_v33  ;;  %v4595_v27 = vpop.f32.mrb[241].mxu1  ;;  %v9496_v9 = vpop.f32.mrb[242].mxu0 }
 0x44c   : > { %v7344_v23 = vpop.eup %7343  ;;  %7363 = vpow2.f32 %v4804_v38  ;;  %v4706_v22 = vsub.f32 0.0, %v4595_v27  ;;  %v6392_v1 = vpop.f32.mrb[242].mxu1  ;;  %v4812_v38 = vmul.f32 1.442695, %v4703_v4  ;;  %v4822_v33 = vmul.f32 1.442695, %v4708_v31 }
 0x44d   : > { %v7346_v18 = vpop.eup %7345  ;;  %v4890_v62 = vadd.f32 1.0, %v7344_v23  ;;  %7365 = vpow2.f32 %v4814_v26  ;;  %v4709_v59 = vsub.f32 0.0, %v6392_v1  ;;  %v9499_v26 = vpop.f32.mrb[243].mxu0 }
 0x44e   : > { %v7348_v10 = vpop.eup %7347  ;;  %7367 = vrcp.f32 %v4892_v44  ;;  %v4893_v14 = vadd.f32 1.0, %v7346_v18  ;;  %v4598_v21 = vpop.f32.mrb[243].mxu1 }
 0x44f   : > { %v7350_v11 = vpop.eup %7349  ;;  %v5012_v13 = vmul.f32 %v7348_v10, %v9407_v37  ;;  %7369 = vrcp.f32 %v4890_v62  ;;  %v4707_v2 = vsub.f32 0.0, %v4598_v21  ;;  %v4818_v37 = vmul.f32 1.442695, %v4706_v22 }
 0x450   : > { %v7352_v5 = vpop.eup %7351  ;;  %v5010_v47 = vmul.f32 %v7350_v11, %v9411_v34  ;;  %7371 = vrcp.f32 %v4893_v14  ;;  %v4824_v27 = vmul.f32 1.442695, %v4709_v59 }
 0x451   : > { %v7354_v23 = vpop.eup %7353  ;;  %v5140_v44 = vadd.f32 %v5076_v49, %v5012_v13  ;;  %v5013_v48 = vmul.f32 %v7352_v5, %v9415_v60  ;;  %7373 = vpow2.f32 %v4810_v53  ;;  %v4820_v49 = vmul.f32 1.442695, %v4707_v2  ;;  %v9511_v53 = vpop.f32.mrb[244].mxu0 }
 0x452   : > { %v7356_v18 = vpop.eup %7355  ;;  %v5138_v4 = vadd.f32 %v5074_v8, %v5010_v47  ;;  %v5011_v62 = vmul.f32 %v7354_v23, %v9419_v39  ;;  %7375 = vpow2.f32 %v4816_v63  ;;  %v5081_v60 = vmul.f32 0.70710677, %v9088_v42  ;;  %v6395_v63 = vpop.f32.mrb[244].mxu1 }
 0x453   : > { %v7358_v10 = vpop.eup %7357  ;;  %5204 = vst.msk [vmem:[%s9290_s12 + $0x110] sm:$0xff] %vm345_vm0, %v5140_v44  ;;  %v5141_v34 = vadd.f32 %v5077_v50, %v5013_v48  ;;  %v5016_v31 = vmul.f32 %v7356_v18, %v9425_v15  ;;  %7377 = vpow2.f32 %v4812_v38  ;;  %v4712_v1 = vsub.f32 0.0, %v6395_v63  ;;  %v9516_v42 = vpop.f32.mrb[245].mxu0 }
 0x454   : > { %v7360_v14 = vpop.eup %7359  ;;  %5202 = vst.msk [vmem:[%s9290_s12 + $0x100] sm:$0xff] %vm345_vm0, %v5138_v4  ;;  %v5139_v8 = vadd.f32 %v5075_v12, %v5011_v62  ;;  %v5014_v39 = vmul.f32 %v7358_v10, %v9427_v52  ;;  %7379 = vpow2.f32 %v4822_v33  ;;  %v4611_v11 = vpop.f32.mrb[245].mxu1  ;;  %v5084_v18 = vmul.f32 0.70710677, %v9113_v45 }
 0x455   : > { %v7362_v22 = vpop.eup %7361  ;;  %5205 = vst.msk [vmem:[%s9290_s12 + $0x118] sm:$0xff] %vm345_vm0, %v5141_v34  ;;  %v5144_v15 = vadd.f32 %v5080_v16, %v5016_v31  ;;  %v5017_v50 = vmul.f32 %v7360_v14, %v9429_v51  ;;  %7381 = vpow2.f32 %v4818_v37  ;;  %v4710_v38 = vsub.f32 0.0, %v4611_v11  ;;  %v9522_v59 = vpop.f32.mrb[246].mxu0  ;;  %v9951_v31 = vld [vmem:[#allocation15_spill] sm:$0xff] }
 0x456   : > { %v7364_v13 = vpop.eup %7363  ;;  %5203 = vst.msk [vmem:[%s9290_s12 + $0x108] sm:$0xff] %vm345_vm0, %v5139_v8  ;;  %v5142_v52 = vadd.f32 %v9486_v46, %v5014_v39  ;;  %v5015_v12 = vmul.f32 %v7362_v22, %v9431_v36  ;;  %7383 = vpow2.f32 %v4824_v27  ;;  %v6396_v16 = vpop.f32.mrb[246].mxu1  ;;  %v4830_v47 = vmul.f32 1.442695, %v4712_v1 }
 0x457   : > { %v7366_v21 = vpop.eup %7365  ;;  %5208 = vst.msk [vmem:[%s9290_s12 + $0x130] sm:$0xff] %vm345_vm0, %v5144_v15  ;;  %v5145_v51 = vadd.f32 %v5081_v60, %v5017_v50  ;;  %v4891_v5 = vadd.f32 1.0, %v7364_v13  ;;  %7385 = vpow2.f32 %v4820_v49  ;;  %v9526_v33 = vpop.f32.mrb[247].mxu0  ;;  %v4826_v44 = vmul.f32 1.442695, %v4710_v38 }
 0x458   : > { %v4614_v2 = vpop.f32.mrb[247].mxu1  ;;  %v7368_v46 = vpop.eup %7367  ;;  %5206 = vst.msk [vmem:[%s9290_s12 + $0x120] sm:$0xff] %vm345_vm0, %v5142_v52  ;;  %v5143_v36 = vadd.f32 %v9489_v25, %v5015_v12  ;;  %v4896_v23 = vadd.f32 1.0, %v7366_v21  ;;  %v4713_v48 = vsub.f32 0.0, %v6396_v16  ;;  %v5082_v27 = vmul.f32 0.70710677, %v9094_v61 }
 0x459   : > { %v7370_v37 = vpop.eup %7369  ;;  %5209 = vst.msk [vmem:[%s9290_s12 + $0x138] sm:$0xff] %vm345_vm0, %v5145_v51  ;;  %v5020_v4 = vmul.f32 %v7368_v46, %v9443_v56  ;;  %7387 = vrcp.f32 %v4891_v5  ;;  %v5085_v49 = vmul.f32 0.70710677, %v9951_v31  ;;  %v9541_v61 = vpop.f32.mrb[248].mxu0  ;;  %v4711_v15 = vsub.f32 0.0, %v4614_v2 }
 0x45a   : > { %v7372_v62 = vpop.eup %7371  ;;  %5207 = vst.msk [vmem:[%s9290_s12 + $0x128] sm:$0xff] %vm345_vm0, %v5143_v36  ;;  %v5018_v10 = vmul.f32 %v7370_v37, %v9446_v35  ;;  %7389 = vrcp.f32 %v4896_v23  ;;  %v4832_v25 = vmul.f32 1.442695, %v4713_v48  ;;  %v6399_v39 = vpop.f32.mrb[248].mxu1  ;;  %v9952_v36 = vld [vmem:[#allocation14_spill] sm:$0xff] }
 0x45b   : > { %v7374_v34 = vpop.eup %7373  ;;  %v5148_v14 = vadd.f32 %v5084_v18, %v5020_v4  ;;  %v5021_v45 = vmul.f32 %v7372_v62, %v9451_v17  ;;  %7391 = vpow2.f32 %v4830_v47  ;;  %v9545_v50 = vpop.f32.mrb[249].mxu0  ;;  %v4716_v13 = vsub.f32 0.0, %v6399_v39 }
 0x45c   : > { %v7376_v56 = vpop.eup %7375  ;;  %v5146_v60 = vadd.f32 %v5082_v27, %v5018_v10  ;;  %v4894_v8 = vadd.f32 1.0, %v7374_v34  ;;  %7393 = vpow2.f32 %v4826_v44  ;;  %v4627_v17 = vpop.f32.mrb[249].mxu1  ;;  %v5083_v23 = vmul.f32 0.70710677, %v9952_v36 }
 0x45d   : > { %v7378_v63 = vpop.eup %7377  ;;  %5212 = vst.msk [vmem:[%s9290_s12 + $0x150] sm:$0xff] %vm345_vm0, %v5148_v14  ;;  %v5149_v35 = vadd.f32 %v5085_v49, %v5021_v45  ;;  %v4897_v22 = vadd.f32 1.0, %v7376_v56  ;;  %7395 = vpow2.f32 %v4832_v25  ;;  %v9549_v52 = vpop.f32.mrb[250].mxu0  ;;  %v4714_v21 = vsub.f32 0.0, %v4627_v17 }
 0x45e   : > { %v7380_v1 = vpop.eup %7379  ;;  %5210 = vst.msk [vmem:[%s9290_s12 + $0x140] sm:$0xff] %vm345_vm0, %v5146_v60  ;;  %7397 = vrcp.f32 %v4894_v8  ;;  %v4895_v11 = vadd.f32 1.0, %v7378_v63  ;;  %v6400_v12 = vpop.f32.mrb[250].mxu1  ;;  %v4828_v48 = vmul.f32 1.442695, %v4711_v15 }
 0x45f   : > { %v7382_v38 = vpop.eup %7381  ;;  %5213 = vst.msk [vmem:[%s9290_s12 + $0x158] sm:$0xff] %vm345_vm0, %v5149_v35  ;;  %7399 = vrcp.f32 %v4897_v22  ;;  %v4900_v16 = vadd.f32 1.0, %v7380_v1  ;;  %v9553_v51 = vpop.f32.mrb[251].mxu0  ;;  %v5086_v37 = vmul.f32 0.70710677, %v9134_v41  ;;  %v4717_v25 = vsub.f32 0.0, %v6400_v12 }
 0x460   : > { %v4630_v5 = vpop.f32.mrb[251].mxu1  ;;  %v7384_v47 = vpop.eup %7383  ;;  %7401 = vrcp.f32 %v4895_v11  ;;  %v4898_v2 = vadd.f32 1.0, %v7382_v38  ;;  %v4838_v4 = vmul.f32 1.442695, %v4716_v13  ;;  %v5087_v27 = vmul.f32 0.70710677, %v9140_v54 }
 0x461   : > { %v7386_v46 = vpop.eup %7385  ;;  %7403 = vrcp.f32 %v4900_v16  ;;  %v4901_v44 = vadd.f32 1.0, %v7384_v47  ;;  %v4834_v10 = vmul.f32 1.442695, %v4714_v21  ;;  %v5088_v31 = vmul.f32 0.70710677, %v9144_v28  ;;  %v9560_v45 = vpop.f32.mrb[252].mxu0 }
 0x462   : > { %7405 = vrcp.f32 %v4898_v2  ;;  %v4899_v18 = vadd.f32 1.0, %v7386_v46  ;;  %v4715_v14 = vsub.f32 0.0, %v4630_v5  ;;  %v6403_v56 = vpop.f32.mrb[252].mxu1  ;;  %v5089_v60 = vmul.f32 0.70710677, %v9150_v32  ;;  %v9564_v39 = vpop.f32.mrb[253].mxu0 }
 0x463   : > { %v7388_v62 = vpop.eup %7387  ;;  %7407 = vrcp.f32 %v4901_v44  ;;  %v4720_v54 = vsub.f32 0.0, %v6403_v56  ;;  %v4643_v63 = vpop.f32.mrb[253].mxu1  ;;  %v5092_v44 = vmul.f32 0.70710677, %v9166_v55  ;;  %v5093_v56 = vmul.f32 0.70710677, %v9170_v0 }
 0x464   : > { %v7390_v34 = vpop.eup %7389  ;;  %v5019_v49 = vmul.f32 %v7388_v62, %v9456_v58  ;;  %7409 = vrcp.f32 %v4899_v18  ;;  %v4718_v58 = vsub.f32 0.0, %v4643_v63  ;;  %v9566_v15 = vpop.f32.mrb[254].mxu0  ;;  %v4836_v21 = vmul.f32 1.442695, %v4715_v14 }
 0x465   : > { %v7392_v41 = vpop.eup %7391  ;;  %v5024_v8 = vmul.f32 %v7390_v34, %v9471_v40  ;;  %7411 = vpow2.f32 %v4828_v48  ;;  %v6404_v17 = vpop.f32.mrb[254].mxu1  ;;  %v4840_v40 = vmul.f32 1.442695, %v4717_v25  ;;  %v4846_v46 = vmul.f32 1.442695, %v4720_v54 }
 0x466   : > { %v7394_v35 = vpop.eup %7393  ;;  %v5147_v28 = vadd.f32 %v5083_v23, %v5019_v49  ;;  %v4904_v22 = vadd.f32 1.0, %v7392_v41  ;;  %7413 = vpow2.f32 %v4838_v4  ;;  %v9568_v13 = vpop.f32.mrb[255].mxu0  ;;  %v4721_v5 = vsub.f32 0.0, %v6404_v17 }
 0x467   : > { %v7396_v1 = vpop.eup %7395  ;;  %v5152_v11 = vadd.f32 %v5088_v31, %v5024_v8  ;;  %v4902_v32 = vadd.f32 1.0, %v7394_v35  ;;  %7415 = vpow2.f32 %v4834_v10  ;;  %v4646_v12 = vpop.f32.mrb[255].mxu1  ;;  %v4842_v18 = vmul.f32 1.442695, %v4718_v58 }
 0x468   : > { %v7398_v38 = vpop.eup %7397  ;;  %5211 = vst.msk [vmem:[%s9290_s12 + $0x148] sm:$0xff] %vm345_vm0, %v5147_v28  ;;  %7417 = vrcp.f32 %v4904_v22  ;;  %v4905_v16 = vadd.f32 1.0, %v7396_v1  ;;  %v4719_v36 = vsub.f32 0.0, %v4646_v12  ;;  %v4848_v25 = vmul.f32 1.442695, %v4721_v5 }
 0x469   : > { %v7400_v47 = vpop.eup %7399  ;;  %5216 = vst.msk [vmem:[%s9290_s12 + $0x170] sm:$0xff] %vm345_vm0, %v5152_v11  ;;  %v5022_v2 = vmul.f32 %v7398_v38, %v9475_v6  ;;  %7419 = vrcp.f32 %v4902_v32  ;;  %v5090_v14 = vmul.f32 0.70710677, %v9159_v43  ;;  %v5091_v43 = vmul.f32 0.70710677, %v9161_v3 }
 0x46a   : > { %v7402_v23 = vpop.eup %7401  ;;  %v5025_v48 = vmul.f32 %v7400_v47, %v9477_v29  ;;  %7421 = vrcp.f32 %v4905_v16  ;;  %v4844_v49 = vmul.f32 1.442695, %v4719_v36  ;;  %v5094_v1 = vmul.f32 0.70710677, %v9186_v7 }
 0x46b   : > { %v7404_v4 = vpop.eup %7403  ;;  %v5150_v62 = vadd.f32 %v5086_v37, %v5022_v2  ;;  %v5023_v10 = vmul.f32 %v7402_v23, %v9480_v19  ;;  %7423 = vpow2.f32 %v4840_v40  ;;  %v5097_v40 = vmul.f32 0.70710677, %v9188_v30 }
 0x46c   : > { %v7406_v34 = vpop.eup %7405  ;;  %v5153_v6 = vadd.f32 %v5089_v60, %v5025_v48  ;;  %v5028_v31 = vmul.f32 %v7404_v4, %v9492_v24  ;;  %7425 = vpow2.f32 %v4836_v21  ;;  %v9953_v48 = vld [vmem:[#allocation16_spill] sm:$0xff] }
 0x46d   : > { %v7408_v55 = vpop.eup %7407  ;;  %5214 = vst.msk [vmem:[%s9290_s12 + $0x160] sm:$0xff] %vm345_vm0, %v5150_v62  ;;  %v5151_v29 = vadd.f32 %v5087_v27, %v5023_v10  ;;  %v5026_v37 = vmul.f32 %v7406_v34, %v9494_v57  ;;  %7427 = vpow2.f32 %v4846_v46  ;;  %v9954_v10 = vld [vmem:[#allocation17_spill] sm:$0xff] }
 0x46e   : > { %v7410_v19 = vpop.eup %7409  ;;  %5217 = vst.msk [vmem:[%s9290_s12 + $0x178] sm:$0xff] %vm345_vm0, %v5153_v6  ;;  %v5156_v24 = vadd.f32 %v5092_v44, %v5028_v31  ;;  %v5029_v41 = vmul.f32 %v7408_v55, %v9496_v9  ;;  %7429 = vpow2.f32 %v4842_v18  ;;  %v5095_v18 = vmul.f32 0.70710677, %v9953_v48  ;;  %v9955_v6 = vld [vmem:[#allocation18_spill] sm:$0xff] }
 0x46f   : > { %v7412_v60 = vpop.eup %7411  ;;  %5215 = vst.msk [vmem:[%s9290_s12 + $0x168] sm:$0xff] %vm345_vm0, %v5151_v29  ;;  %v5154_v27 = vadd.f32 %v5090_v14, %v5026_v37  ;;  %v5027_v57 = vmul.f32 %v7410_v19, %v9499_v26  ;;  %7431 = vpow2.f32 %v4848_v25  ;;  %v5096_v26 = vmul.f32 0.70710677, %v9182_v20 }
 0x470   : > { %v7414_v8 = vpop.eup %7413  ;;  %5220 = vst.msk [vmem:[%s9290_s12 + $0x190] sm:$0xff] %vm345_vm0, %v5156_v24  ;;  %v5157_v0 = vadd.f32 %v5093_v56, %v5029_v41  ;;  %v4903_v54 = vadd.f32 1.0, %v7412_v60  ;;  %7433 = vpow2.f32 %v4844_v49  ;;  %v5100_v25 = vmul.f32 0.70710677, %v9954_v10  ;;  %v9957_v41 = vld [vmem:[#allocation20_spill] sm:$0xff] }
 0x471   : > { %v7416_v63 = vpop.eup %7415  ;;  %5218 = vst.msk [vmem:[%s9290_s12 + $0x180] sm:$0xff] %vm345_vm0, %v5154_v27  ;;  %v5155_v9 = vadd.f32 %v5091_v43, %v5027_v57  ;;  %v4908_v35 = vadd.f32 1.0, %v7414_v8  ;;  %v5098_v31 = vmul.f32 0.70710677, %v9955_v6  ;;  %v5099_v60 = vmul.f32 0.70710677, %v9957_v41 }
 0x472   : > { %v7418_v28 = vpop.eup %7417  ;;  %5221 = vst.msk [vmem:[%s9290_s12 + $0x198] sm:$0xff] %vm345_vm0, %v5157_v0  ;;  %7435 = vrcp.f32 %v4903_v54  ;;  %v4906_v3 = vadd.f32 1.0, %v7416_v63  ;;  %v9958_v27 = vld [vmem:[#allocation21_spill] sm:$0xff]  ;;  %v9959_v63 = vld [vmem:[#allocation22_spill] sm:$0xff] }
 0x473   : > { %v7420_v22 = vpop.eup %7419  ;;  %5219 = vst.msk [vmem:[%s9290_s12 + $0x188] sm:$0xff] %vm345_vm0, %v5155_v9  ;;  %v5032_v58 = vmul.f32 %v7418_v28, %v9511_v53  ;;  %7437 = vrcp.f32 %v4908_v35  ;;  %v5104_v57 = vmul.f32 0.70710677, %v9958_v27  ;;  %v5102_v9 = vmul.f32 0.70710677, %v9959_v63 }
 0x474   : > { %v7422_v17 = vpop.eup %7421  ;;  %v5030_v11 = vmul.f32 %v7420_v22, %v9516_v42  ;;  %7439 = vrcp.f32 %v4906_v3  ;;  %v9960_v3 = vld [vmem:[#allocation23_spill] sm:$0xff] }
 0x475   : > { %v7424_v32 = vpop.eup %7423  ;;  %v5160_v12 = vadd.f32 %v5096_v26, %v5032_v58  ;;  %v5033_v20 = vmul.f32 %v7422_v17, %v9522_v59  ;;  %v5105_v22 = vmul.f32 0.70710677, %v9960_v3  ;;  %v9961_v58 = vld [vmem:[#allocation24_spill] sm:$0xff] }
 0x476   : > { %v7426_v38 = vpop.eup %7425  ;;  %v5158_v16 = vadd.f32 %v5094_v1, %v5030_v11  ;;  %v4909_v21 = vadd.f32 1.0, %v7424_v32  ;;  %v5103_v17 = vmul.f32 0.70710677, %v9961_v58 }
 0x477   : > { %v7428_v5 = vpop.eup %7427  ;;  %5224 = vst.msk [vmem:[%s9290_s12 + $0x1b0] sm:$0xff] %vm345_vm0, %v5160_v12  ;;  %v5161_v53 = vadd.f32 %v5097_v40, %v5033_v20  ;;  %v4907_v47 = vadd.f32 1.0, %v7426_v38 }
 0x478   : > { %v7430_v2 = vpop.eup %7429  ;;  %5222 = vst.msk [vmem:[%s9290_s12 + $0x1a0] sm:$0xff] %vm345_vm0, %v5158_v16  ;;  %7441 = vrcp.f32 %v4909_v21  ;;  %v4912_v7 = vadd.f32 1.0, %v7428_v5 }
 0x479   : > { %v7432_v42 = vpop.eup %7431  ;;  %5225 = vst.msk [vmem:[%s9290_s12 + $0x1b8] sm:$0xff] %vm345_vm0, %v5161_v53  ;;  %7443 = vrcp.f32 %v4907_v47  ;;  %v4910_v30 = vadd.f32 1.0, %v7430_v2 }
 0x47a   : > { %v7434_v46 = vpop.eup %7433  ;;  %7445 = vrcp.f32 %v4912_v7  ;;  %v4913_v59 = vadd.f32 1.0, %v7432_v42 }
 0x47b   : > { %7447 = vrcp.f32 %v4910_v30  ;;  %v4911_v36 = vadd.f32 1.0, %v7434_v46 }
 0x47c   : > { %v7436_v23 = vpop.eup %7435  ;;  %7449 = vrcp.f32 %v4913_v59 }
 0x47d   : > { %v7438_v44 = vpop.eup %7437  ;;  %v5031_v4 = vmul.f32 %v7436_v23, %v9526_v33  ;;  %7451 = vrcp.f32 %v4911_v36  ;;  %v9956_v33 = vld [vmem:[#allocation19_spill] sm:$0xff] }
 0x47e   : > { %v7440_v62 = vpop.eup %7439  ;;  %v5036_v34 = vmul.f32 %v7438_v44, %v9541_v61  ;;  %v5101_v56 = vmul.f32 0.70710677, %v9956_v33 }
 0x47f   : > { %v5159_v49 = vadd.f32 %v5095_v18, %v5031_v4  ;;  %v5034_v55 = vmul.f32 %v7440_v62, %v9545_v50 }
 0x480   : > { %v5164_v14 = vadd.f32 %v5100_v25, %v5036_v34 }
 0x481   : > { %5223 = vst.msk [vmem:[%s9290_s12 + $0x1a8] sm:$0xff] %vm345_vm0, %v5159_v49  ;;  %v5162_v29 = vadd.f32 %v5098_v31, %v5034_v55 }
 0x482   : > { %v7442_v37 = vpop.eup %7441  ;;  %5228 = vst.msk [vmem:[%s9290_s12 + $0x1d0] sm:$0xff] %vm345_vm0, %v5164_v14 }
 0x483   : > { %v7444_v19 = vpop.eup %7443  ;;  %5226 = vst.msk [vmem:[%s9290_s12 + $0x1c0] sm:$0xff] %vm345_vm0, %v5162_v29  ;;  %v5037_v61 = vmul.f32 %v7442_v37, %v9549_v52 }
 0x484   : > { %v7446_v24 = vpop.eup %7445  ;;  %v5035_v50 = vmul.f32 %v7444_v19, %v9553_v51 }
 0x485   : > { %v7448_v43 = vpop.eup %7447  ;;  %v5165_v8 = vadd.f32 %v5101_v56, %v5037_v61  ;;  %v5040_v0 = vmul.f32 %v7446_v24, %v9560_v45 }
 0x486   : > { %v7450_v54 = vpop.eup %7449  ;;  %v5163_v35 = vadd.f32 %v5099_v60, %v5035_v50  ;;  %v5038_v52 = vmul.f32 %v7448_v43, %v9564_v39 }
 0x487   : > { %v7452_v28 = vpop.eup %7451  ;;  %5229 = vst.msk [vmem:[%s9290_s12 + $0x1d8] sm:$0xff] %vm345_vm0, %v5165_v8  ;;  %v5168_v51 = vadd.f32 %v5104_v57, %v5040_v0  ;;  %v5041_v26 = vmul.f32 %v7450_v54, %v9566_v15 }
 0x488   : > { %5227 = vst.msk [vmem:[%s9290_s12 + $0x1c8] sm:$0xff] %vm345_vm0, %v5163_v35  ;;  %v5166_v45 = vadd.f32 %v5102_v9, %v5038_v52  ;;  %v5039_v1 = vmul.f32 %v7452_v28, %v9568_v13 }
 0x489   : > { %5232 = vst.msk [vmem:[%s9290_s12 + $0x1f0] sm:$0xff] %vm345_vm0, %v5168_v51  ;;  %v5169_v11 = vadd.f32 %v5105_v22, %v5041_v26 }
 0x48a   : > { %5230 = vst.msk [vmem:[%s9290_s12 + $0x1e0] sm:$0xff] %vm345_vm0, %v5166_v45  ;;  %v5167_v39 = vadd.f32 %v5103_v17, %v5039_v1 }
 0x48b   : > { %5233 = vst.msk [vmem:[%s9290_s12 + $0x1f8] sm:$0xff] %vm345_vm0, %v5169_v11 }
 0x48c   : > { %5231 = vst.msk [vmem:[%s9290_s12 + $0x1e8] sm:$0xff] %vm345_vm0, %v5167_v39 }
 0x48d PF: > { %s15_s18 = sadd.s32 1, %s7459_s18  }
 0x48e   : > { %p12_p4 = scmp.ge.s32.totalorder %s15_s18, 4  }
 0x490   :  { %14 = sbr.rel (!%p12_p4) target bundleno = 1 (0x1), region = 74 }

</bundles_post_ra>
